<compile_context>
chip_gen: v7x
topology: tpu7x:2x2x1
jax: 0.10.0
libtpu: 0.0.40
codegen_flags: <defaults>
</compile_context>

<pallas_src>
import math

import jax
import jax.numpy as jnp
from jax.experimental import pallas as pl
from jax.experimental.pallas import tpu as pltpu

BLOCK_ROWS = 2048            # original batch rows per grid step (>= 2048)
COMPUTE_DTYPE = jnp.bfloat16  # MXU operand dtype; accumulation is f32


def _group_size(n_out: int) -> int:
    # Fold enough rows that the output slab's last dim is lane-dense
    # (multiple of 128) when possible, while bounding the block-diagonal
    # weight expansion (g <= 32  ->  W2_dense <= 2 MiB in bf16).
    g = 128 // math.gcd(n_out, 128)
    return min(g, 32)


def _adv_kernel(x_ref, w1_ref, b1_ref, w2_ref, b2_ref, w3_ref, b3_ref, o_ref):
    # x_ref: (TBg, g*n_in) bf16 -- lane-dense grouped batch rows.
    # Weights are block-diagonal kron(I_g, W) in bf16; biases are f32, tiled.
    x = x_ref[...]

    h = jnp.dot(x, w1_ref[...], preferred_element_type=jnp.float32) + b1_ref[...]
    h = jnp.tanh(h).astype(x.dtype)                       # back to bf16 for MXU

    h = jnp.dot(h, w2_ref[...], preferred_element_type=jnp.float32) + b2_ref[...]
    h = jnp.tanh(h).astype(x.dtype)

    z = jnp.dot(h, w3_ref[...], preferred_element_type=jnp.float32) + b3_ref[...]
    # sigmoid(z) = 1 / (1 + exp(-z)); approx reciprocal rides the EUP slot.
    o_ref[...] = pl.reciprocal(1.0 + jnp.exp(-z), approx=True).astype(o_ref.dtype)


def prepare_params(params, compute_dtype=COMPUTE_DTYPE):
    """One-time transform: block-diagonal (kron) bf16 weights + tiled f32 biases."""
    n_out = params["w3"].shape[1]
    g = _group_size(n_out)

    def dense(w, b):
        wd = jnp.kron(jnp.eye(g, dtype=jnp.float32), w.astype(jnp.float32))
        bd = jnp.tile(b.reshape(1, -1).astype(jnp.float32), (1, g))
        return wd.astype(compute_dtype), bd

    w1d, b1d = dense(params["w1"], params["b1"])
    w2d, b2d = dense(params["w2"], params["b2"])
    w3d, b3d = dense(params["w3"], params["b3"])
    return {"w1": w1d, "b1": b1d, "w2": w2d, "b2": b2d, "w3": w3d, "b3": b3d}


@jax.jit
def adv_forward(x, dense_params):
    """x: (B, n_in). dense_params: output of prepare_params. Returns (B, n_out) f32."""
    w1d, b1d = dense_params["w1"], dense_params["b1"]
    w2d, b2d = dense_params["w2"], dense_params["b2"]
    w3d, b3d = dense_params["w3"], dense_params["b3"]

    B, n_in = x.shape
    g = w1d.shape[0] // n_in          # rows folded per grouped row
    n_out = w3d.shape[1] // g
    cdt = w1d.dtype

    # Pad the batch to a whole number of groups (padded rows sliced off below).
    bp = ((B + g - 1) // g) * g
    if bp != B:
        x = jnp.pad(x, ((0, bp - B), (0, 0)))

    # Lane-dense grouped view: row-major reshape, no data movement.
    # (In production, ship x already in bf16 to halve its HBM traffic.)
    xg = x.astype(cdt).reshape(bp // g, g * n_in)
    gb = bp // g

    # Batch tile: BLOCK_ROWS original rows (power-of-two grouped rows >= 16,
    # so the (8,128) block rule holds), capped at the full extent.
    tbg = min(BLOCK_ROWS // g, gb)
    grid = (pl.cdiv(gb, tbg),)

    def tile_spec(shape):             # per-step batch tiles
        return pl.BlockSpec(shape, lambda i: (i, 0))

    def resident(arr):                # constant index_map -> fetched once, stays in VMEM
        return pl.BlockSpec(arr.shape, lambda i: (0, 0))

    out_g = pl.pallas_call(
        _adv_kernel,
        out_shape=jax.ShapeDtypeStruct((gb, g * n_out), jnp.float32),
        grid=grid,
        in_specs=[
            tile_spec((tbg, g * n_in)),
            resident(w1d), resident(b1d),
            resident(w2d), resident(b2d),
            resident(w3d), resident(b3d),
        ],
        out_specs=tile_spec((tbg, g * n_out)),
        compiler_params=pltpu.CompilerParams(
            dimension_semantics=("parallel",)),   # megacore on v7x
    )(xg, w1d, b1d, w2d, b2d, w3d, b3d)

    # Free row-major view back to (B, n_out).
    return out_g.reshape(bp, n_out)[:B]


def init_params(key, n_in, n_out):
    """Mimic nn.Linear's U(-1/sqrt(fan_in), 1/sqrt(fan_in)); store W as (in, out)."""
    ks = jax.random.split(key, 6)

    def linear(kw, kb, fan_in, fan_out):
        bound = 1.0 / jnp.sqrt(fan_in)
        w = jax.random.uniform(kw, (fan_in, fan_out), jnp.float32, -bound, bound)
        b = jax.random.uniform(kb, (1, fan_out), jnp.float32, -bound, bound)
        return w, b

    w1, b1 = linear(ks[0], ks[1], n_in, 32)
    w2, b2 = linear(ks[2], ks[3], 32, 32)
    w3, b3 = linear(ks[4], ks[5], 32, n_out)
    return {"w1": w1, "b1": b1, "w2": w2, "b2": b2, "w3": w3, "b3": b3}


def adv_reference(x, params):
    h = jnp.tanh(x @ params["w1"] + params["b1"])
    h = jnp.tanh(h @ params["w2"] + params["b2"])
    return jax.nn.sigmoid(h @ params["w3"] + params["b3"])


if __name__ == "__main__":
    key = jax.random.PRNGKey(0)
    k_x, k_p = jax.random.split(key)

    n_in, n_out = 16, 4
    params = init_params(k_p, n_in, n_out)
    dense_params = prepare_params(params)          # one-time weight expansion

    # Small run (exercises the full-array single-block path) and a larger run
    # (exercises multi-step pipelined grid: gb=128 grouped rows, 2 tiles).
    for B in (8, 4096):
        x = jax.random.normal(jax.random.fold_in(k_x, B), (B, n_in), jnp.float32)

        out = adv_forward(x, dense_params)
        jax.block_until_ready(out)

        ref = adv_reference(x, params)             # full-f32 reference
        assert out.shape == (B, n_out), out.shape
        err = float(jnp.max(jnp.abs(out - ref)))
        # bf16 operands + approx reciprocal => ~5e-3 worst-case deviation.
        assert err < 2e-2, f"mismatch vs reference at B={B}: max abs err {err}"

    print("KERNEL_OK")
</pallas_src>

<mosaic_0001>
module attributes {stable_mosaic.version = 11 : i64} {
  func.func @_adv_kernel(%arg0: i32, %arg1: memref<1x512xbf16, #tpu.memory_space<vmem>>, %arg2: memref<512x1024xbf16, #tpu.memory_space<vmem>>, %arg3: memref<1x1024xf32, #tpu.memory_space<vmem>>, %arg4: memref<1024x1024xbf16, #tpu.memory_space<vmem>>, %arg5: memref<1x1024xf32, #tpu.memory_space<vmem>>, %arg6: memref<1024x128xbf16, #tpu.memory_space<vmem>>, %arg7: memref<1x128xf32, #tpu.memory_space<vmem>>, %arg8: memref<1x128xf32, #tpu.memory_space<vmem>>) attributes {dimension_semantics = [#tpu.dimension_semantics<parallel>], iteration_bounds = array<i64: 1>, scalar_prefetch = 0 : i64, scratch_operands = 0 : i64, tpu.core_type = #tpu.core_type<tc>, window_params = [{transform_indices = @transform_0, window_bounds = array<i64: 1, 512>}, {pipeline_mode = #tpu.pipeline_mode<synchronous>, transform_indices = @transform_1, window_bounds = array<i64: 512, 1024>}, {pipeline_mode = #tpu.pipeline_mode<synchronous>, transform_indices = @transform_2, window_bounds = array<i64: 1, 1024>}, {pipeline_mode = #tpu.pipeline_mode<synchronous>, transform_indices = @transform_3, window_bounds = array<i64: 1024, 1024>}, {pipeline_mode = #tpu.pipeline_mode<synchronous>, transform_indices = @transform_4, window_bounds = array<i64: 1, 1024>}, {pipeline_mode = #tpu.pipeline_mode<synchronous>, transform_indices = @transform_5, window_bounds = array<i64: 1024, 128>}, {pipeline_mode = #tpu.pipeline_mode<synchronous>, transform_indices = @transform_6, window_bounds = array<i64: 1, 128>}, {transform_indices = @transform_7, window_bounds = array<i64: 1, 128>}]} {
    %c0 = arith.constant 0 : index
    %c0_0 = arith.constant 0 : index
    %0 = vector.load %arg1[%c0, %c0_0] : memref<1x512xbf16, #tpu.memory_space<vmem>>, vector<1x512xbf16>
    %c0_1 = arith.constant 0 : index
    %c0_2 = arith.constant 0 : index
    %1 = vector.load %arg2[%c0_1, %c0_2] : memref<512x1024xbf16, #tpu.memory_space<vmem>>, vector<512x1024xbf16>
    %cst = arith.constant dense<0.000000e+00> : vector<1x1024xf32>
    %2 = tpu.matmul %0, %1, %cst {dimension_numbers = #tpu.dot_dimension_numbers<[1], [0], [0], [1], [0, 0, 1, 1], [], []>} : vector<1x512xbf16>, vector<512x1024xbf16>, vector<1x1024xf32> -> vector<1x1024xf32>
    %c0_3 = arith.constant 0 : index
    %c0_4 = arith.constant 0 : index
    %3 = vector.load %arg3[%c0_3, %c0_4] : memref<1x1024xf32, #tpu.memory_space<vmem>>, vector<1x1024xf32>
    %4 = arith.addf %2, %3 : vector<1x1024xf32>
    %5 = math.tanh %4 : vector<1x1024xf32>
    %6 = arith.truncf %5 : vector<1x1024xf32> to vector<1x1024xbf16>
    %c0_5 = arith.constant 0 : index
    %c0_6 = arith.constant 0 : index
    %7 = vector.load %arg4[%c0_5, %c0_6] : memref<1024x1024xbf16, #tpu.memory_space<vmem>>, vector<1024x1024xbf16>
    %cst_7 = arith.constant dense<0.000000e+00> : vector<1x1024xf32>
    %8 = tpu.matmul %6, %7, %cst_7 {dimension_numbers = #tpu.dot_dimension_numbers<[1], [0], [0], [1], [0, 0, 1, 1], [], []>} : vector<1x1024xbf16>, vector<1024x1024xbf16>, vector<1x1024xf32> -> vector<1x1024xf32>
    %c0_8 = arith.constant 0 : index
    %c0_9 = arith.constant 0 : index
    %9 = vector.load %arg5[%c0_8, %c0_9] : memref<1x1024xf32, #tpu.memory_space<vmem>>, vector<1x1024xf32>
    %10 = arith.addf %8, %9 : vector<1x1024xf32>
    %11 = math.tanh %10 : vector<1x1024xf32>
    %12 = arith.truncf %11 : vector<1x1024xf32> to vector<1x1024xbf16>
    %c0_10 = arith.constant 0 : index
    %c0_11 = arith.constant 0 : index
    %13 = vector.load %arg6[%c0_10, %c0_11] : memref<1024x128xbf16, #tpu.memory_space<vmem>>, vector<1024x128xbf16>
    %cst_12 = arith.constant dense<0.000000e+00> : vector<1x128xf32>
    %14 = tpu.matmul %12, %13, %cst_12 {dimension_numbers = #tpu.dot_dimension_numbers<[1], [0], [0], [1], [0, 0, 1, 1], [], []>} : vector<1x1024xbf16>, vector<1024x128xbf16>, vector<1x128xf32> -> vector<1x128xf32>
    %c0_13 = arith.constant 0 : index
    %c0_14 = arith.constant 0 : index
    %15 = vector.load %arg7[%c0_13, %c0_14] : memref<1x128xf32, #tpu.memory_space<vmem>>, vector<1x128xf32>
    %16 = arith.addf %14, %15 : vector<1x128xf32>
    %cst_15 = arith.constant 0.000000e+00 : f32
    %17 = vector.broadcast %cst_15 : f32 to vector<1x128xf32>
    %18 = arith.subf %17, %16 : vector<1x128xf32>
    %19 = math.exp %18 : vector<1x128xf32>
    %cst_16 = arith.constant 1.000000e+00 : f32
    %20 = vector.broadcast %cst_16 : f32 to vector<1x128xf32>
    %21 = arith.addf %20, %19 : vector<1x128xf32>
    %22 = tpu.reciprocal %21 {approx = true} : vector<1x128xf32> -> vector<1x128xf32>
    %c0_17 = arith.constant 0 : index
    %c0_18 = arith.constant 0 : index
    %23 = vector.load %arg8[%c0_17, %c0_18] : memref<1x128xf32, #tpu.memory_space<vmem>>, vector<1x128xf32>
    tpu.vector_store %arg8[%c0_17, %c0_18], %22 {strides = array<i32>} : memref<1x128xf32, #tpu.memory_space<vmem>>, vector<1x128xf32>,
    return
  }
  func.func @transform_0(%arg0: i32) -> (i32, i32) {
    %c0_i32 = arith.constant 0 : i32
    %c0_i32_0 = arith.constant 0 : i32
    return %arg0, %c0_i32 : i32, i32
  }
  func.func @transform_1(%arg0: i32) -> (i32, i32) {
    %c0_i32 = arith.constant 0 : i32
    %c0_i32_0 = arith.constant 0 : i32
    %c0_i32_1 = arith.constant 0 : i32
    return %c0_i32, %c0_i32_0 : i32, i32
  }
  func.func @transform_2(%arg0: i32) -> (i32, i32) {
    %c0_i32 = arith.constant 0 : i32
    %c0_i32_0 = arith.constant 0 : i32
    %c0_i32_1 = arith.constant 0 : i32
    return %c0_i32, %c0_i32_0 : i32, i32
  }
  func.func @transform_3(%arg0: i32) -> (i32, i32) {
    %c0_i32 = arith.constant 0 : i32
    %c0_i32_0 = arith.constant 0 : i32
    %c0_i32_1 = arith.constant 0 : i32
    return %c0_i32, %c0_i32_0 : i32, i32
  }
  func.func @transform_4(%arg0: i32) -> (i32, i32) {
    %c0_i32 = arith.constant 0 : i32
    %c0_i32_0 = arith.constant 0 : i32
    %c0_i32_1 = arith.constant 0 : i32
    return %c0_i32, %c0_i32_0 : i32, i32
  }
  func.func @transform_5(%arg0: i32) -> (i32, i32) {
    %c0_i32 = arith.constant 0 : i32
    %c0_i32_0 = arith.constant 0 : i32
    %c0_i32_1 = arith.constant 0 : i32
    return %c0_i32, %c0_i32_0 : i32, i32
  }
  func.func @transform_6(%arg0: i32) -> (i32, i32) {
    %c0_i32 = arith.constant 0 : i32
    %c0_i32_0 = arith.constant 0 : i32
    %c0_i32_1 = arith.constant 0 : i32
    return %c0_i32, %c0_i32_0 : i32, i32
  }
  func.func @transform_7(%arg0: i32) -> (i32, i32) {
    %c0_i32 = arith.constant 0 : i32
    %c0_i32_0 = arith.constant 0 : i32
    return %arg0, %c0_i32 : i32, i32
  }
}

</mosaic_0001>

<bundles_post_ra>
// kernel: adv_forward.1
= control target key start
LH: loop header
LB: loop body
LE: loop exit
PB: predicated region body
PF: predicated region fallthrough
CT: control target
= control target key end

     0   :  { %12 = vsyncpa [#allocation3], 0  ;;  %s8075_s0 = inlined_call_operand.vmem [shape: bf16[1,512], index: 0, kind: input, shape index: {}]   ;;  %s8076_s1 = inlined_call_operand.hbm [shape: bf16[512,1024], index: 1, kind: input, shape index: {}]   ;;  %s8077_s2 = inlined_call_operand.hbm [shape: f32[1,1024], index: 2, kind: input, shape index: {}]   ;;  %s8078_s3 = inlined_call_operand.hbm [shape: bf16[1024,1024], index: 3, kind: input, shape index: {}]   ;;  %s8079_s4 = inlined_call_operand.hbm [shape: f32[1,1024], index: 4, kind: input, shape index: {}]   ;;  %s8080_s5 = inlined_call_operand.hbm [shape: bf16[1024,128], index: 5, kind: input, shape index: {}]   ;;  %s8081_s6 = inlined_call_operand.hbm [shape: f32[1,128], index: 6, kind: input, shape index: {}]   ;;  %s8082_s7 = inlined_call_operand.vmem [shape: f32[1,128], index: 7, kind: output, shape index: {}]  }
   0x1   :  { %13 = vsyncpa [#allocation5], 0 }
   0x2   :  { %14 = vsyncpa [#allocation8], 0 }
   0x3   :  { %15 = vsyncpa [#allocation11], 0  ;;  %s7781_s24 = smov [#allocation4]   ;;  %s7782_s26 = smov [#allocation7]  }
   0x4   :  { %s36_s25 = sshll.u32 %s7781_s24, 4  ;;  %s58_s27 = sshll.u32 %s7782_s26, 4  ;;  %s37_s25 = int_to_ptr.vmem [resolvable:$true] %s36_s25  ;;  %s59_s27 = int_to_ptr.vmem [resolvable:$true] %s58_s27 }
   0x5   :  { %s7641_s30 = scalar_lea.hbm %s8077_s2, 128 }
   0x6   :  { %p7642_p0 = scmp.ne.s32.totalorder %s8077_s2, %s7641_s30  ;;  %p7645_p1 = scmp.lt.u32.totalorder %s7641_s30, %s8077_s2 }
   0x8   :  { %p7647_p2 = pnand %p7645_p1, %p7642_p0 }
   0xa   :  { %7650 = shalt.err (!%p7647_p2)
}
   0xb   :  { %s7651_s12 = scalar_lea.vmem %s37_s25, 128  ;;  %p7656_p4 = scmp.lt.s32.totalorder %s37_s25, %s37_s25 }
   0xc   :  { %p7652_p3 = scmp.ne.s32.totalorder %s37_s25, %s7651_s12  ;;  %p7657_p5 = scmp.lt.s32.totalorder %s7651_s12, %s7651_s12 }
   0xe   :  { %p7658_p6 = por %p7657_p5, %p7656_p4 }
  0x10   :  { %p7659_p7 = pnand %p7658_p6, %p7652_p3 }
  0x12   :  { %7662 = shalt.err (!%p7659_p7)
}
  0x13   :  { %39 = dma.hbm_to_vmem [thread:$0]  %s8077_s2, 128, %s37_s25, [#allocation5]  }
  0x14   :  { %s7663_s17 = scalar_lea.hbm %s8079_s4, 128 }
  0x15   :  { %p7664_p8 = scmp.ne.s32.totalorder %s8079_s4, %s7663_s17  ;;  %p7667_p9 = scmp.lt.u32.totalorder %s7663_s17, %s8079_s4 }
  0x17   :  { %p7669_p10 = pnand %p7667_p9, %p7664_p8 }
  0x19   :  { %7672 = shalt.err (!%p7669_p10)
}
  0x1a   :  { %s7673_s22 = scalar_lea.vmem %s59_s27, 128  ;;  %p7678_p12 = scmp.lt.s32.totalorder %s59_s27, %s59_s27 }
  0x1b   :  { %p7674_p11 = scmp.ne.s32.totalorder %s59_s27, %s7673_s22  ;;  %p7679_p13 = scmp.lt.s32.totalorder %s7673_s22, %s7673_s22 }
  0x1d   :  { %p7680_p0 = por %p7679_p13, %p7678_p12 }
  0x1f   :  { %p7681_p1 = pnand %p7680_p0, %p7674_p11 }
  0x21   :  { %7684 = shalt.err (!%p7681_p1)
}
  0x22   :  { %61 = dma.hbm_to_vmem [thread:$0]  %s8079_s4, 128, %s59_s27, [#allocation8]  }
  0x23   :  { %s7783_s24 = smov [#allocation2]   ;;  %s7685_s29 = scalar_lea.hbm %s8076_s1, 32768 }
  0x24   :  { %s23_s25 = sshll.u32 %s7783_s24, 4  ;;  %p7686_p2 = scmp.ne.s32.totalorder %s8076_s1, %s7685_s29  ;;  %s24_s25 = int_to_ptr.vmem [resolvable:$true] %s23_s25 }
  0x25   :  { %p7689_p3 = scmp.lt.u32.totalorder %s7685_s29, %s8076_s1 }
  0x27   :  { %p7691_p4 = pnand %p7689_p3, %p7686_p2 }
  0x29   :  { %7694 = shalt.err (!%p7691_p4)
}
  0x2a   :  { %s7695_s11 = scalar_lea.vmem %s24_s25, 32768  ;;  %p7700_p6 = scmp.lt.s32.totalorder %s24_s25, %s24_s25 }
  0x2b   :  { %p7696_p5 = scmp.ne.s32.totalorder %s24_s25, %s7695_s11  ;;  %p7701_p7 = scmp.lt.s32.totalorder %s7695_s11, %s7695_s11 }
  0x2d   :  { %p7702_p8 = por %p7701_p7, %p7700_p6 }
  0x2f   :  { %p7703_p9 = pnand %p7702_p8, %p7696_p5 }
  0x31   :  { %7706 = shalt.err (!%p7703_p9)
}
  0x32   :  { %s7784_s4 = smov 512   ;;  %s7785_s27 = smov 32  }
  0x33   :  { %29 = dma.hbm_to_vmem [thread:$0]  %s8076_s1, 32768, %s24_s25, [#allocation3], %s7784_s4, %s7784_s4, %s7785_s27  }
  0x34   :  { %s7786_s14 = smov [#allocation6]   ;;  %s7787_s16 = smov [#allocation9]  }
  0x35   :  { %s45_s15 = sshll.u32 %s7786_s14, 4  ;;  %s67_s17 = sshll.u32 %s7787_s16, 4  ;;  %s46_s15 = int_to_ptr.vmem [resolvable:$true] %s45_s15  ;;  %s68_s17 = int_to_ptr.vmem [resolvable:$true] %s67_s17 }
  0x36   :  { %s7707_s20 = scalar_lea.hbm %s8078_s3, 65536 }
  0x37   :  { %p7708_p10 = scmp.ne.s32.totalorder %s8078_s3, %s7707_s20  ;;  %p7711_p11 = scmp.lt.u32.totalorder %s7707_s20, %s8078_s3 }
  0x39   :  { %p7713_p12 = pnand %p7711_p11, %p7708_p10 }
  0x3b   :  { %7716 = shalt.err (!%p7713_p12)
}
  0x3c   :  { %s7717_s1 = scalar_lea.vmem %s46_s15, 65536  ;;  %p7722_p0 = scmp.lt.s32.totalorder %s46_s15, %s46_s15 }
  0x3d   :  { %p7718_p13 = scmp.ne.s32.totalorder %s46_s15, %s7717_s1  ;;  %p7723_p1 = scmp.lt.s32.totalorder %s7717_s1, %s7717_s1 }
  0x3f   :  { %p7724_p2 = por %p7723_p1, %p7722_p0 }
  0x41   :  { %p7725_p3 = pnand %p7724_p2, %p7718_p13 }
  0x43   :  { %7728 = shalt.err (!%p7725_p3)
}
  0x44   :  { %51 = dma.hbm_to_vmem [thread:$0]  %s8078_s3, 65536, %s46_s15, [#allocation5], %s7784_s4, %s7784_s4, %s7785_s27  }
  0x45   :  { %s7729_s29 = scalar_lea.hbm %s8080_s5, 8192 }
  0x46   :  { %p7730_p4 = scmp.ne.s32.totalorder %s8080_s5, %s7729_s29  ;;  %p7733_p5 = scmp.lt.u32.totalorder %s7729_s29, %s8080_s5 }
  0x48   :  { %p7735_p6 = pnand %p7733_p5, %p7730_p4 }
  0x4a   :  { %7738 = shalt.err (!%p7735_p6)
}
  0x4b   :  { %s7739_s11 = scalar_lea.vmem %s68_s17, 8192  ;;  %p7744_p8 = scmp.lt.s32.totalorder %s68_s17, %s68_s17 }
  0x4c   :  { %p7740_p7 = scmp.ne.s32.totalorder %s68_s17, %s7739_s11  ;;  %p7745_p9 = scmp.lt.s32.totalorder %s7739_s11, %s7739_s11 }
  0x4e   :  { %p7746_p10 = por %p7745_p9, %p7744_p8 }
  0x50   :  { %p7747_p11 = pnand %p7746_p10, %p7740_p7 }
  0x52   :  { %7750 = shalt.err (!%p7747_p11)
}
  0x53   :  { %s7788_s3 = smov 64   ;;  %s7789_s4 = smov 4  }
  0x54   :  { %73 = dma.hbm_to_vmem [thread:$0]  %s8080_s5, 8192, %s68_s17, [#allocation8], %s7788_s3, %s7788_s3, %s7789_s4  }
  0x55   :  { %s7790_s13 = smov [#allocation10]   ;;  %s7751_s18 = scalar_lea.hbm %s8081_s6, 16 }
  0x56   :  { %s80_s14 = sshll.u32 %s7790_s13, 4  ;;  %p7752_p12 = scmp.ne.s32.totalorder %s8081_s6, %s7751_s18  ;;  %s81_s14 = int_to_ptr.vmem [resolvable:$true] %s80_s14 }
  0x57   :  { %p7755_p13 = scmp.lt.u32.totalorder %s7751_s18, %s8081_s6 }
  0x59   :  { %p7757_p0 = pnand %p7755_p13, %p7752_p12 }
  0x5b   :  { %7760 = shalt.err (!%p7757_p0)
}
  0x5c   :  { %s7761_s2 = scalar_lea.vmem %s81_s14, 16  ;;  %s7765_s5 = scalar_lea.vmem %s81_s14, 32 }
  0x5d   :  { %p7762_p1 = scmp.ne.s32.totalorder %s81_s14, %s7761_s2  ;;  %p7766_p2 = scmp.lt.s32.totalorder %s81_s14, %s81_s14 }
  0x5e   :  { %p7767_p3 = scmp.lt.s32.totalorder %s7765_s5, %s7761_s2 }
  0x60   :  { %p7768_p4 = por %p7767_p3, %p7766_p2 }
  0x62   :  { %p7769_p5 = pnand %p7768_p4, %p7762_p1 }
  0x64   :  { %7772 = shalt.err (!%p7769_p5)
}
  0x65   :  { %83 = dma.hbm_to_vmem [thread:$0]  %s8081_s6, 16, %s81_s14, [#allocation11]  }
  0x66   :  { %7773 = dma.done.wait [#allocation3], 32768  }
  0x67   :  { %7774 = vsyncadd [#allocation3], 4294934528 }
  0x68   :  { %7775 = dma.done.wait [#allocation5], 65664  }
  0x69   :  { %7776 = vsyncadd [#allocation5], 4294901632 }
  0x6a   :  { %7777 = dma.done.wait [#allocation8], 8320  }
  0x6b   :  { %7778 = vsyncadd [#allocation8], 4294958976 }
  0x6c   :  { %7779 = dma.done.wait [#allocation11], 16  }
  0x6d   :  { %7780 = vsyncadd [#allocation11], 4294967280  ;;  %v104_v0 = vld [vmem:[#allocation2] sm:$0xff]  ;;  %v105_v2 = vld [vmem:[#allocation2 + $0x8] sm:$0xff]  ;;  %v7791_v35 = vmov 1966171168   ;;  %v373_v37 = vlaneseq }
  0x6e   :  { %v108_v1 = vld [vmem:[#allocation2 + $0x20] sm:$0xff]  ;;  %v109_v4 = vld [vmem:[#allocation2 + $0x28] sm:$0xff]  ;;  %v371_v36 = vunpack.c.l.s4 %v7791_v35 }
  0x6f   :  { %v6530_v3 = vcombine.high %v104_v0, %v108_v1  ;;  %v6529_v5 = vcombine.low %v104_v0, %v108_v1  ;;  %v112_v6 = vld [vmem:[#allocation2 + $0x40] sm:$0xff]  ;;  %v6532_v8 = vcombine.high %v105_v2, %v109_v4  ;;  %v6531_v9 = vcombine.low %v105_v2, %v109_v4  ;;  %v113_v11 = vld [vmem:[#allocation2 + $0x48] sm:$0xff] }
  0x70   :  { %v116_v7 = vld [vmem:[#allocation2 + $0x60] sm:$0xff]  ;;  %v117_v12 = vld [vmem:[#allocation2 + $0x68] sm:$0xff]  ;;  %v372_v46 = vunpack.c.0.s8 %v371_v36  ;;  %v7904_v47 = vshrl.u32 %v373_v37, 7 }
  0x71   :  { %v6538_v10 = vcombine.high %v112_v6, %v116_v7  ;;  %v120_v13 = vld [vmem:[#allocation2 + $0x80] sm:$0xff]  ;;  %1711 = vmatprep.subr.bf16.mxu0 %v6530_v3  ;;  %v6540_v14 = vcombine.high %v113_v11, %v117_v12  ;;  %v121_v16 = vld [vmem:[#allocation2 + $0x88] sm:$0xff]  ;;  %1793 = vmatprep.subr.bf16.mxu1 %v6532_v8  ;;  %v6537_v18 = vcombine.low %v112_v6, %v116_v7 }
  0x72   :  { %v124_v15 = vld [vmem:[#allocation2 + $0xa0] sm:$0xff]  ;;  %v125_v17 = vld [vmem:[#allocation2 + $0xa8] sm:$0xff]  ;;  %1712 = vmatpush1.bf16.msra.mxu0 %v6529_v5  ;;  %1794 = vmatpush1.bf16.msra.mxu1 %v6531_v9  ;;  %v6539_v19 = vcombine.low %v113_v11, %v117_v12  ;;  %v7907_v56 = vsub.s32 %v372_v46, %v7904_v47 }
  0x73   :  { %1713 = vmatprep.subr.bf16.mxu0 %v6538_v10  ;;  %v6546_v20 = vcombine.high %v120_v13, %v124_v15  ;;  %1795 = vmatprep.subr.bf16.mxu1 %v6540_v14  ;;  %v6548_v21 = vcombine.high %v121_v16, %v125_v17  ;;  %v128_v22 = vld [vmem:[#allocation2 + $0xc0] sm:$0xff]  ;;  %v129_v24 = vld [vmem:[#allocation2 + $0xc8] sm:$0xff]  ;;  %v6545_v26 = vcombine.low %v120_v13, %v124_v15 }
  0x74   :  { %v132_v23 = vld [vmem:[#allocation2 + $0xe0] sm:$0xff]  ;;  %v133_v25 = vld [vmem:[#allocation2 + $0xe8] sm:$0xff]  ;;  %v6547_v27 = vcombine.low %v121_v16, %v125_v17 }
  0x75   :  { %v6554_v28 = vcombine.high %v128_v22, %v132_v23  ;;  %v6556_v29 = vcombine.high %v129_v24, %v133_v25  ;;  %v136_v30 = vld [vmem:[#allocation2 + $0x100] sm:$0xff]  ;;  %v137_v32 = vld [vmem:[#allocation2 + $0x108] sm:$0xff]  ;;  %v6553_v34 = vcombine.low %v128_v22, %v132_v23  ;;  %v6555_v38 = vcombine.low %v129_v24, %v133_v25 }
  0x76   :  { %1714 = vmatpush1.bf16.msra.mxu0 %v6537_v18  ;;  %1796 = vmatpush1.bf16.msra.mxu1 %v6539_v19  ;;  %v140_v31 = vld [vmem:[#allocation2 + $0x120] sm:$0xff]  ;;  %v141_v33 = vld [vmem:[#allocation2 + $0x128] sm:$0xff] }
  0x77   :  { %1715 = vmatprep.subr.bf16.mxu0 %v6546_v20  ;;  %1797 = vmatprep.subr.bf16.mxu1 %v6548_v21  ;;  %v6562_v39 = vcombine.high %v136_v30, %v140_v31  ;;  %v6564_v40 = vcombine.high %v137_v32, %v141_v33  ;;  %v144_v41 = vld [vmem:[#allocation2 + $0x140] sm:$0xff]  ;;  %v145_v43 = vld [vmem:[#allocation2 + $0x148] sm:$0xff]  ;;  %v6561_v45 = vcombine.low %v136_v30, %v140_v31 }
  0x78   :  { %v148_v42 = vld [vmem:[#allocation2 + $0x160] sm:$0xff]  ;;  %v149_v44 = vld [vmem:[#allocation2 + $0x168] sm:$0xff]  ;;  %v6563_v48 = vcombine.low %v137_v32, %v141_v33 }
  0x79   :  { %v6570_v49 = vcombine.high %v144_v41, %v148_v42  ;;  %v6572_v50 = vcombine.high %v145_v43, %v149_v44  ;;  %v152_v51 = vld [vmem:[#allocation2 + $0x180] sm:$0xff]  ;;  %v153_v53 = vld [vmem:[#allocation2 + $0x188] sm:$0xff]  ;;  %v6569_v55 = vcombine.low %v144_v41, %v148_v42  ;;  %v6571_v57 = vcombine.low %v145_v43, %v149_v44 }
  0x7a   :  { %1716 = vmatpush1.bf16.msra.mxu0 %v6545_v26  ;;  %1798 = vmatpush1.bf16.msra.mxu1 %v6547_v27  ;;  %v156_v52 = vld [vmem:[#allocation2 + $0x1a0] sm:$0xff]  ;;  %v157_v54 = vld [vmem:[#allocation2 + $0x1a8] sm:$0xff] }
  0x7b   :  { %1717 = vmatprep.subr.bf16.mxu0 %v6554_v28  ;;  %1799 = vmatprep.subr.bf16.mxu1 %v6556_v29  ;;  %v6578_v58 = vcombine.high %v152_v51, %v156_v52  ;;  %v7912_v59 = vld.sshfl [vmem:[%s8075_s0] sm:$0x33 pattern:$0x75316420]  ;;  %v6580_v60 = vcombine.high %v153_v53, %v157_v54  ;;  %v161_v0 = vld [vmem:[#allocation2 + $0x1c8] sm:$0xff]  ;;  %v6577_v2 = vcombine.low %v152_v51, %v156_v52 }
  0x7c   :  { %v160_v61 = vld [vmem:[#allocation2 + $0x1c0] sm:$0xff]  ;;  %v369_v63 = vcombine.high %v7912_v59, %v7912_v59  ;;  %v165_v1 = vld [vmem:[#allocation2 + $0x1e8] sm:$0xff]  ;;  %v6579_v4 = vcombine.low %v153_v53, %v157_v54 }
  0x7d   :  { %v164_v62 = vld [vmem:[#allocation2 + $0x1e0] sm:$0xff]  ;;  %v6588_v6 = vcombine.high %v161_v0, %v165_v1  ;;  %v169_v9 = vld [vmem:[#allocation2 + $0x208] sm:$0xff]  ;;  %v6587_v12 = vcombine.low %v161_v0, %v165_v1 }
  0x7e   :  { %1718 = vmatpush1.bf16.msra.mxu0 %v6553_v34  ;;  %1800 = vmatpush1.bf16.msra.mxu1 %v6555_v38  ;;  %v7917_v3 = vrot.slane %v369_v63, %v7907_v56  ;;  %v6586_v5 = vcombine.high %v160_v61, %v164_v62  ;;  %v168_v7 = vld [vmem:[#allocation2 + $0x200] sm:$0xff]  ;;  %v173_v10 = vld [vmem:[#allocation2 + $0x228] sm:$0xff]  ;;  %v6585_v11 = vcombine.low %v160_v61, %v164_v62 }
  0x7f   :  { %1719 = vmatprep.subr.bf16.mxu0 %v6562_v39  ;;  %1801 = vmatprep.subr.bf16.mxu1 %v6564_v40  ;;  %v172_v8 = vld [vmem:[#allocation2 + $0x220] sm:$0xff]  ;;  %v6596_v14 = vcombine.high %v169_v9, %v173_v10  ;;  %v177_v17 = vld [vmem:[#allocation2 + $0x248] sm:$0xff]  ;;  %v6595_v20 = vcombine.low %v169_v9, %v173_v10 }
  0x80   :  { %1743 = vmatprep.mubr.bf16.mxu0 %v7917_v3  ;;  %1825 = vmatprep.mubr.bf16.mxu1 %v7917_v3  ;;  %v6594_v13 = vcombine.high %v168_v7, %v172_v8  ;;  %v176_v15 = vld [vmem:[#allocation2 + $0x240] sm:$0xff]  ;;  %v181_v18 = vld [vmem:[#allocation2 + $0x268] sm:$0xff]  ;;  %v6593_v19 = vcombine.low %v168_v7, %v172_v8 }
  0x81   :  { %v180_v16 = vld [vmem:[#allocation2 + $0x260] sm:$0xff]  ;;  %v6604_v22 = vcombine.high %v177_v17, %v181_v18  ;;  %v185_v25 = vld [vmem:[#allocation2 + $0x288] sm:$0xff]  ;;  %v6603_v28 = vcombine.low %v177_v17, %v181_v18 }
  0x82   :  { %1720 = vmatpush1.bf16.msra.mxu0 %v6561_v45  ;;  %1802 = vmatpush1.bf16.msra.mxu1 %v6563_v48  ;;  %v6602_v21 = vcombine.high %v176_v15, %v180_v16  ;;  %v184_v23 = vld [vmem:[#allocation2 + $0x280] sm:$0xff]  ;;  %v189_v26 = vld [vmem:[#allocation2 + $0x2a8] sm:$0xff]  ;;  %v6601_v27 = vcombine.low %v176_v15, %v180_v16 }
  0x83   :  { %1721 = vmatprep.subr.bf16.mxu0 %v6570_v49  ;;  %1803 = vmatprep.subr.bf16.mxu1 %v6572_v50  ;;  %v188_v24 = vld [vmem:[#allocation2 + $0x2a0] sm:$0xff]  ;;  %v6612_v30 = vcombine.high %v185_v25, %v189_v26  ;;  %v193_v33 = vld [vmem:[#allocation2 + $0x2c8] sm:$0xff]  ;;  %v6611_v36 = vcombine.low %v185_v25, %v189_v26 }
  0x84   :  { %v6610_v29 = vcombine.high %v184_v23, %v188_v24  ;;  %v192_v31 = vld [vmem:[#allocation2 + $0x2c0] sm:$0xff]  ;;  %v197_v34 = vld [vmem:[#allocation2 + $0x2e8] sm:$0xff]  ;;  %v6609_v35 = vcombine.low %v184_v23, %v188_v24 }
  0x85   :  { %v196_v32 = vld [vmem:[#allocation2 + $0x2e0] sm:$0xff]  ;;  %v6620_v38 = vcombine.high %v193_v33, %v197_v34  ;;  %v201_v41 = vld [vmem:[#allocation2 + $0x308] sm:$0xff]  ;;  %v6619_v44 = vcombine.low %v193_v33, %v197_v34 }
  0x86   :  { %1722 = vmatpush1.bf16.msra.mxu0 %v6569_v55  ;;  %1804 = vmatpush1.bf16.msra.mxu1 %v6571_v57  ;;  %v6618_v37 = vcombine.high %v192_v31, %v196_v32  ;;  %v200_v39 = vld [vmem:[#allocation2 + $0x300] sm:$0xff]  ;;  %v205_v42 = vld [vmem:[#allocation2 + $0x328] sm:$0xff]  ;;  %v6617_v43 = vcombine.low %v192_v31, %v196_v32  ;;  %v7927_v32 = vcombine.high %v7917_v3, %v7917_v3 }
  0x87   :  { %1723 = vmatprep.subr.bf16.mxu0 %v6578_v58  ;;  %1805 = vmatprep.subr.bf16.mxu1 %v6580_v60  ;;  %v204_v40 = vld [vmem:[#allocation2 + $0x320] sm:$0xff]  ;;  %v6628_v46 = vcombine.high %v201_v41, %v205_v42  ;;  %v209_v50 = vld [vmem:[#allocation2 + $0x348] sm:$0xff]  ;;  %v6627_v53 = vcombine.low %v201_v41, %v205_v42 }
  0x88   :  { %v6626_v45 = vcombine.high %v200_v39, %v204_v40  ;;  %v208_v48 = vld [vmem:[#allocation2 + $0x340] sm:$0xff]  ;;  %v213_v51 = vld [vmem:[#allocation2 + $0x368] sm:$0xff]  ;;  %v6625_v52 = vcombine.low %v200_v39, %v204_v40 }
  0x89   :  { %v212_v49 = vld [vmem:[#allocation2 + $0x360] sm:$0xff]  ;;  %v6636_v55 = vcombine.high %v209_v50, %v213_v51  ;;  %v217_v60 = vld [vmem:[#allocation2 + $0x388] sm:$0xff]  ;;  %v6635_v63 = vcombine.low %v209_v50, %v213_v51 }
  0x8a   :  { %1724 = vmatpush1.bf16.msra.mxu0 %v6577_v2  ;;  %1806 = vmatpush1.bf16.msra.mxu1 %v6579_v4  ;;  %v6634_v54 = vcombine.high %v208_v48, %v212_v49  ;;  %v216_v57 = vld [vmem:[#allocation2 + $0x380] sm:$0xff]  ;;  %v221_v61 = vld [vmem:[#allocation2 + $0x3a8] sm:$0xff]  ;;  %v6633_v62 = vcombine.low %v208_v48, %v212_v49 }
  0x8b   :  { %1725 = vmatprep.subr.bf16.mxu0 %v6586_v5  ;;  %1807 = vmatprep.subr.bf16.mxu1 %v6588_v6  ;;  %v220_v58 = vld [vmem:[#allocation2 + $0x3a0] sm:$0xff]  ;;  %v6644_v1 = vcombine.high %v217_v60, %v221_v61  ;;  %v225_v5 = vld [vmem:[#allocation2 + $0x3c8] sm:$0xff]  ;;  %v6643_v8 = vcombine.low %v217_v60, %v221_v61 }
  0x8c   :  { %v6642_v0 = vcombine.high %v216_v57, %v220_v58  ;;  %v224_v2 = vld [vmem:[#allocation2 + $0x3c0] sm:$0xff]  ;;  %v229_v6 = vld [vmem:[#allocation2 + $0x3e8] sm:$0xff]  ;;  %v6641_v7 = vcombine.low %v216_v57, %v220_v58 }
  0x8d   :  { %v228_v4 = vld [vmem:[#allocation2 + $0x3e0] sm:$0xff]  ;;  %v6652_v10 = vcombine.high %v225_v5, %v229_v6  ;;  %v6651_v16 = vcombine.low %v225_v5, %v229_v6  ;;  %v245_v23 = vld [vmem:[#allocation2 + $0x468] sm:$0xff] }
  0x8e   :  { %1726 = vmatpush1.bf16.msra.mxu0 %v6585_v11  ;;  %1808 = vmatpush1.bf16.msra.mxu1 %v6587_v12  ;;  %v6650_v9 = vcombine.high %v224_v2, %v228_v4  ;;  %v232_v11 = vld [vmem:[#allocation2 + $0x400] sm:$0xff]  ;;  %v6649_v15 = vcombine.low %v224_v2, %v228_v4  ;;  %v253_v31 = vld [vmem:[#allocation2 + $0x4a8] sm:$0xff] }
  0x8f   :  { %1727 = vmatprep.subr.bf16.mxu0 %v6594_v13  ;;  %1809 = vmatprep.subr.bf16.mxu1 %v6596_v14  ;;  %v236_v12 = vld [vmem:[#allocation2 + $0x420] sm:$0xff]  ;;  %v233_v13 = vld [vmem:[#allocation2 + $0x408] sm:$0xff] }
  0x90   :  { %v237_v14 = vld [vmem:[#allocation2 + $0x428] sm:$0xff]  ;;  %v6658_v17 = vcombine.high %v232_v11, %v236_v12  ;;  %v6657_v24 = vcombine.low %v232_v11, %v236_v12  ;;  %v256_v34 = vld [vmem:[#allocation2 + $0x4c0] sm:$0xff] }
  0x91   :  { %v6660_v18 = vcombine.high %v233_v13, %v237_v14  ;;  %v6659_v25 = vcombine.low %v233_v13, %v237_v14  ;;  %v264_v42 = vld [vmem:[#allocation2 + $0x500] sm:$0xff] }
  0x92   :  { %1728 = vmatpush1.bf16.msra.mxu0 %v6593_v19  ;;  %1810 = vmatpush1.bf16.msra.mxu1 %v6595_v20  ;;  %v240_v19 = vld [vmem:[#allocation2 + $0x440] sm:$0xff] }
  0x93   :  { %1729 = vmatprep.subr.bf16.mxu0 %v6602_v21  ;;  %1811 = vmatprep.subr.bf16.mxu1 %v6604_v22  ;;  %v244_v20 = vld [vmem:[#allocation2 + $0x460] sm:$0xff]  ;;  %v7923_v21 = vrot.slane %v7912_v59, %v7907_v56  ;;  %v241_v22 = vld [vmem:[#allocation2 + $0x448] sm:$0xff] }
  0x94   :  { %v6666_v26 = vcombine.high %v240_v19, %v244_v20  ;;  %v6665_v56 = vcombine.low %v240_v19, %v244_v20  ;;  %v6667_v59 = vcombine.low %v241_v22, %v245_v23  ;;  %v272_v51 = vld [vmem:[#allocation2 + $0x540] sm:$0xff] }
  0x95   :  { %v280_v61 = vld [vmem:[#allocation2 + $0x580] sm:$0xff] }
  0x96   :  { %1730 = vmatpush1.bf16.msra.mxu0 %v6601_v27  ;;  %1812 = vmatpush1.bf16.msra.mxu1 %v6603_v28  ;;  %v248_v27 = vld [vmem:[#allocation2 + $0x480] sm:$0xff] }
  0x97   :  { %1731 = vmatprep.subr.bf16.mxu0 %v6610_v29  ;;  %1813 = vmatprep.subr.bf16.mxu1 %v6612_v30  ;;  %v252_v28 = vld [vmem:[#allocation2 + $0x4a0] sm:$0xff]  ;;  %v249_v29 = vld [vmem:[#allocation2 + $0x488] sm:$0xff]  ;;  %v6668_v30 = vcombine.high %v241_v22, %v245_v23 }
  0x98   :  { %v6674_v33 = vcombine.high %v248_v27, %v252_v28  ;;  %v6673_v39 = vcombine.low %v248_v27, %v252_v28  ;;  %v6675_v40 = vcombine.low %v249_v29, %v253_v31  ;;  %v288_v6 = vld [vmem:[#allocation2 + $0x5c0] sm:$0xff]  ;;  %v309_v27 = vld [vmem:[#allocation2 + $0x668] sm:$0xff] }
  0x99   :  { %v296_v14 = vld [vmem:[#allocation2 + $0x600] sm:$0xff] }
  0x9a   :  { %1732 = vmatpush1.bf16.msra.mxu0 %v6609_v35  ;;  %1814 = vmatpush1.bf16.msra.mxu1 %v6611_v36  ;;  %v260_v35 = vld [vmem:[#allocation2 + $0x4e0] sm:$0xff]  ;;  %v257_v36 = vld [vmem:[#allocation2 + $0x4c8] sm:$0xff] }
  0x9b   :  { %1733 = vmatprep.subr.bf16.mxu0 %v6618_v37  ;;  %1815 = vmatprep.subr.bf16.mxu1 %v6620_v38  ;;  %v6676_v37 = vcombine.high %v249_v29, %v253_v31  ;;  %v261_v38 = vld [vmem:[#allocation2 + $0x4e8] sm:$0xff]  ;;  %v6682_v41 = vcombine.high %v256_v34, %v260_v35  ;;  %v6681_v48 = vcombine.low %v256_v34, %v260_v35  ;;  %v304_v23 = vld [vmem:[#allocation2 + $0x640] sm:$0xff] }
  0x9c   :  { %v6683_v49 = vcombine.low %v257_v36, %v261_v38  ;;  %v312_v31 = vld [vmem:[#allocation2 + $0x680] sm:$0xff]  ;;  %v317_v34 = vld [vmem:[#allocation2 + $0x6a8] sm:$0xff] }
  0x9e   :  { %1734 = vmatpush1.bf16.msra.mxu0 %v6617_v43  ;;  %1816 = vmatpush1.bf16.msra.mxu1 %v6619_v44  ;;  %v268_v43 = vld [vmem:[#allocation2 + $0x520] sm:$0xff]  ;;  %v265_v44 = vld [vmem:[#allocation2 + $0x508] sm:$0xff] }
  0x9f   :  { %1735 = vmatprep.subr.bf16.mxu0 %v6626_v45  ;;  %1817 = vmatprep.subr.bf16.mxu1 %v6628_v46  ;;  %v6684_v45 = vcombine.high %v257_v36, %v261_v38  ;;  %v269_v46 = vld [vmem:[#allocation2 + $0x528] sm:$0xff]  ;;  %v6690_v50 = vcombine.high %v264_v42, %v268_v43  ;;  %v6689_v57 = vcombine.low %v264_v42, %v268_v43  ;;  %v320_v38 = vld [vmem:[#allocation2 + $0x6c0] sm:$0xff] }
  0xa0   :  { %v6691_v58 = vcombine.low %v265_v44, %v269_v46  ;;  %v325_v42 = vld [vmem:[#allocation2 + $0x6e8] sm:$0xff] }
  0xa2   :  { %1736 = vmatpush1.bf16.msra.mxu0 %v6625_v52  ;;  %1818 = vmatpush1.bf16.msra.mxu1 %v6627_v53  ;;  %v276_v52 = vld [vmem:[#allocation2 + $0x560] sm:$0xff]  ;;  %v273_v53 = vld [vmem:[#allocation2 + $0x548] sm:$0xff] }
  0xa3   :  { %1737 = vmatprep.subr.bf16.mxu0 %v6634_v54  ;;  %1819 = vmatprep.subr.bf16.mxu1 %v6636_v55  ;;  %v6692_v54 = vcombine.high %v265_v44, %v269_v46  ;;  %v277_v55 = vld [vmem:[#allocation2 + $0x568] sm:$0xff]  ;;  %v6698_v60 = vcombine.high %v272_v51, %v276_v52  ;;  %v6697_v2 = vcombine.low %v272_v51, %v276_v52  ;;  %v328_v46 = vld [vmem:[#allocation2 + $0x700] sm:$0xff] }
  0xa4   :  { %v6699_v4 = vcombine.low %v273_v53, %v277_v55  ;;  %v333_v51 = vld [vmem:[#allocation2 + $0x728] sm:$0xff] }
  0xa6   :  { %1738 = vmatpush1.bf16.msra.mxu0 %v6633_v62  ;;  %1820 = vmatpush1.bf16.msra.mxu1 %v6635_v63  ;;  %v284_v62 = vld [vmem:[#allocation2 + $0x5a0] sm:$0xff]  ;;  %v281_v63 = vld [vmem:[#allocation2 + $0x588] sm:$0xff] }
  0xa7   :  { %1739 = vmatprep.subr.bf16.mxu0 %v6642_v0  ;;  %1821 = vmatprep.subr.bf16.mxu1 %v6644_v1  ;;  %v6700_v0 = vcombine.high %v273_v53, %v277_v55  ;;  %v285_v1 = vld [vmem:[#allocation2 + $0x5a8] sm:$0xff]  ;;  %v6706_v5 = vcombine.high %v280_v61, %v284_v62  ;;  %v6705_v11 = vcombine.low %v280_v61, %v284_v62  ;;  %v336_v55 = vld [vmem:[#allocation2 + $0x740] sm:$0xff] }
  0xa8   :  { %v6707_v12 = vcombine.low %v281_v63, %v285_v1  ;;  %v341_v61 = vld [vmem:[#allocation2 + $0x768] sm:$0xff] }
  0xaa   :  { %1740 = vmatpush1.bf16.msra.mxu0 %v6641_v7  ;;  %1822 = vmatpush1.bf16.msra.mxu1 %v6643_v8  ;;  %v292_v7 = vld [vmem:[#allocation2 + $0x5e0] sm:$0xff]  ;;  %v289_v8 = vld [vmem:[#allocation2 + $0x5c8] sm:$0xff] }
  0xab   :  { %1741 = vmatprep.subr.bf16.mxu0 %v6650_v9  ;;  %1823 = vmatprep.subr.bf16.mxu1 %v6652_v10  ;;  %v6708_v9 = vcombine.high %v281_v63, %v285_v1  ;;  %v293_v10 = vld [vmem:[#allocation2 + $0x5e8] sm:$0xff]  ;;  %v6714_v13 = vcombine.high %v288_v6, %v292_v7  ;;  %v6713_v19 = vcombine.low %v288_v6, %v292_v7  ;;  %v344_v1 = vld [vmem:[#allocation2 + $0x780] sm:$0xff] }
  0xac   :  { %v6715_v20 = vcombine.low %v289_v8, %v293_v10  ;;  %v349_v6 = vld [vmem:[#allocation2 + $0x7a8] sm:$0xff] }
  0xae   :  { %1742 = vmatpush1.bf16.msra.mxu0 %v6649_v15  ;;  %1824 = vmatpush1.bf16.msra.mxu1 %v6651_v16  ;;  %v300_v15 = vld [vmem:[#allocation2 + $0x620] sm:$0xff]  ;;  %v297_v16 = vld [vmem:[#allocation2 + $0x608] sm:$0xff] }
  0xaf   :  { %1752 = vmatprep.subr.bf16.mxu0 %v6658_v17  ;;  %1834 = vmatprep.subr.bf16.mxu1 %v6660_v18  ;;  %v6716_v17 = vcombine.high %v289_v8, %v293_v10  ;;  %v301_v18 = vld [vmem:[#allocation2 + $0x628] sm:$0xff]  ;;  %v6722_v22 = vcombine.high %v296_v14, %v300_v15  ;;  %v6721_v28 = vcombine.low %v296_v14, %v300_v15  ;;  %v352_v10 = vld [vmem:[#allocation2 + $0x7c0] sm:$0xff] }
  0xb0   :  { %v6723_v29 = vcombine.low %v297_v16, %v301_v18  ;;  %v357_v14 = vld [vmem:[#allocation2 + $0x7e8] sm:$0xff] }
  0xb1   :  { %1744 = vmatmul.mubr.bf16.vlgmr.msra.gmra.mrb[0].mxu0 %v7923_v21  ;;  %1826 = vmatmul.mubr.bf16.vlgmr.msra.gmra.mrb[0].mxu1 %v7923_v21 }
  0xb2   :  { %1753 = vmatpush1.bf16.msra.mxu0 %v6657_v24  ;;  %1835 = vmatpush1.bf16.msra.mxu1 %v6659_v25  ;;  %v308_v24 = vld [vmem:[#allocation2 + $0x660] sm:$0xff]  ;;  %v305_v25 = vld [vmem:[#allocation2 + $0x648] sm:$0xff] }
  0xb3   :  { %1754 = vmatprep.subr.bf16.mxu0 %v6666_v26  ;;  %1836 = vmatprep.subr.bf16.mxu1 %v6668_v30  ;;  %v6724_v26 = vcombine.high %v297_v16, %v301_v18  ;;  %v6730_v30 = vcombine.high %v304_v23, %v308_v24  ;;  %v6729_v35 = vcombine.low %v304_v23, %v308_v24  ;;  %v106_v18 = vld [vmem:[#allocation2 + $0x10] sm:$0xff]  ;;  %v111_v23 = vld [vmem:[#allocation2 + $0x38] sm:$0xff] }
  0xb4   :  { %1784 = vmatprep.mubr.bf16.mxu0 %v7927_v32  ;;  %1866 = vmatprep.mubr.bf16.mxu1 %v7927_v32  ;;  %v6731_v36 = vcombine.low %v305_v25, %v309_v27 }
  0xb6   :  { %1755 = vmatpush1.bf16.msra.mxu0 %v6665_v56  ;;  %1837 = vmatpush1.bf16.msra.mxu1 %v6667_v59  ;;  %v316_v56 = vld [vmem:[#allocation2 + $0x6a0] sm:$0xff]  ;;  %v313_v59 = vld [vmem:[#allocation2 + $0x688] sm:$0xff] }
  0xb7   :  { %1756 = vmatprep.subr.bf16.mxu0 %v6674_v33  ;;  %1838 = vmatprep.subr.bf16.mxu1 %v6676_v37  ;;  %v6732_v33 = vcombine.high %v305_v25, %v309_v27  ;;  %v6738_v37 = vcombine.high %v312_v31, %v316_v56  ;;  %v6737_v43 = vcombine.low %v312_v31, %v316_v56  ;;  %v114_v27 = vld [vmem:[#allocation2 + $0x50] sm:$0xff]  ;;  %v119_v31 = vld [vmem:[#allocation2 + $0x78] sm:$0xff] }
  0xb8   :  { %v6739_v44 = vcombine.low %v313_v59, %v317_v34  ;;  %v7935_v56 = vcombine.high %v7923_v21, %v7923_v21 }
  0xba   :  { %1757 = vmatpush1.bf16.msra.mxu0 %v6673_v39  ;;  %1839 = vmatpush1.bf16.msra.mxu1 %v6675_v40  ;;  %v324_v39 = vld [vmem:[#allocation2 + $0x6e0] sm:$0xff]  ;;  %v321_v40 = vld [vmem:[#allocation2 + $0x6c8] sm:$0xff] }
  0xbb   :  { %1758 = vmatprep.subr.bf16.mxu0 %v6682_v41  ;;  %1840 = vmatprep.subr.bf16.mxu1 %v6684_v45  ;;  %v6740_v41 = vcombine.high %v313_v59, %v317_v34  ;;  %v6746_v45 = vcombine.high %v320_v38, %v324_v39  ;;  %v6745_v52 = vcombine.low %v320_v38, %v324_v39  ;;  %v123_v38 = vld [vmem:[#allocation2 + $0x98] sm:$0xff] }
  0xbc   :  { %v6747_v53 = vcombine.low %v321_v40, %v325_v42  ;;  %v127_v39 = vld [vmem:[#allocation2 + $0xb8] sm:$0xff] }
  0xbe   :  { %1759 = vmatpush1.bf16.msra.mxu0 %v6681_v48  ;;  %1841 = vmatpush1.bf16.msra.mxu1 %v6683_v49  ;;  %v332_v48 = vld [vmem:[#allocation2 + $0x720] sm:$0xff]  ;;  %v329_v49 = vld [vmem:[#allocation2 + $0x708] sm:$0xff] }
  0xbf   :  { %1760 = vmatprep.subr.bf16.mxu0 %v6690_v50  ;;  %1842 = vmatprep.subr.bf16.mxu1 %v6692_v54  ;;  %v6748_v50 = vcombine.high %v321_v40, %v325_v42  ;;  %v6754_v54 = vcombine.high %v328_v46, %v332_v48  ;;  %v6753_v62 = vcombine.low %v328_v46, %v332_v48  ;;  %v131_v46 = vld [vmem:[#allocation2 + $0xd8] sm:$0xff] }
  0xc0   :  { %v6755_v63 = vcombine.low %v329_v49, %v333_v51  ;;  %v135_v48 = vld [vmem:[#allocation2 + $0xf8] sm:$0xff] }
  0xc2   :  { %1761 = vmatpush1.bf16.msra.mxu0 %v6689_v57  ;;  %1843 = vmatpush1.bf16.msra.mxu1 %v6691_v58  ;;  %v340_v57 = vld [vmem:[#allocation2 + $0x760] sm:$0xff]  ;;  %v337_v58 = vld [vmem:[#allocation2 + $0x748] sm:$0xff] }
  0xc3   :  { %1762 = vmatprep.subr.bf16.mxu0 %v6698_v60  ;;  %1844 = vmatprep.subr.bf16.mxu1 %v6700_v0  ;;  %v6756_v60 = vcombine.high %v329_v49, %v333_v51  ;;  %v6762_v0 = vcombine.high %v336_v55, %v340_v57  ;;  %v6761_v7 = vcombine.low %v336_v55, %v340_v57  ;;  %v139_v55 = vld [vmem:[#allocation2 + $0x118] sm:$0xff] }
  0xc4   :  { %v6763_v8 = vcombine.low %v337_v58, %v341_v61  ;;  %v143_v57 = vld [vmem:[#allocation2 + $0x138] sm:$0xff] }
  0xc6   :  { %1763 = vmatpush1.bf16.msra.mxu0 %v6697_v2  ;;  %1845 = vmatpush1.bf16.msra.mxu1 %v6699_v4  ;;  %v348_v2 = vld [vmem:[#allocation2 + $0x7a0] sm:$0xff]  ;;  %v345_v4 = vld [vmem:[#allocation2 + $0x788] sm:$0xff] }
  0xc7   :  { %1764 = vmatprep.subr.bf16.mxu0 %v6706_v5  ;;  %1846 = vmatprep.subr.bf16.mxu1 %v6708_v9  ;;  %v6764_v5 = vcombine.high %v337_v58, %v341_v61  ;;  %v6770_v9 = vcombine.high %v344_v1, %v348_v2  ;;  %v6769_v15 = vcombine.low %v344_v1, %v348_v2  ;;  %v151_v1 = vld [vmem:[#allocation2 + $0x178] sm:$0xff] }
  0xc8   :  { %v6771_v16 = vcombine.low %v345_v4, %v349_v6 }
  0xca   :  { %1765 = vmatpush1.bf16.msra.mxu0 %v6705_v11  ;;  %1847 = vmatpush1.bf16.msra.mxu1 %v6707_v12  ;;  %v356_v11 = vld [vmem:[#allocation2 + $0x7e0] sm:$0xff]  ;;  %v353_v12 = vld [vmem:[#allocation2 + $0x7c8] sm:$0xff] }
  0xcb   :  { %1766 = vmatprep.subr.bf16.mxu0 %v6714_v13  ;;  %1848 = vmatprep.subr.bf16.mxu1 %v6716_v17  ;;  %v6772_v13 = vcombine.high %v345_v4, %v349_v6  ;;  %v6778_v17 = vcombine.high %v352_v10, %v356_v11  ;;  %v6777_v24 = vcombine.low %v352_v10, %v356_v11  ;;  %v159_v10 = vld [vmem:[#allocation2 + $0x1b8] sm:$0xff] }
  0xcc   :  { %v6779_v25 = vcombine.low %v353_v12, %v357_v14  ;;  %v6567_v4 = vcombine.low %v139_v55, %v143_v57 }
  0xce   :  { %1767 = vmatpush1.bf16.msra.mxu0 %v6713_v19  ;;  %1849 = vmatpush1.bf16.msra.mxu1 %v6715_v20  ;;  %v110_v19 = vld [vmem:[#allocation2 + $0x30] sm:$0xff]  ;;  %v107_v20 = vld [vmem:[#allocation2 + $0x18] sm:$0xff] }
  0xcf   :  { %1768 = vmatprep.subr.bf16.mxu0 %v6722_v22  ;;  %1850 = vmatprep.subr.bf16.mxu1 %v6724_v26  ;;  %v6780_v22 = vcombine.high %v353_v12, %v357_v14  ;;  %v6534_v26 = vcombine.high %v106_v18, %v110_v19  ;;  %v6533_v59 = vcombine.low %v106_v18, %v110_v19  ;;  %v167_v18 = vld [vmem:[#allocation2 + $0x1f8] sm:$0xff] }
  0xd2   :  { %1769 = vmatpush1.bf16.msra.mxu0 %v6721_v28  ;;  %1851 = vmatpush1.bf16.msra.mxu1 %v6723_v29  ;;  %v118_v28 = vld [vmem:[#allocation2 + $0x70] sm:$0xff]  ;;  %v115_v29 = vld [vmem:[#allocation2 + $0x58] sm:$0xff] }
  0xd3   :  { %1770 = vmatprep.subr.bf16.mxu0 %v6730_v30  ;;  %1852 = vmatprep.subr.bf16.mxu1 %v6732_v33  ;;  %v6536_v30 = vcombine.high %v107_v20, %v111_v23  ;;  %v6535_v33 = vcombine.low %v107_v20, %v111_v23  ;;  %v6542_v34 = vcombine.high %v114_v27, %v118_v28 }
  0xd4   :  { %v6541_v40 = vcombine.low %v114_v27, %v118_v28  ;;  %v175_v27 = vld [vmem:[#allocation2 + $0x238] sm:$0xff] }
  0xd6   :  { %1771 = vmatpush1.bf16.msra.mxu0 %v6729_v35  ;;  %1853 = vmatpush1.bf16.msra.mxu1 %v6731_v36  ;;  %v6544_v35 = vcombine.high %v115_v29, %v119_v31  ;;  %v122_v36 = vld [vmem:[#allocation2 + $0x90] sm:$0xff] }
  0xd7   :  { %1772 = vmatprep.subr.bf16.mxu0 %v6738_v37  ;;  %1854 = vmatprep.subr.bf16.mxu1 %v6740_v41  ;;  %v126_v37 = vld [vmem:[#allocation2 + $0xb0] sm:$0xff]  ;;  %v6543_v41 = vcombine.low %v115_v29, %v119_v31 }
  0xd8   :  { %v6550_v42 = vcombine.high %v122_v36, %v126_v37  ;;  %v6549_v49 = vcombine.low %v122_v36, %v126_v37 }
  0xda   :  { %1773 = vmatpush1.bf16.msra.mxu0 %v6737_v43  ;;  %1855 = vmatpush1.bf16.msra.mxu1 %v6739_v44  ;;  %v6552_v43 = vcombine.high %v123_v38, %v127_v39  ;;  %v130_v44 = vld [vmem:[#allocation2 + $0xd0] sm:$0xff] }
  0xdb   :  { %1774 = vmatprep.subr.bf16.mxu0 %v6746_v45  ;;  %1856 = vmatprep.subr.bf16.mxu1 %v6748_v50  ;;  %v134_v45 = vld [vmem:[#allocation2 + $0xf0] sm:$0xff]  ;;  %v6551_v50 = vcombine.low %v123_v38, %v127_v39 }
  0xdc   :  { %v6558_v51 = vcombine.high %v130_v44, %v134_v45  ;;  %v6557_v58 = vcombine.low %v130_v44, %v134_v45 }
  0xde   :  { %1775 = vmatpush1.bf16.msra.mxu0 %v6745_v52  ;;  %1857 = vmatpush1.bf16.msra.mxu1 %v6747_v53  ;;  %v6560_v52 = vcombine.high %v131_v46, %v135_v48  ;;  %v138_v53 = vld [vmem:[#allocation2 + $0x110] sm:$0xff] }
  0xdf   :  { %1776 = vmatprep.subr.bf16.mxu0 %v6754_v54  ;;  %1858 = vmatprep.subr.bf16.mxu1 %v6756_v60  ;;  %v142_v54 = vld [vmem:[#allocation2 + $0x130] sm:$0xff]  ;;  %v6559_v60 = vcombine.low %v131_v46, %v135_v48 }
  0xe0   :  { %v6566_v61 = vcombine.high %v138_v53, %v142_v54  ;;  %v6565_v2 = vcombine.low %v138_v53, %v142_v54 }
  0xe2   :  { %1777 = vmatpush1.bf16.msra.mxu0 %v6753_v62  ;;  %1859 = vmatpush1.bf16.msra.mxu1 %v6755_v63  ;;  %v146_v62 = vld [vmem:[#allocation2 + $0x150] sm:$0xff] }
  0xe3   :  { %1778 = vmatprep.subr.bf16.mxu0 %v6762_v0  ;;  %1860 = vmatprep.subr.bf16.mxu1 %v6764_v5  ;;  %v150_v63 = vld [vmem:[#allocation2 + $0x170] sm:$0xff]  ;;  %v147_v0 = vld [vmem:[#allocation2 + $0x158] sm:$0xff] }
  0xe4   :  { %v6574_v5 = vcombine.high %v146_v62, %v150_v63  ;;  %v6576_v6 = vcombine.high %v147_v0, %v151_v1  ;;  %v6573_v11 = vcombine.low %v146_v62, %v150_v63  ;;  %v6575_v12 = vcombine.low %v147_v0, %v151_v1 }
  0xe6   :  { %1779 = vmatpush1.bf16.msra.mxu0 %v6761_v7  ;;  %1861 = vmatpush1.bf16.msra.mxu1 %v6763_v8  ;;  %v154_v7 = vld [vmem:[#allocation2 + $0x190] sm:$0xff] }
  0xe7   :  { %1780 = vmatprep.subr.bf16.mxu0 %v6770_v9  ;;  %1862 = vmatprep.subr.bf16.mxu1 %v6772_v13  ;;  %v158_v8 = vld [vmem:[#allocation2 + $0x1b0] sm:$0xff]  ;;  %v155_v9 = vld [vmem:[#allocation2 + $0x198] sm:$0xff] }
  0xe8   :  { %v6582_v13 = vcombine.high %v154_v7, %v158_v8  ;;  %v6584_v14 = vcombine.high %v155_v9, %v159_v10  ;;  %v6581_v19 = vcombine.low %v154_v7, %v158_v8  ;;  %v6583_v20 = vcombine.low %v155_v9, %v159_v10 }
  0xea   :  { %1781 = vmatpush1.bf16.msra.mxu0 %v6769_v15  ;;  %1863 = vmatpush1.bf16.msra.mxu1 %v6771_v16  ;;  %v162_v15 = vld [vmem:[#allocation2 + $0x1d0] sm:$0xff] }
  0xeb   :  { %1782 = vmatprep.subr.bf16.mxu0 %v6778_v17  ;;  %1864 = vmatprep.subr.bf16.mxu1 %v6780_v22  ;;  %v166_v16 = vld [vmem:[#allocation2 + $0x1f0] sm:$0xff]  ;;  %v163_v17 = vld [vmem:[#allocation2 + $0x1d8] sm:$0xff] }
  0xec   :  { %v6590_v22 = vcombine.high %v162_v15, %v166_v16  ;;  %v6592_v23 = vcombine.high %v163_v17, %v167_v18  ;;  %v6589_v28 = vcombine.low %v162_v15, %v166_v16  ;;  %v6591_v29 = vcombine.low %v163_v17, %v167_v18 }
  0xee   :  { %1783 = vmatpush1.bf16.msra.mxu0 %v6777_v24  ;;  %1865 = vmatpush1.bf16.msra.mxu1 %v6779_v25  ;;  %v170_v24 = vld [vmem:[#allocation2 + $0x210] sm:$0xff] }
  0xef   :  { %1875 = vmatprep.subr.bf16.mxu0 %v6534_v26  ;;  %1957 = vmatprep.subr.bf16.mxu1 %v6536_v30  ;;  %v174_v25 = vld [vmem:[#allocation2 + $0x230] sm:$0xff]  ;;  %v171_v26 = vld [vmem:[#allocation2 + $0x218] sm:$0xff] }
  0xf0   :  { %v6598_v30 = vcombine.high %v170_v24, %v174_v25  ;;  %v6600_v31 = vcombine.high %v171_v26, %v175_v27  ;;  %v6597_v36 = vcombine.low %v170_v24, %v174_v25  ;;  %v6599_v37 = vcombine.low %v171_v26, %v175_v27 }
  0xf1   :  { %1785 = vmatmul.mubr.bf16.vlgmr.msra.gmra.mrb[0].mxu0 %v7935_v56  ;;  %1867 = vmatmul.mubr.bf16.vlgmr.msra.gmra.mrb[0].mxu1 %v7935_v56 }
  0xf2   :  { %1876 = vmatpush1.bf16.msra.mxu0 %v6533_v59  ;;  %1958 = vmatpush1.bf16.msra.mxu1 %v6535_v33  ;;  %v178_v59 = vld [vmem:[#allocation2 + $0x250] sm:$0xff] }
  0xf3   :  { %1877 = vmatprep.subr.bf16.mxu0 %v6542_v34  ;;  %1959 = vmatprep.subr.bf16.mxu1 %v6544_v35  ;;  %v182_v33 = vld [vmem:[#allocation2 + $0x270] sm:$0xff]  ;;  %v179_v34 = vld [vmem:[#allocation2 + $0x258] sm:$0xff] }
  0xf4   :  { %1907 = vmatprep.mubr.bf16.mxu0 %v7917_v3  ;;  %1989 = vmatprep.mubr.bf16.mxu1 %v7917_v3  ;;  %v6568_v3 = vcombine.high %v139_v55, %v143_v57  ;;  %v183_v35 = vld [vmem:[#allocation2 + $0x278] sm:$0xff]  ;;  %v6606_v38 = vcombine.high %v178_v59, %v182_v33  ;;  %v6605_v44 = vcombine.low %v178_v59, %v182_v33 }
  0xf5   :  { %v6608_v39 = vcombine.high %v179_v34, %v183_v35  ;;  %v6607_v45 = vcombine.low %v179_v34, %v183_v35 }
  0xf6   :  { %1878 = vmatpush1.bf16.msra.mxu0 %v6541_v40  ;;  %1960 = vmatpush1.bf16.msra.mxu1 %v6543_v41  ;;  %v186_v40 = vld [vmem:[#allocation2 + $0x290] sm:$0xff] }
  0xf7   :  { %1879 = vmatprep.subr.bf16.mxu0 %v6550_v42  ;;  %1961 = vmatprep.subr.bf16.mxu1 %v6552_v43  ;;  %v190_v41 = vld [vmem:[#allocation2 + $0x2b0] sm:$0xff]  ;;  %v187_v42 = vld [vmem:[#allocation2 + $0x298] sm:$0xff] }
  0xf8   :  { %v191_v43 = vld [vmem:[#allocation2 + $0x2b8] sm:$0xff]  ;;  %v6614_v46 = vcombine.high %v186_v40, %v190_v41  ;;  %v6613_v53 = vcombine.low %v186_v40, %v190_v41 }
  0xf9   :  { %v6616_v48 = vcombine.high %v187_v42, %v191_v43  ;;  %v6615_v54 = vcombine.low %v187_v42, %v191_v43 }
  0xfa   :  { %1880 = vmatpush1.bf16.msra.mxu0 %v6549_v49  ;;  %1962 = vmatpush1.bf16.msra.mxu1 %v6551_v50  ;;  %v194_v49 = vld [vmem:[#allocation2 + $0x2d0] sm:$0xff] }
  0xfb   :  { %1881 = vmatprep.subr.bf16.mxu0 %v6558_v51  ;;  %1963 = vmatprep.subr.bf16.mxu1 %v6560_v52  ;;  %v198_v50 = vld [vmem:[#allocation2 + $0x2f0] sm:$0xff]  ;;  %v195_v51 = vld [vmem:[#allocation2 + $0x2d8] sm:$0xff] }
  0xfc   :  { %v199_v52 = vld [vmem:[#allocation2 + $0x2f8] sm:$0xff]  ;;  %v6622_v55 = vcombine.high %v194_v49, %v198_v50  ;;  %v6621_v62 = vcombine.low %v194_v49, %v198_v50 }
  0xfd   :  { %v6624_v57 = vcombine.high %v195_v51, %v199_v52  ;;  %v6623_v63 = vcombine.low %v195_v51, %v199_v52 }
  0xfe   :  { %1882 = vmatpush1.bf16.msra.mxu0 %v6557_v58  ;;  %1964 = vmatpush1.bf16.msra.mxu1 %v6559_v60  ;;  %v202_v58 = vld [vmem:[#allocation2 + $0x310] sm:$0xff] }
  0xff   :  { %1883 = vmatprep.subr.bf16.mxu0 %v6566_v61  ;;  %1965 = vmatprep.subr.bf16.mxu1 %v6568_v3  ;;  %v206_v60 = vld [vmem:[#allocation2 + $0x330] sm:$0xff]  ;;  %v203_v61 = vld [vmem:[#allocation2 + $0x318] sm:$0xff] }
 0x100   :  { %v207_v3 = vld [vmem:[#allocation2 + $0x338] sm:$0xff]  ;;  %v6630_v0 = vcombine.high %v202_v58, %v206_v60  ;;  %v6629_v7 = vcombine.low %v202_v58, %v206_v60 }
 0x101   :  { %v6632_v1 = vcombine.high %v203_v61, %v207_v3  ;;  %v6631_v8 = vcombine.low %v203_v61, %v207_v3  ;;  %v266_v3 = vld [vmem:[#allocation2 + $0x510] sm:$0xff] }
 0x102   :  { %1884 = vmatpush1.bf16.msra.mxu0 %v6565_v2  ;;  %1966 = vmatpush1.bf16.msra.mxu1 %v6567_v4  ;;  %v210_v2 = vld [vmem:[#allocation2 + $0x350] sm:$0xff] }
 0x103   :  { %1885 = vmatprep.subr.bf16.mxu0 %v6574_v5  ;;  %1967 = vmatprep.subr.bf16.mxu1 %v6576_v6  ;;  %v214_v4 = vld [vmem:[#allocation2 + $0x370] sm:$0xff]  ;;  %v211_v5 = vld [vmem:[#allocation2 + $0x358] sm:$0xff] }
 0x104   :  { %v215_v6 = vld [vmem:[#allocation2 + $0x378] sm:$0xff]  ;;  %v6638_v9 = vcombine.high %v210_v2, %v214_v4  ;;  %v6637_v15 = vcombine.low %v210_v2, %v214_v4 }
 0x105   :  { %v6640_v10 = vcombine.high %v211_v5, %v215_v6  ;;  %v6639_v16 = vcombine.low %v211_v5, %v215_v6  ;;  %v274_v5 = vld [vmem:[#allocation2 + $0x550] sm:$0xff] }
 0x106   :  { %1886 = vmatpush1.bf16.msra.mxu0 %v6573_v11  ;;  %1968 = vmatpush1.bf16.msra.mxu1 %v6575_v12  ;;  %v218_v11 = vld [vmem:[#allocation2 + $0x390] sm:$0xff] }
 0x107   :  { %1887 = vmatprep.subr.bf16.mxu0 %v6582_v13  ;;  %1969 = vmatprep.subr.bf16.mxu1 %v6584_v14  ;;  %v222_v12 = vld [vmem:[#allocation2 + $0x3b0] sm:$0xff]  ;;  %v219_v13 = vld [vmem:[#allocation2 + $0x398] sm:$0xff] }
 0x108   :  { %v223_v14 = vld [vmem:[#allocation2 + $0x3b8] sm:$0xff]  ;;  %v6646_v17 = vcombine.high %v218_v11, %v222_v12  ;;  %v6645_v24 = vcombine.low %v218_v11, %v222_v12  ;;  %v278_v6 = vld [vmem:[#allocation2 + $0x570] sm:$0xff] }
 0x109   :  { %v6648_v18 = vcombine.high %v219_v13, %v223_v14  ;;  %v6647_v25 = vcombine.low %v219_v13, %v223_v14  ;;  %v6702_v11 = vcombine.high %v274_v5, %v278_v6  ;;  %v282_v13 = vld [vmem:[#allocation2 + $0x590] sm:$0xff] }
 0x10a   :  { %1888 = vmatpush1.bf16.msra.mxu0 %v6581_v19  ;;  %1970 = vmatpush1.bf16.msra.mxu1 %v6583_v20  ;;  %v226_v19 = vld [vmem:[#allocation2 + $0x3d0] sm:$0xff] }
 0x10b   :  { %1889 = vmatprep.subr.bf16.mxu0 %v6590_v22  ;;  %1971 = vmatprep.subr.bf16.mxu1 %v6592_v23  ;;  %v230_v20 = vld [vmem:[#allocation2 + $0x3f0] sm:$0xff]  ;;  %v227_v22 = vld [vmem:[#allocation2 + $0x3d8] sm:$0xff] }
 0x10c   :  { %v231_v23 = vld [vmem:[#allocation2 + $0x3f8] sm:$0xff]  ;;  %v6654_v26 = vcombine.high %v226_v19, %v230_v20  ;;  %v6653_v59 = vcombine.low %v226_v19, %v230_v20  ;;  %v286_v14 = vld [vmem:[#allocation2 + $0x5b0] sm:$0xff] }
 0x10d   :  { %v6656_v27 = vcombine.high %v227_v22, %v231_v23  ;;  %v6655_v33 = vcombine.low %v227_v22, %v231_v23  ;;  %v6710_v19 = vcombine.high %v282_v13, %v286_v14  ;;  %v290_v22 = vld [vmem:[#allocation2 + $0x5d0] sm:$0xff] }
 0x10e   :  { %1890 = vmatpush1.bf16.msra.mxu0 %v6589_v28  ;;  %1972 = vmatpush1.bf16.msra.mxu1 %v6591_v29  ;;  %v234_v28 = vld [vmem:[#allocation2 + $0x410] sm:$0xff] }
 0x10f   :  { %1891 = vmatprep.subr.bf16.mxu0 %v6598_v30  ;;  %1973 = vmatprep.subr.bf16.mxu1 %v6600_v31  ;;  %v238_v29 = vld [vmem:[#allocation2 + $0x430] sm:$0xff]  ;;  %v235_v30 = vld [vmem:[#allocation2 + $0x418] sm:$0xff] }
 0x110   :  { %v239_v31 = vld [vmem:[#allocation2 + $0x438] sm:$0xff]  ;;  %v6662_v34 = vcombine.high %v234_v28, %v238_v29  ;;  %v6661_v40 = vcombine.low %v234_v28, %v238_v29  ;;  %v294_v23 = vld [vmem:[#allocation2 + $0x5f0] sm:$0xff] }
 0x111   :  { %v6664_v35 = vcombine.high %v235_v30, %v239_v31  ;;  %v6663_v41 = vcombine.low %v235_v30, %v239_v31  ;;  %v6718_v28 = vcombine.high %v290_v22, %v294_v23  ;;  %v298_v30 = vld [vmem:[#allocation2 + $0x610] sm:$0xff] }
 0x112   :  { %1892 = vmatpush1.bf16.msra.mxu0 %v6597_v36  ;;  %1974 = vmatpush1.bf16.msra.mxu1 %v6599_v37  ;;  %v242_v36 = vld [vmem:[#allocation2 + $0x450] sm:$0xff] }
 0x113   :  { %1893 = vmatprep.subr.bf16.mxu0 %v6606_v38  ;;  %1975 = vmatprep.subr.bf16.mxu1 %v6608_v39  ;;  %v246_v37 = vld [vmem:[#allocation2 + $0x470] sm:$0xff]  ;;  %v243_v38 = vld [vmem:[#allocation2 + $0x458] sm:$0xff] }
 0x114   :  { %v247_v39 = vld [vmem:[#allocation2 + $0x478] sm:$0xff]  ;;  %v6670_v42 = vcombine.high %v242_v36, %v246_v37  ;;  %v6669_v49 = vcombine.low %v242_v36, %v246_v37  ;;  %v302_v31 = vld [vmem:[#allocation2 + $0x630] sm:$0xff] }
 0x115   :  { %v6672_v43 = vcombine.high %v243_v38, %v247_v39  ;;  %v6671_v50 = vcombine.low %v243_v38, %v247_v39  ;;  %v6726_v36 = vcombine.high %v298_v30, %v302_v31  ;;  %v306_v38 = vld [vmem:[#allocation2 + $0x650] sm:$0xff] }
 0x116   :  { %1894 = vmatpush1.bf16.msra.mxu0 %v6605_v44  ;;  %1976 = vmatpush1.bf16.msra.mxu1 %v6607_v45  ;;  %v250_v44 = vld [vmem:[#allocation2 + $0x490] sm:$0xff] }
 0x117   :  { %1895 = vmatprep.subr.bf16.mxu0 %v6614_v46  ;;  %1977 = vmatprep.subr.bf16.mxu1 %v6616_v48  ;;  %v254_v45 = vld [vmem:[#allocation2 + $0x4b0] sm:$0xff]  ;;  %v251_v46 = vld [vmem:[#allocation2 + $0x498] sm:$0xff] }
 0x118   :  { %v255_v48 = vld [vmem:[#allocation2 + $0x4b8] sm:$0xff]  ;;  %v6678_v51 = vcombine.high %v250_v44, %v254_v45  ;;  %v6677_v58 = vcombine.low %v250_v44, %v254_v45  ;;  %v310_v39 = vld [vmem:[#allocation2 + $0x670] sm:$0xff] }
 0x119   :  { %v6680_v52 = vcombine.high %v251_v46, %v255_v48  ;;  %v6734_v44 = vcombine.high %v306_v38, %v310_v39 }
 0x11a   :  { %1896 = vmatpush1.bf16.msra.mxu0 %v6613_v53  ;;  %1978 = vmatpush1.bf16.msra.mxu1 %v6615_v54  ;;  %v258_v53 = vld [vmem:[#allocation2 + $0x4d0] sm:$0xff] }
 0x11b   :  { %1897 = vmatprep.subr.bf16.mxu0 %v6622_v55  ;;  %1979 = vmatprep.subr.bf16.mxu1 %v6624_v57  ;;  %v262_v54 = vld [vmem:[#allocation2 + $0x4f0] sm:$0xff]  ;;  %v259_v55 = vld [vmem:[#allocation2 + $0x4d8] sm:$0xff] }
 0x11c   :  { %v263_v57 = vld [vmem:[#allocation2 + $0x4f8] sm:$0xff]  ;;  %v6686_v60 = vcombine.high %v258_v53, %v262_v54 }
 0x11d   :  { %v6688_v61 = vcombine.high %v259_v55, %v263_v57  ;;  %v6687_v2 = vcombine.low %v259_v55, %v263_v57  ;;  %v322_v55 = vld [vmem:[#allocation2 + $0x6d0] sm:$0xff] }
 0x11e   :  { %1898 = vmatpush1.bf16.msra.mxu0 %v6621_v62  ;;  %1980 = vmatpush1.bf16.msra.mxu1 %v6623_v63  ;;  %v270_v62 = vld [vmem:[#allocation2 + $0x530] sm:$0xff]  ;;  %v267_v63 = vld [vmem:[#allocation2 + $0x518] sm:$0xff] }
 0x11f   :  { %1899 = vmatprep.subr.bf16.mxu0 %v6630_v0  ;;  %1981 = vmatprep.subr.bf16.mxu1 %v6632_v1  ;;  %v271_v0 = vld [vmem:[#allocation2 + $0x538] sm:$0xff]  ;;  %v6685_v1 = vcombine.low %v258_v53, %v262_v54  ;;  %v6694_v4 = vcombine.high %v266_v3, %v270_v62  ;;  %v326_v57 = vld [vmem:[#allocation2 + $0x6f0] sm:$0xff] }
 0x122   :  { %1900 = vmatpush1.bf16.msra.mxu0 %v6629_v7  ;;  %1982 = vmatpush1.bf16.msra.mxu1 %v6631_v8  ;;  %v275_v7 = vld [vmem:[#allocation2 + $0x558] sm:$0xff] }
 0x123   :  { %1901 = vmatprep.subr.bf16.mxu0 %v6638_v9  ;;  %1983 = vmatprep.subr.bf16.mxu1 %v6640_v10  ;;  %v279_v8 = vld [vmem:[#allocation2 + $0x578] sm:$0xff]  ;;  %v6693_v9 = vcombine.low %v266_v3, %v270_v62  ;;  %v6695_v10 = vcombine.low %v267_v63, %v271_v0  ;;  %v6750_v3 = vcombine.high %v322_v55, %v326_v57 }
 0x124   :  { %v6704_v12 = vcombine.high %v275_v7, %v279_v8 }
 0x126   :  { %1902 = vmatpush1.bf16.msra.mxu0 %v6637_v15  ;;  %1984 = vmatpush1.bf16.msra.mxu1 %v6639_v16  ;;  %v283_v15 = vld [vmem:[#allocation2 + $0x598] sm:$0xff] }
 0x127   :  { %1903 = vmatprep.subr.bf16.mxu0 %v6646_v17  ;;  %1985 = vmatprep.subr.bf16.mxu1 %v6648_v18  ;;  %v287_v16 = vld [vmem:[#allocation2 + $0x5b8] sm:$0xff]  ;;  %v6701_v17 = vcombine.low %v274_v5, %v278_v6  ;;  %v6703_v18 = vcombine.low %v275_v7, %v279_v8  ;;  %v338_v7 = vld [vmem:[#allocation2 + $0x750] sm:$0xff] }
 0x128   :  { %v6712_v20 = vcombine.high %v283_v15, %v287_v16  ;;  %v342_v8 = vld [vmem:[#allocation2 + $0x770] sm:$0xff] }
 0x12a   :  { %1904 = vmatpush1.bf16.msra.mxu0 %v6645_v24  ;;  %1986 = vmatpush1.bf16.msra.mxu1 %v6647_v25  ;;  %v291_v24 = vld [vmem:[#allocation2 + $0x5d8] sm:$0xff] }
 0x12b   :  { %1905 = vmatprep.subr.bf16.mxu0 %v6654_v26  ;;  %1987 = vmatprep.subr.bf16.mxu1 %v6656_v27  ;;  %v295_v25 = vld [vmem:[#allocation2 + $0x5f8] sm:$0xff]  ;;  %v6709_v26 = vcombine.low %v282_v13, %v286_v14  ;;  %v6711_v27 = vcombine.low %v283_v15, %v287_v16  ;;  %v6766_v13 = vcombine.high %v338_v7, %v342_v8  ;;  %v346_v15 = vld [vmem:[#allocation2 + $0x790] sm:$0xff] }
 0x12c   :  { %v6720_v29 = vcombine.high %v291_v24, %v295_v25  ;;  %v350_v16 = vld [vmem:[#allocation2 + $0x7b0] sm:$0xff] }
 0x12e   :  { %1906 = vmatpush1.bf16.msra.mxu0 %v6653_v59  ;;  %1988 = vmatpush1.bf16.msra.mxu1 %v6655_v33  ;;  %v299_v59 = vld [vmem:[#allocation2 + $0x618] sm:$0xff] }
 0x12f   :  { %1916 = vmatprep.subr.bf16.mxu0 %v6662_v34  ;;  %1998 = vmatprep.subr.bf16.mxu1 %v6664_v35  ;;  %v303_v33 = vld [vmem:[#allocation2 + $0x638] sm:$0xff]  ;;  %v6717_v34 = vcombine.low %v290_v22, %v294_v23  ;;  %v6719_v35 = vcombine.low %v291_v24, %v295_v25  ;;  %v6774_v22 = vcombine.high %v346_v15, %v350_v16  ;;  %v354_v24 = vld [vmem:[#allocation2 + $0x7d0] sm:$0xff] }
 0x130   :  { %v6728_v37 = vcombine.high %v299_v59, %v303_v33  ;;  %v358_v25 = vld [vmem:[#allocation2 + $0x7f0] sm:$0xff] }
 0x131   :  { %1908 = vmatmul.mubr.bf16.vlgmr.msra.gmra.mrb[4].mxu0 %v7923_v21  ;;  %1990 = vmatmul.mubr.bf16.vlgmr.msra.gmra.mrb[4].mxu1 %v7923_v21  ;;  %v6679_v21 = vcombine.low %v251_v46, %v255_v48  ;;  %v314_v46 = vld [vmem:[#allocation2 + $0x690] sm:$0xff] }
 0x132   :  { %1917 = vmatpush1.bf16.msra.mxu0 %v6661_v40  ;;  %1999 = vmatpush1.bf16.msra.mxu1 %v6663_v41  ;;  %v307_v40 = vld [vmem:[#allocation2 + $0x658] sm:$0xff]  ;;  %v318_v48 = vld [vmem:[#allocation2 + $0x6b0] sm:$0xff] }
 0x133   :  { %1918 = vmatprep.subr.bf16.mxu0 %v6670_v42  ;;  %2000 = vmatprep.subr.bf16.mxu1 %v6672_v43  ;;  %v311_v41 = vld [vmem:[#allocation2 + $0x678] sm:$0xff]  ;;  %v6725_v42 = vcombine.low %v298_v30, %v302_v31  ;;  %v6727_v43 = vcombine.low %v299_v59, %v303_v33  ;;  %v6742_v53 = vcombine.high %v314_v46, %v318_v48  ;;  %v2055_v59 = vld [vmem:[#allocation6] sm:$0xff] }
 0x134   :  { %1948 = vmatprep.mubr.bf16.mxu0 %v7927_v32  ;;  %2030 = vmatprep.mubr.bf16.mxu1 %v7927_v32  ;;  %v6696_v32 = vcombine.high %v267_v63, %v271_v0  ;;  %v6736_v45 = vcombine.high %v307_v40, %v311_v41  ;;  %v330_v63 = vld [vmem:[#allocation2 + $0x710] sm:$0xff]  ;;  %v6782_v30 = vcombine.high %v354_v24, %v358_v25  ;;  %v2059_v33 = vld [vmem:[#allocation6 + $0x20] sm:$0xff] }
 0x135   :  { %v334_v0 = vld [vmem:[#allocation2 + $0x730] sm:$0xff] }
 0x136   :  { %1919 = vmatpush1.bf16.msra.mxu0 %v6669_v49  ;;  %2001 = vmatpush1.bf16.msra.mxu1 %v6671_v50  ;;  %v315_v49 = vld [vmem:[#allocation2 + $0x698] sm:$0xff]  ;;  %v6758_v5 = vcombine.high %v330_v63, %v334_v0 }
 0x137   :  { %1920 = vmatprep.subr.bf16.mxu0 %v6678_v51  ;;  %2002 = vmatprep.subr.bf16.mxu1 %v6680_v52  ;;  %v319_v50 = vld [vmem:[#allocation2 + $0x6b8] sm:$0xff]  ;;  %v6733_v51 = vcombine.low %v306_v38, %v310_v39  ;;  %v6735_v52 = vcombine.low %v307_v40, %v311_v41  ;;  %v6786_v38 = vcombine.high %v2055_v59, %v2059_v33  ;;  %v2063_v40 = vld [vmem:[#allocation6 + $0x40] sm:$0xff] }
 0x138   :  { %v6744_v54 = vcombine.high %v315_v49, %v319_v50  ;;  %v2067_v41 = vld [vmem:[#allocation6 + $0x60] sm:$0xff] }
 0x13a   :  { %1921 = vmatpush1.bf16.msra.mxu0 %v6677_v58  ;;  %2003 = vmatpush1.bf16.msra.mxu1 %v6679_v21  ;;  %v323_v58 = vld [vmem:[#allocation2 + $0x6d8] sm:$0xff] }
 0x13b   :  { %1922 = vmatprep.subr.bf16.mxu0 %v6686_v60  ;;  %2004 = vmatprep.subr.bf16.mxu1 %v6688_v61  ;;  %v327_v21 = vld [vmem:[#allocation2 + $0x6f8] sm:$0xff]  ;;  %v6741_v60 = vcombine.low %v314_v46, %v318_v48  ;;  %v6743_v61 = vcombine.low %v315_v49, %v319_v50  ;;  %v6794_v46 = vcombine.high %v2063_v40, %v2067_v41  ;;  %v2071_v49 = vld [vmem:[#allocation6 + $0x80] sm:$0xff] }
 0x13c   :  { %v6752_v62 = vcombine.high %v323_v58, %v327_v21  ;;  %v2075_v50 = vld [vmem:[#allocation6 + $0xa0] sm:$0xff] }
 0x13e   :  { %1923 = vmatpush1.bf16.msra.mxu0 %v6685_v1  ;;  %2005 = vmatpush1.bf16.msra.mxu1 %v6687_v2  ;;  %v331_v1 = vld [vmem:[#allocation2 + $0x718] sm:$0xff] }
 0x13f   :  { %1924 = vmatprep.subr.bf16.mxu0 %v6694_v4  ;;  %2006 = vmatprep.subr.bf16.mxu1 %v6696_v32  ;;  %v335_v2 = vld [vmem:[#allocation2 + $0x738] sm:$0xff]  ;;  %v6749_v4 = vcombine.low %v322_v55, %v326_v57  ;;  %v6751_v32 = vcombine.low %v323_v58, %v327_v21  ;;  %v6802_v55 = vcombine.high %v2071_v49, %v2075_v50  ;;  %v2079_v58 = vld [vmem:[#allocation6 + $0xc0] sm:$0xff] }
 0x140   :  { %v6760_v6 = vcombine.high %v331_v1, %v335_v2  ;;  %v2083_v21 = vld [vmem:[#allocation6 + $0xe0] sm:$0xff] }
 0x142   :  { %1925 = vmatpush1.bf16.msra.mxu0 %v6693_v9  ;;  %2007 = vmatpush1.bf16.msra.mxu1 %v6695_v10  ;;  %v339_v9 = vld [vmem:[#allocation2 + $0x758] sm:$0xff] }
 0x143   :  { %1926 = vmatprep.subr.bf16.mxu0 %v6702_v11  ;;  %2008 = vmatprep.subr.bf16.mxu1 %v6704_v12  ;;  %v343_v10 = vld [vmem:[#allocation2 + $0x778] sm:$0xff]  ;;  %v6757_v11 = vcombine.low %v330_v63, %v334_v0  ;;  %v6759_v12 = vcombine.low %v331_v1, %v335_v2  ;;  %v6810_v63 = vcombine.high %v2079_v58, %v2083_v21  ;;  %v2087_v0 = vld [vmem:[#allocation6 + $0x100] sm:$0xff]  ;;  %v2088_v2 = vld [vmem:[#allocation6 + $0x108] sm:$0xff] }
 0x144   :  { %v6768_v14 = vcombine.high %v339_v9, %v343_v10  ;;  %v2091_v1 = vld [vmem:[#allocation6 + $0x120] sm:$0xff] }
 0x146   :  { %1927 = vmatpush1.bf16.msra.mxu0 %v6701_v17  ;;  %2009 = vmatpush1.bf16.msra.mxu1 %v6703_v18  ;;  %v347_v17 = vld [vmem:[#allocation2 + $0x798] sm:$0xff] }
 0x147   :  { %1928 = vmatprep.subr.bf16.mxu0 %v6710_v19  ;;  %2010 = vmatprep.subr.bf16.mxu1 %v6712_v20  ;;  %v351_v18 = vld [vmem:[#allocation2 + $0x7b8] sm:$0xff]  ;;  %v6765_v19 = vcombine.low %v338_v7, %v342_v8  ;;  %v6767_v20 = vcombine.low %v339_v9, %v343_v10  ;;  %v2095_v8 = vld [vmem:[#allocation6 + $0x140] sm:$0xff]  ;;  %v2096_v10 = vld [vmem:[#allocation6 + $0x148] sm:$0xff] }
 0x148   :  { %v6776_v23 = vcombine.high %v347_v17, %v351_v18  ;;  %v2099_v9 = vld [vmem:[#allocation6 + $0x160] sm:$0xff] }
 0x14a   :  { %1929 = vmatpush1.bf16.msra.mxu0 %v6709_v26  ;;  %2011 = vmatpush1.bf16.msra.mxu1 %v6711_v27  ;;  %v355_v26 = vld [vmem:[#allocation2 + $0x7d8] sm:$0xff] }
 0x14b   :  { %1930 = vmatprep.subr.bf16.mxu0 %v6718_v28  ;;  %2012 = vmatprep.subr.bf16.mxu1 %v6720_v29  ;;  %v359_v27 = vld [vmem:[#allocation2 + $0x7f8] sm:$0xff]  ;;  %v6773_v28 = vcombine.low %v346_v15, %v350_v16  ;;  %v6775_v29 = vcombine.low %v347_v17, %v351_v18  ;;  %v2103_v16 = vld [vmem:[#allocation6 + $0x180] sm:$0xff]  ;;  %v2104_v18 = vld [vmem:[#allocation6 + $0x188] sm:$0xff] }
 0x14c   :  { %v6784_v31 = vcombine.high %v355_v26, %v359_v27  ;;  %v2107_v17 = vld [vmem:[#allocation6 + $0x1a0] sm:$0xff] }
 0x14e   :  { %1931 = vmatpush1.bf16.msra.mxu0 %v6717_v34  ;;  %2013 = vmatpush1.bf16.msra.mxu1 %v6719_v35  ;;  %v2056_v34 = vld [vmem:[#allocation6 + $0x8] sm:$0xff] }
 0x14f   :  { %1932 = vmatprep.subr.bf16.mxu0 %v6726_v36  ;;  %2014 = vmatprep.subr.bf16.mxu1 %v6728_v37  ;;  %v2060_v35 = vld [vmem:[#allocation6 + $0x28] sm:$0xff]  ;;  %v6781_v36 = vcombine.low %v354_v24, %v358_v25  ;;  %v6783_v37 = vcombine.low %v355_v26, %v359_v27  ;;  %v2111_v25 = vld [vmem:[#allocation6 + $0x1c0] sm:$0xff] }
 0x150   :  { %v6788_v39 = vcombine.high %v2056_v34, %v2060_v35  ;;  %v2115_v26 = vld [vmem:[#allocation6 + $0x1e0] sm:$0xff]  ;;  %v2112_v27 = vld [vmem:[#allocation6 + $0x1c8] sm:$0xff] }
 0x152   :  { %1933 = vmatpush1.bf16.msra.mxu0 %v6725_v42  ;;  %2015 = vmatpush1.bf16.msra.mxu1 %v6727_v43  ;;  %v2064_v42 = vld [vmem:[#allocation6 + $0x48] sm:$0xff] }
 0x153   :  { %1934 = vmatprep.subr.bf16.mxu0 %v6734_v44  ;;  %2016 = vmatprep.subr.bf16.mxu1 %v6736_v45  ;;  %v2068_v43 = vld [vmem:[#allocation6 + $0x68] sm:$0xff]  ;;  %v6785_v44 = vcombine.low %v2055_v59, %v2059_v33  ;;  %v6787_v45 = vcombine.low %v2056_v34, %v2060_v35  ;;  %v2119_v33 = vld [vmem:[#allocation6 + $0x200] sm:$0xff] }
 0x154   :  { %v6796_v48 = vcombine.high %v2064_v42, %v2068_v43  ;;  %v2123_v34 = vld [vmem:[#allocation6 + $0x220] sm:$0xff]  ;;  %v2120_v35 = vld [vmem:[#allocation6 + $0x208] sm:$0xff] }
 0x156   :  { %1935 = vmatpush1.bf16.msra.mxu0 %v6733_v51  ;;  %2017 = vmatpush1.bf16.msra.mxu1 %v6735_v52  ;;  %v2072_v51 = vld [vmem:[#allocation6 + $0x88] sm:$0xff] }
 0x157   :  { %1936 = vmatprep.subr.bf16.mxu0 %v6742_v53  ;;  %2018 = vmatprep.subr.bf16.mxu1 %v6744_v54  ;;  %v2076_v52 = vld [vmem:[#allocation6 + $0xa8] sm:$0xff]  ;;  %v6793_v53 = vcombine.low %v2063_v40, %v2067_v41  ;;  %v6795_v54 = vcombine.low %v2064_v42, %v2068_v43  ;;  %v2127_v41 = vld [vmem:[#allocation6 + $0x240] sm:$0xff] }
 0x158   :  { %v6804_v57 = vcombine.high %v2072_v51, %v2076_v52  ;;  %v2131_v42 = vld [vmem:[#allocation6 + $0x260] sm:$0xff]  ;;  %v2128_v43 = vld [vmem:[#allocation6 + $0x248] sm:$0xff] }
 0x15a   :  { %1937 = vmatpush1.bf16.msra.mxu0 %v6741_v60  ;;  %2019 = vmatpush1.bf16.msra.mxu1 %v6743_v61  ;;  %v2080_v60 = vld [vmem:[#allocation6 + $0xc8] sm:$0xff] }
 0x15b   :  { %1938 = vmatprep.subr.bf16.mxu0 %v6750_v3  ;;  %2020 = vmatprep.subr.bf16.mxu1 %v6752_v62  ;;  %v2084_v61 = vld [vmem:[#allocation6 + $0xe8] sm:$0xff]  ;;  %v6801_v3 = vcombine.low %v2071_v49, %v2075_v50  ;;  %v6803_v62 = vcombine.low %v2072_v51, %v2076_v52  ;;  %v2135_v50 = vld [vmem:[#allocation6 + $0x280] sm:$0xff] }
 0x15c   :  { %v2139_v51 = vld [vmem:[#allocation6 + $0x2a0] sm:$0xff]  ;;  %v2136_v52 = vld [vmem:[#allocation6 + $0x288] sm:$0xff] }
 0x15e   :  { %1939 = vmatpush1.bf16.msra.mxu0 %v6749_v4  ;;  %2021 = vmatpush1.bf16.msra.mxu1 %v6751_v32  ;;  %v2092_v4 = vld [vmem:[#allocation6 + $0x128] sm:$0xff]  ;;  %v6809_v32 = vcombine.low %v2079_v58, %v2083_v21  ;;  %v2143_v21 = vld [vmem:[#allocation6 + $0x2c0] sm:$0xff] }
 0x15f   :  { %1940 = vmatprep.subr.bf16.mxu0 %v6758_v5  ;;  %2022 = vmatprep.subr.bf16.mxu1 %v6760_v6  ;;  %v6811_v5 = vcombine.low %v2080_v60, %v2084_v61  ;;  %v6818_v6 = vcombine.high %v2087_v0, %v2091_v1  ;;  %v6820_v7 = vcombine.high %v2088_v2, %v2092_v4 }
 0x162   :  { %1941 = vmatpush1.bf16.msra.mxu0 %v6757_v11  ;;  %2023 = vmatpush1.bf16.msra.mxu1 %v6759_v12  ;;  %v2100_v11 = vld [vmem:[#allocation6 + $0x168] sm:$0xff]  ;;  %v6817_v12 = vcombine.low %v2087_v0, %v2091_v1  ;;  %v2151_v1 = vld [vmem:[#allocation6 + $0x300] sm:$0xff] }
 0x163   :  { %1942 = vmatprep.subr.bf16.mxu0 %v6766_v13  ;;  %2024 = vmatprep.subr.bf16.mxu1 %v6768_v14  ;;  %v6819_v13 = vcombine.low %v2088_v2, %v2092_v4  ;;  %v6826_v14 = vcombine.high %v2095_v8, %v2099_v9  ;;  %v6828_v15 = vcombine.high %v2096_v10, %v2100_v11  ;;  %v2155_v2 = vld [vmem:[#allocation6 + $0x320] sm:$0xff]  ;;  %v2152_v4 = vld [vmem:[#allocation6 + $0x308] sm:$0xff] }
 0x166   :  { %1943 = vmatpush1.bf16.msra.mxu0 %v6765_v19  ;;  %2025 = vmatpush1.bf16.msra.mxu1 %v6767_v20  ;;  %v2108_v19 = vld [vmem:[#allocation6 + $0x1a8] sm:$0xff]  ;;  %v6825_v20 = vcombine.low %v2095_v8, %v2099_v9  ;;  %v2159_v9 = vld [vmem:[#allocation6 + $0x340] sm:$0xff] }
 0x167   :  { %1944 = vmatprep.subr.bf16.mxu0 %v6774_v22  ;;  %2026 = vmatprep.subr.bf16.mxu1 %v6776_v23  ;;  %v6827_v22 = vcombine.low %v2096_v10, %v2100_v11  ;;  %v6834_v23 = vcombine.high %v2103_v16, %v2107_v17  ;;  %v6836_v24 = vcombine.high %v2104_v18, %v2108_v19  ;;  %v2163_v10 = vld [vmem:[#allocation6 + $0x360] sm:$0xff]  ;;  %v2160_v11 = vld [vmem:[#allocation6 + $0x348] sm:$0xff] }
 0x16a   :  { %1945 = vmatpush1.bf16.msra.mxu0 %v6773_v28  ;;  %2027 = vmatpush1.bf16.msra.mxu1 %v6775_v29  ;;  %v2116_v28 = vld [vmem:[#allocation6 + $0x1e8] sm:$0xff]  ;;  %v6833_v29 = vcombine.low %v2103_v16, %v2107_v17  ;;  %v2167_v17 = vld [vmem:[#allocation6 + $0x380] sm:$0xff] }
 0x16b   :  { %1946 = vmatprep.subr.bf16.mxu0 %v6782_v30  ;;  %2028 = vmatprep.subr.bf16.mxu1 %v6784_v31  ;;  %v6835_v30 = vcombine.low %v2104_v18, %v2108_v19  ;;  %v6842_v31 = vcombine.high %v2111_v25, %v2115_v26  ;;  %v6844_v59 = vcombine.high %v2112_v27, %v2116_v28  ;;  %v2171_v18 = vld [vmem:[#allocation6 + $0x3a0] sm:$0xff]  ;;  %v2168_v19 = vld [vmem:[#allocation6 + $0x388] sm:$0xff] }
 0x16e   :  { %1947 = vmatpush1.bf16.msra.mxu0 %v6781_v36  ;;  %2029 = vmatpush1.bf16.msra.mxu1 %v6783_v37  ;;  %v2124_v36 = vld [vmem:[#allocation6 + $0x228] sm:$0xff]  ;;  %v6841_v37 = vcombine.low %v2111_v25, %v2115_v26  ;;  %v2175_v26 = vld [vmem:[#allocation6 + $0x3c0] sm:$0xff] }
 0x16f   :  { %5169 = vmatprep.subr.bf16.mxu0 %v6786_v38  ;;  %5333 = vmatprep.subr.bf16.mxu1 %v6788_v39  ;;  %v6843_v38 = vcombine.low %v2112_v27, %v2116_v28  ;;  %v6850_v39 = vcombine.high %v2119_v33, %v2123_v34  ;;  %v6852_v40 = vcombine.high %v2120_v35, %v2124_v36  ;;  %v2179_v27 = vld [vmem:[#allocation6 + $0x3e0] sm:$0xff]  ;;  %v2176_v28 = vld [vmem:[#allocation6 + $0x3c8] sm:$0xff] }
 0x171   :  { %1949 = vmatmul.mubr.bf16.vlgmr.msra.gmra.mrb[4].mxu0 %v7935_v56  ;;  %2031 = vmatmul.mubr.bf16.vlgmr.msra.gmra.mrb[4].mxu1 %v7935_v56  ;;  %v6812_v56 = vcombine.high %v2080_v60, %v2084_v61  ;;  %v2147_v60 = vld [vmem:[#allocation6 + $0x2e0] sm:$0xff]  ;;  %v2144_v61 = vld [vmem:[#allocation6 + $0x2c8] sm:$0xff] }
 0x172   :  { %5170 = vmatpush1.bf16.msra.mxu0 %v6785_v44  ;;  %5334 = vmatpush1.bf16.msra.mxu1 %v6787_v45  ;;  %v2132_v44 = vld [vmem:[#allocation6 + $0x268] sm:$0xff]  ;;  %v6849_v45 = vcombine.low %v2119_v33, %v2123_v34  ;;  %v2183_v34 = vld [vmem:[#allocation6 + $0x400] sm:$0xff] }
 0x173   :  { %5171 = vmatprep.subr.bf16.mxu0 %v6794_v46  ;;  %5335 = vmatprep.subr.bf16.mxu1 %v6796_v48  ;;  %v6851_v46 = vcombine.low %v2120_v35, %v2124_v36  ;;  %v6858_v48 = vcombine.high %v2127_v41, %v2131_v42  ;;  %v6860_v49 = vcombine.high %v2128_v43, %v2132_v44  ;;  %v2187_v35 = vld [vmem:[#allocation6 + $0x420] sm:$0xff]  ;;  %v2184_v36 = vld [vmem:[#allocation6 + $0x408] sm:$0xff] }
 0x176   :  { %5172 = vmatpush1.bf16.msra.mxu0 %v6793_v53  ;;  %5336 = vmatpush1.bf16.msra.mxu1 %v6795_v54  ;;  %v2140_v53 = vld [vmem:[#allocation6 + $0x2a8] sm:$0xff]  ;;  %v6857_v54 = vcombine.low %v2127_v41, %v2131_v42  ;;  %v1673_v42 = vsub.s32 0, %v7904_v47 }
 0x177   :  { %5173 = vmatprep.subr.bf16.mxu0 %v6802_v55  ;;  %5337 = vmatprep.subr.bf16.mxu1 %v6804_v57  ;;  %v6859_v55 = vcombine.low %v2128_v43, %v2132_v44  ;;  %v6866_v57 = vcombine.high %v2135_v50, %v2139_v51  ;;  %v6868_v58 = vcombine.high %v2136_v52, %v2140_v53  ;;  %v7948_v43 = vld [vmem:[#allocation4] sm:$0xff]  ;;  %v1677_v44 = vsub.s32 1, %v7904_v47 }
 0x17a   :  { %5174 = vmatpush1.bf16.msra.mxu0 %v6801_v3  ;;  %5338 = vmatpush1.bf16.msra.mxu1 %v6803_v62  ;;  %v2148_v3 = vld [vmem:[#allocation6 + $0x2e8] sm:$0xff]  ;;  %v6865_v62 = vcombine.low %v2135_v50, %v2139_v51 }
 0x17b   :  { %5175 = vmatprep.subr.bf16.mxu0 %v6810_v63  ;;  %5339 = vmatprep.subr.bf16.mxu1 %v6812_v56  ;;  %v6867_v63 = vcombine.low %v2136_v52, %v2140_v53  ;;  %v6874_v56 = vcombine.high %v2143_v21, %v2147_v60  ;;  %v6876_v0 = vcombine.high %v2144_v61, %v2148_v3 }
 0x17e   :  { %5176 = vmatpush1.bf16.msra.mxu0 %v6809_v32  ;;  %5340 = vmatpush1.bf16.msra.mxu1 %v6811_v5  ;;  %v2156_v32 = vld [vmem:[#allocation6 + $0x328] sm:$0xff]  ;;  %v6873_v5 = vcombine.low %v2143_v21, %v2147_v60 }
 0x17f   :  { %5177 = vmatprep.subr.bf16.mxu0 %v6818_v6  ;;  %5341 = vmatprep.subr.bf16.mxu1 %v6820_v7  ;;  %v6875_v6 = vcombine.low %v2144_v61, %v2148_v3  ;;  %v6882_v7 = vcombine.high %v2151_v1, %v2155_v2  ;;  %v6884_v8 = vcombine.high %v2152_v4, %v2156_v32 }
 0x182   :  { %5178 = vmatpush1.bf16.msra.mxu0 %v6817_v12  ;;  %5342 = vmatpush1.bf16.msra.mxu1 %v6819_v13  ;;  %v2164_v12 = vld [vmem:[#allocation6 + $0x368] sm:$0xff]  ;;  %v6881_v13 = vcombine.low %v2151_v1, %v2155_v2 }
 0x183   :  { %5179 = vmatprep.subr.bf16.mxu0 %v6826_v14  ;;  %5343 = vmatprep.subr.bf16.mxu1 %v6828_v15  ;;  %v6883_v14 = vcombine.low %v2152_v4, %v2156_v32  ;;  %v6890_v15 = vcombine.high %v2159_v9, %v2163_v10  ;;  %v6892_v16 = vcombine.high %v2160_v11, %v2164_v12  ;;  %v2196_v1 = vld [vmem:[#allocation6 + $0x468] sm:$0xff] }
 0x184   :  { %v6913_v32 = vcombine.low %v2183_v34, %v2187_v35 }
 0x186   :  { %5180 = vmatpush1.bf16.msra.mxu0 %v6825_v20  ;;  %5344 = vmatpush1.bf16.msra.mxu1 %v6827_v22  ;;  %v2172_v20 = vld [vmem:[#allocation6 + $0x3a8] sm:$0xff]  ;;  %v6889_v22 = vcombine.low %v2159_v9, %v2163_v10  ;;  %v2203_v10 = vld [vmem:[#allocation6 + $0x4a0] sm:$0xff] }
 0x187   :  { %5181 = vmatprep.subr.bf16.mxu0 %v6834_v23  ;;  %5345 = vmatprep.subr.bf16.mxu1 %v6836_v24  ;;  %v6891_v23 = vcombine.low %v2160_v11, %v2164_v12  ;;  %v6898_v24 = vcombine.high %v2167_v17, %v2171_v18  ;;  %v6900_v25 = vcombine.high %v2168_v19, %v2172_v20  ;;  %v2200_v11 = vld [vmem:[#allocation6 + $0x488] sm:$0xff] }
 0x188   :  { %v2204_v12 = vld [vmem:[#allocation6 + $0x4a8] sm:$0xff] }
 0x18a   :  { %5182 = vmatpush1.bf16.msra.mxu0 %v6833_v29  ;;  %5346 = vmatpush1.bf16.msra.mxu1 %v6835_v30  ;;  %v2180_v29 = vld [vmem:[#allocation6 + $0x3e8] sm:$0xff]  ;;  %v6897_v30 = vcombine.low %v2167_v17, %v2171_v18  ;;  %v6932_v17 = vcombine.high %v2200_v11, %v2204_v12  ;;  %v2207_v18 = vld [vmem:[#allocation6 + $0x4c0] sm:$0xff] }
 0x18b   :  { %5183 = vmatprep.subr.bf16.mxu0 %v6842_v31  ;;  %5347 = vmatprep.subr.bf16.mxu1 %v6844_v59  ;;  %v6899_v31 = vcombine.low %v2168_v19, %v2172_v20  ;;  %v6906_v59 = vcombine.high %v2175_v26, %v2179_v27  ;;  %v6908_v33 = vcombine.high %v2176_v28, %v2180_v29  ;;  %v2211_v19 = vld [vmem:[#allocation6 + $0x4e0] sm:$0xff]  ;;  %v2208_v20 = vld [vmem:[#allocation6 + $0x4c8] sm:$0xff] }
 0x18e   :  { %5184 = vmatpush1.bf16.msra.mxu0 %v6841_v37  ;;  %5348 = vmatpush1.bf16.msra.mxu1 %v6843_v38  ;;  %v2188_v37 = vld [vmem:[#allocation6 + $0x428] sm:$0xff]  ;;  %v6905_v38 = vcombine.low %v2175_v26, %v2179_v27  ;;  %v2215_v27 = vld [vmem:[#allocation6 + $0x500] sm:$0xff] }
 0x18f   :  { %5185 = vmatprep.subr.bf16.mxu0 %v6850_v39  ;;  %5349 = vmatprep.subr.bf16.mxu1 %v6852_v40  ;;  %v6907_v39 = vcombine.low %v2176_v28, %v2180_v29  ;;  %v6914_v40 = vcombine.high %v2183_v34, %v2187_v35  ;;  %v6916_v41 = vcombine.high %v2184_v36, %v2188_v37  ;;  %v2219_v28 = vld [vmem:[#allocation6 + $0x520] sm:$0xff]  ;;  %v2216_v29 = vld [vmem:[#allocation6 + $0x508] sm:$0xff] }
 0x190   :  { %v2223_v35 = vld [vmem:[#allocation6 + $0x540] sm:$0xff] }
 0x192   :  { %5186 = vmatpush1.bf16.msra.mxu0 %v6849_v45  ;;  %5350 = vmatpush1.bf16.msra.mxu1 %v6851_v46  ;;  %v1685_v45 = vsub.s32 3, %v7904_v47  ;;  %v1674_v46 = vrot.slane %v7948_v43, %v1673_v42 }
 0x193   :  { %5187 = vmatprep.subr.bf16.mxu0 %v6858_v48  ;;  %5351 = vmatprep.subr.bf16.mxu1 %v6860_v49  ;;  %v1678_v48 = vrot.slane %v7948_v43, %v1677_v44 }
 0x194   :  { %v1686_v49 = vrot.slane %v7948_v43, %v1685_v45 }
 0x196   :  { %5188 = vmatpush1.bf16.msra.mxu0 %v6857_v54  ;;  %5352 = vmatpush1.bf16.msra.mxu1 %v6859_v55 }
 0x197   :  { %5189 = vmatprep.subr.bf16.mxu0 %v6866_v57  ;;  %5353 = vmatprep.subr.bf16.mxu1 %v6868_v58 }
 0x19a   :  { %5190 = vmatpush1.bf16.msra.mxu0 %v6865_v62  ;;  %5354 = vmatpush1.bf16.msra.mxu1 %v6867_v63  ;;  %v2191_v62 = vld [vmem:[#allocation6 + $0x440] sm:$0xff] }
 0x19b   :  { %5191 = vmatprep.subr.bf16.mxu0 %v6874_v56  ;;  %5355 = vmatprep.subr.bf16.mxu1 %v6876_v0  ;;  %v2195_v56 = vld [vmem:[#allocation6 + $0x460] sm:$0xff]  ;;  %v2192_v0 = vld [vmem:[#allocation6 + $0x448] sm:$0xff] }
 0x19c   :  { %v6924_v9 = vcombine.high %v2192_v0, %v2196_v1 }
 0x19e   :  { %5192 = vmatpush1.bf16.msra.mxu0 %v6873_v5  ;;  %5356 = vmatpush1.bf16.msra.mxu1 %v6875_v6  ;;  %v6915_v5 = vcombine.low %v2184_v36, %v2188_v37  ;;  %v2227_v36 = vld [vmem:[#allocation6 + $0x560] sm:$0xff]  ;;  %v2224_v37 = vld [vmem:[#allocation6 + $0x548] sm:$0xff] }
 0x19f   :  { %5193 = vmatprep.subr.bf16.mxu0 %v6882_v7  ;;  %5357 = vmatprep.subr.bf16.mxu1 %v6884_v8  ;;  %v2199_v7 = vld [vmem:[#allocation6 + $0x480] sm:$0xff]  ;;  %v6922_v8 = vcombine.high %v2191_v62, %v2195_v56 }
 0x1a2   :  { %5194 = vmatpush1.bf16.msra.mxu0 %v6881_v13  ;;  %5358 = vmatpush1.bf16.msra.mxu1 %v6883_v14  ;;  %v6921_v14 = vcombine.low %v2191_v62, %v2195_v56 }
 0x1a3   :  { %5195 = vmatprep.subr.bf16.mxu0 %v6890_v15  ;;  %5359 = vmatprep.subr.bf16.mxu1 %v6892_v16  ;;  %v6923_v15 = vcombine.low %v2192_v0, %v2196_v1  ;;  %v6930_v16 = vcombine.high %v2199_v7, %v2203_v10  ;;  %v2247_v0 = vld [vmem:[#allocation6 + $0x600] sm:$0xff] }
 0x1a4   :  { %v2251_v1 = vld [vmem:[#allocation6 + $0x620] sm:$0xff] }
 0x1a6   :  { %5196 = vmatpush1.bf16.msra.mxu0 %v6889_v22  ;;  %5360 = vmatpush1.bf16.msra.mxu1 %v6891_v23  ;;  %v2212_v22 = vld [vmem:[#allocation6 + $0x4e8] sm:$0xff]  ;;  %v6929_v23 = vcombine.low %v2199_v7, %v2203_v10  ;;  %v2255_v10 = vld [vmem:[#allocation6 + $0x640] sm:$0xff] }
 0x1a7   :  { %5197 = vmatprep.subr.bf16.mxu0 %v6898_v24  ;;  %5361 = vmatprep.subr.bf16.mxu1 %v6900_v25  ;;  %v6931_v24 = vcombine.low %v2200_v11, %v2204_v12  ;;  %v6938_v25 = vcombine.high %v2207_v18, %v2211_v19  ;;  %v6940_v26 = vcombine.high %v2208_v20, %v2212_v22  ;;  %v2259_v11 = vld [vmem:[#allocation6 + $0x660] sm:$0xff]  ;;  %v2256_v12 = vld [vmem:[#allocation6 + $0x648] sm:$0xff] }
 0x1aa   :  { %5198 = vmatpush1.bf16.msra.mxu0 %v6897_v30  ;;  %5362 = vmatpush1.bf16.msra.mxu1 %v6899_v31  ;;  %v2220_v30 = vld [vmem:[#allocation6 + $0x528] sm:$0xff]  ;;  %v6937_v31 = vcombine.low %v2207_v18, %v2211_v19  ;;  %v2263_v19 = vld [vmem:[#allocation6 + $0x680] sm:$0xff] }
 0x1ab   :  { %5199 = vmatprep.subr.bf16.mxu0 %v6906_v59  ;;  %5363 = vmatprep.subr.bf16.mxu1 %v6908_v33  ;;  %v6939_v59 = vcombine.low %v2208_v20, %v2212_v22  ;;  %v6946_v33 = vcombine.high %v2215_v27, %v2219_v28  ;;  %v6948_v34 = vcombine.high %v2216_v29, %v2220_v30  ;;  %v2267_v20 = vld [vmem:[#allocation6 + $0x6a0] sm:$0xff]  ;;  %v2264_v22 = vld [vmem:[#allocation6 + $0x688] sm:$0xff] }
 0x1ae   :  { %5200 = vmatpush1.bf16.msra.mxu0 %v6905_v38  ;;  %5364 = vmatpush1.bf16.msra.mxu1 %v6907_v39  ;;  %v2228_v38 = vld [vmem:[#allocation6 + $0x568] sm:$0xff]  ;;  %v6945_v39 = vcombine.low %v2215_v27, %v2219_v28  ;;  %v2271_v28 = vld [vmem:[#allocation6 + $0x6c0] sm:$0xff] }
 0x1af   :  { %5210 = vmatprep.subr.bf16.mxu0 %v6914_v40  ;;  %5374 = vmatprep.subr.bf16.mxu1 %v6916_v41  ;;  %v6947_v40 = vcombine.low %v2216_v29, %v2220_v30  ;;  %v6954_v41 = vcombine.high %v2223_v35, %v2227_v36  ;;  %v2275_v29 = vld [vmem:[#allocation6 + $0x6e0] sm:$0xff]  ;;  %v2272_v30 = vld [vmem:[#allocation6 + $0x6c8] sm:$0xff] }
 0x1c4   :  { %v1786_v50 = vpop.f32.mrb[0].mxu0  ;;  %v7961_v52 = vpop.f32.mrb[0].mxu1 }
 0x1c5   :  { %v7449_v51 = vadd.f32 %v1786_v50, %v1674_v46  ;;  %v1788_v53 = vpop.f32.mrb[1].mxu0  ;;  %v1870_v55 = vpop.f32.mrb[1].mxu1  ;;  %v6956_v46 = vcombine.high %v2224_v37, %v2228_v38  ;;  %v2232_v50 = vld [vmem:[#allocation6 + $0x588] sm:$0xff] }
 0x1c6   :  { %v7450_v54 = vadd.f32 %v1788_v53, %v1678_v48  ;;  %v1790_v57 = vpop.f32.mrb[2].mxu0  ;;  %v7452_v58 = vadd.f32 %v1870_v55, %v1686_v49  ;;  %v1872_v21 = vpop.f32.mrb[2].mxu1  ;;  %v2231_v48 = vld [vmem:[#allocation6 + $0x580] sm:$0xff]  ;;  %v6953_v53 = vcombine.low %v2223_v35, %v2227_v36  ;;  %v7002_v35 = vcombine.high %v2271_v28, %v2275_v29 }
 0x1c7   :  { %v1791_v60 = vpop.f32.mrb[3].mxu0  ;;  %7604 = vtanh.f32 %v7449_v51  ;;  %v1873_v61 = vpop.f32.mrb[3].mxu1  ;;  %v2235_v49 = vld [vmem:[#allocation6 + $0x5a0] sm:$0xff]  ;;  %v2236_v51 = vld [vmem:[#allocation6 + $0x5a8] sm:$0xff] }
 0x1c8   :  { %7606 = vtanh.f32 %v7450_v54  ;;  %v6955_v54 = vcombine.low %v2224_v37, %v2228_v38  ;;  %v6962_v55 = vcombine.high %v2231_v48, %v2235_v49  ;;  %v6964_v57 = vcombine.high %v2232_v50, %v2236_v51  ;;  %v2243_v21 = vld [vmem:[#allocation6 + $0x5e0] sm:$0xff]  ;;  %v2240_v60 = vld [vmem:[#allocation6 + $0x5c8] sm:$0xff] }
 0x1c9   :  { %7608 = vtanh.f32 %v7452_v58  ;;  %v2239_v58 = vld [vmem:[#allocation6 + $0x5c0] sm:$0xff]  ;;  %v2244_v61 = vld [vmem:[#allocation6 + $0x5e8] sm:$0xff]  ;;  %v6963_v62 = vcombine.low %v2232_v50, %v2236_v51 }
 0x1ca   :  { %v6972_v56 = vcombine.high %v2240_v60, %v2244_v61  ;;  %v6971_v7 = vcombine.low %v2240_v60, %v2244_v61  ;;  %v2279_v37 = vld [vmem:[#allocation6 + $0x700] sm:$0xff] }
 0x1cb   :  { %v2283_v38 = vld [vmem:[#allocation6 + $0x720] sm:$0xff] }
 0x1cc   :  { %v2287_v51 = vld [vmem:[#allocation6 + $0x740] sm:$0xff] }
 0x1d1   :  { %v7605_v3 = vpop.eup %7604 }
 0x1d2   :  { %v7607_v63 = vpop.eup %7606  ;;  %v7965_v6 = vpack.c.bf16 %v7605_v3, %v7605_v3  ;;  %v6961_v3 = vcombine.low %v2231_v48, %v2235_v49  ;;  %v7010_v49 = vcombine.high %v2279_v37, %v2283_v38 }
 0x1d3   :  { %v7609_v2 = vpop.eup %7608  ;;  %v7963_v4 = vpack.c.bf16 %v7607_v63, %v7607_v63  ;;  %v6970_v63 = vcombine.high %v2239_v58, %v2243_v21 }
 0x1d4   :  { %v7969_v13 = vpack.c.bf16 %v7609_v2, %v7609_v2  ;;  %v2248_v2 = vld [vmem:[#allocation6 + $0x608] sm:$0xff] }
 0x1d5   :  { %5201 = vmatprep.mubr.bf16.mxu0 %v7963_v4  ;;  %5365 = vmatprep.mubr.bf16.mxu1 %v7963_v4 }
 0x1d6   :  { %5202 = vmatmul.mubr.bf16.vlgmr.msra.gmra.mrb[8].mxu0 %v7965_v6  ;;  %5366 = vmatmul.mubr.bf16.vlgmr.msra.gmra.mrb[8].mxu1 %v7965_v6 }
 0x1d7   :  { %5211 = vmatpush1.bf16.msra.mxu0 %v6913_v32  ;;  %5375 = vmatpush1.bf16.msra.mxu1 %v6915_v5  ;;  %v2252_v32 = vld [vmem:[#allocation6 + $0x628] sm:$0xff]  ;;  %v6969_v5 = vcombine.low %v2239_v58, %v2243_v21  ;;  %v7009_v58 = vcombine.low %v2279_v37, %v2283_v38 }
 0x1d8   :  { %5242 = vmatprep.mubr.bf16.mxu0 %v7969_v13  ;;  %5406 = vmatprep.mubr.bf16.mxu1 %v7969_v13  ;;  %v2332_v37 = vld [vmem:[#allocation6 + $0x8a8] sm:$0xff] }
 0x1d9   :  { %5212 = vmatprep.subr.bf16.mxu0 %v6922_v8  ;;  %5376 = vmatprep.subr.bf16.mxu1 %v6924_v9  ;;  %v6978_v8 = vcombine.high %v2247_v0, %v2251_v1  ;;  %v6980_v9 = vcombine.high %v2248_v2, %v2252_v32 }
 0x1db   :  { %5213 = vmatpush1.bf16.msra.mxu0 %v6921_v14  ;;  %5377 = vmatpush1.bf16.msra.mxu1 %v6923_v15  ;;  %v2260_v14 = vld [vmem:[#allocation6 + $0x668] sm:$0xff]  ;;  %v6977_v15 = vcombine.low %v2247_v0, %v2251_v1 }
 0x1dc   :  { %5214 = vmatprep.subr.bf16.mxu0 %v6930_v16  ;;  %5378 = vmatprep.subr.bf16.mxu1 %v6932_v17  ;;  %v6979_v16 = vcombine.low %v2248_v2, %v2252_v32  ;;  %v6986_v17 = vcombine.high %v2255_v10, %v2259_v11  ;;  %v6988_v18 = vcombine.high %v2256_v12, %v2260_v14  ;;  %v2303_v32 = vld [vmem:[#allocation6 + $0x7c0] sm:$0xff] }
 0x1df   :  { %5215 = vmatpush1.bf16.msra.mxu0 %v6929_v23  ;;  %5379 = vmatpush1.bf16.msra.mxu1 %v6931_v24  ;;  %v2268_v23 = vld [vmem:[#allocation6 + $0x6a8] sm:$0xff]  ;;  %v6985_v24 = vcombine.low %v2255_v10, %v2259_v11 }
 0x1e0   :  { %5216 = vmatprep.subr.bf16.mxu0 %v6938_v25  ;;  %5380 = vmatprep.subr.bf16.mxu1 %v6940_v26  ;;  %v6987_v25 = vcombine.low %v2256_v12, %v2260_v14  ;;  %v6994_v26 = vcombine.high %v2263_v19, %v2267_v20  ;;  %v6996_v27 = vcombine.high %v2264_v22, %v2268_v23  ;;  %v2311_v14 = vld [vmem:[#allocation6 + $0x800] sm:$0xff] }
 0x1e3   :  { %5217 = vmatpush1.bf16.msra.mxu0 %v6937_v31  ;;  %5381 = vmatpush1.bf16.msra.mxu1 %v6939_v59  ;;  %v2276_v31 = vld [vmem:[#allocation6 + $0x6e8] sm:$0xff]  ;;  %v1681_v59 = vsub.s32 2, %v7904_v47 }
 0x1e4   :  { %5218 = vmatprep.subr.bf16.mxu0 %v6946_v33  ;;  %5382 = vmatprep.subr.bf16.mxu1 %v6948_v34  ;;  %v6993_v33 = vcombine.low %v2263_v19, %v2267_v20  ;;  %v6995_v34 = vcombine.low %v2264_v22, %v2268_v23  ;;  %v7004_v36 = vcombine.high %v2272_v30, %v2276_v31  ;;  %v2319_v23 = vld [vmem:[#allocation6 + $0x840] sm:$0xff] }
 0x1e5   :  { %v7003_v48 = vcombine.low %v2272_v30, %v2276_v31 }
 0x1e7   :  { %5219 = vmatpush1.bf16.msra.mxu0 %v6945_v39  ;;  %5383 = vmatpush1.bf16.msra.mxu1 %v6947_v40  ;;  %v2280_v39 = vld [vmem:[#allocation6 + $0x708] sm:$0xff] }
 0x1e8   :  { %5220 = vmatprep.subr.bf16.mxu0 %v6954_v41  ;;  %5384 = vmatprep.subr.bf16.mxu1 %v6956_v46  ;;  %v2284_v40 = vld [vmem:[#allocation6 + $0x728] sm:$0xff]  ;;  %v1682_v41 = vrot.slane %v7948_v43, %v1681_v59  ;;  %v7001_v46 = vcombine.low %v2271_v28, %v2275_v29 }
 0x1e9   :  { %v7012_v50 = vcombine.high %v2280_v39, %v2284_v40  ;;  %v7011_v21 = vcombine.low %v2280_v39, %v2284_v40 }
 0x1eb   :  { %5221 = vmatpush1.bf16.msra.mxu0 %v6953_v53  ;;  %5385 = vmatpush1.bf16.msra.mxu1 %v6955_v54  ;;  %v2291_v53 = vld [vmem:[#allocation6 + $0x760] sm:$0xff]  ;;  %v2288_v54 = vld [vmem:[#allocation6 + $0x748] sm:$0xff] }
 0x1ec   :  { %5222 = vmatprep.subr.bf16.mxu0 %v6962_v55  ;;  %5386 = vmatprep.subr.bf16.mxu1 %v6964_v57  ;;  %v2292_v55 = vld [vmem:[#allocation6 + $0x768] sm:$0xff]  ;;  %v7451_v57 = vadd.f32 %v7961_v52, %v1682_v41  ;;  %v7018_v60 = vcombine.high %v2287_v51, %v2291_v53  ;;  %v7017_v0 = vcombine.low %v2287_v51, %v2291_v53 }
 0x1ed   :  { %v7020_v61 = vcombine.high %v2288_v54, %v2292_v55  ;;  %v7019_v1 = vcombine.low %v2288_v54, %v2292_v55 }
 0x1ee   :  { %7610 = vtanh.f32 %v7451_v57  ;;  %v2343_v57 = vld [vmem:[#allocation6 + $0x900] sm:$0xff] }
 0x1ef   :  { %5223 = vmatpush1.bf16.msra.mxu0 %v6961_v3  ;;  %5387 = vmatpush1.bf16.msra.mxu1 %v6963_v62  ;;  %v2295_v3 = vld [vmem:[#allocation6 + $0x780] sm:$0xff] }
 0x1f0   :  { %5224 = vmatprep.subr.bf16.mxu0 %v6970_v63  ;;  %5388 = vmatprep.subr.bf16.mxu1 %v6972_v56  ;;  %v2299_v62 = vld [vmem:[#allocation6 + $0x7a0] sm:$0xff]  ;;  %v2296_v63 = vld [vmem:[#allocation6 + $0x788] sm:$0xff] }
 0x1f1   :  { %v2300_v56 = vld [vmem:[#allocation6 + $0x7a8] sm:$0xff]  ;;  %v7026_v52 = vcombine.high %v2295_v3, %v2299_v62 }
 0x1f2   :  { %v7028_v2 = vcombine.high %v2296_v63, %v2300_v56  ;;  %v7027_v10 = vcombine.low %v2296_v63, %v2300_v56  ;;  %v2351_v56 = vld [vmem:[#allocation6 + $0x940] sm:$0xff] }
 0x1f3   :  { %5225 = vmatpush1.bf16.msra.mxu0 %v6969_v5  ;;  %5389 = vmatpush1.bf16.msra.mxu1 %v6971_v7  ;;  %v2307_v5 = vld [vmem:[#allocation6 + $0x7e0] sm:$0xff]  ;;  %v2304_v7 = vld [vmem:[#allocation6 + $0x7c8] sm:$0xff] }
 0x1f4   :  { %5226 = vmatprep.subr.bf16.mxu0 %v6978_v8  ;;  %5390 = vmatprep.subr.bf16.mxu1 %v6980_v9  ;;  %v2308_v8 = vld [vmem:[#allocation6 + $0x7e8] sm:$0xff]  ;;  %v7025_v9 = vcombine.low %v2295_v3, %v2299_v62  ;;  %v7034_v11 = vcombine.high %v2303_v32, %v2307_v5 }
 0x1f5   :  { %v7036_v12 = vcombine.high %v2304_v7, %v2308_v8  ;;  %v7035_v19 = vcombine.low %v2304_v7, %v2308_v8  ;;  %v2359_v8 = vld [vmem:[#allocation6 + $0x980] sm:$0xff] }
 0x1f7   :  { %5227 = vmatpush1.bf16.msra.mxu0 %v6977_v15  ;;  %5391 = vmatpush1.bf16.msra.mxu1 %v6979_v16  ;;  %v2315_v15 = vld [vmem:[#allocation6 + $0x820] sm:$0xff]  ;;  %v2312_v16 = vld [vmem:[#allocation6 + $0x808] sm:$0xff] }
 0x1f8   :  { %5228 = vmatprep.subr.bf16.mxu0 %v6986_v17  ;;  %5392 = vmatprep.subr.bf16.mxu1 %v6988_v18  ;;  %v2316_v17 = vld [vmem:[#allocation6 + $0x828] sm:$0xff]  ;;  %v7033_v18 = vcombine.low %v2303_v32, %v2307_v5  ;;  %v7042_v20 = vcombine.high %v2311_v14, %v2315_v15  ;;  %v7041_v28 = vcombine.low %v2311_v14, %v2315_v15 }
 0x1f9   :  { %v7044_v22 = vcombine.high %v2312_v16, %v2316_v17  ;;  %v7043_v29 = vcombine.low %v2312_v16, %v2316_v17  ;;  %v2367_v17 = vld [vmem:[#allocation6 + $0x9c0] sm:$0xff] }
 0x1fb   :  { %5229 = vmatpush1.bf16.msra.mxu0 %v6985_v24  ;;  %5393 = vmatpush1.bf16.msra.mxu1 %v6987_v25  ;;  %v7611_v24 = vpop.eup %7610  ;;  %v2323_v25 = vld [vmem:[#allocation6 + $0x860] sm:$0xff] }
 0x1fc   :  { %5230 = vmatprep.subr.bf16.mxu0 %v6994_v26  ;;  %5394 = vmatprep.subr.bf16.mxu1 %v6996_v27  ;;  %v2320_v26 = vld [vmem:[#allocation6 + $0x848] sm:$0xff]  ;;  %v7980_v30 = vpack.c.bf16 %v7611_v24, %v7611_v24  ;;  %v7050_v31 = vcombine.high %v2319_v23, %v2323_v25  ;;  %v7049_v38 = vcombine.low %v2319_v23, %v2323_v25 }
 0x1fd   :  { %v2324_v27 = vld [vmem:[#allocation6 + $0x868] sm:$0xff] }
 0x1fe   :  { %v7051_v39 = vcombine.low %v2320_v26, %v2324_v27 }
 0x1ff   :  { %5231 = vmatpush1.bf16.msra.mxu0 %v6993_v33  ;;  %5395 = vmatpush1.bf16.msra.mxu1 %v6995_v34  ;;  %v7052_v33 = vcombine.high %v2320_v26, %v2324_v27  ;;  %v2327_v34 = vld [vmem:[#allocation6 + $0x880] sm:$0xff] }
 0x200   :  { %5232 = vmatprep.subr.bf16.mxu0 %v7002_v35  ;;  %5396 = vmatprep.subr.bf16.mxu1 %v7004_v36  ;;  %v2331_v35 = vld [vmem:[#allocation6 + $0x8a0] sm:$0xff]  ;;  %v2328_v36 = vld [vmem:[#allocation6 + $0x888] sm:$0xff] }
 0x201   :  { %v7058_v40 = vcombine.high %v2327_v34, %v2331_v35  ;;  %v7060_v41 = vcombine.high %v2328_v36, %v2332_v37  ;;  %v7057_v51 = vcombine.low %v2327_v34, %v2331_v35  ;;  %v7059_v53 = vcombine.low %v2328_v36, %v2332_v37  ;;  %v2375_v26 = vld [vmem:[#allocation6 + $0xa00] sm:$0xff] }
 0x202   :  { %v2379_v27 = vld [vmem:[#allocation6 + $0xa20] sm:$0xff] }
 0x203   :  { %5233 = vmatpush1.bf16.msra.mxu0 %v7001_v46  ;;  %5397 = vmatpush1.bf16.msra.mxu1 %v7003_v48  ;;  %v2335_v46 = vld [vmem:[#allocation6 + $0x8c0] sm:$0xff]  ;;  %v7106_v34 = vcombine.high %v2375_v26, %v2379_v27 }
 0x204   :  { %5234 = vmatprep.subr.bf16.mxu0 %v7010_v49  ;;  %5398 = vmatprep.subr.bf16.mxu1 %v7012_v50  ;;  %v2339_v48 = vld [vmem:[#allocation6 + $0x8e0] sm:$0xff]  ;;  %v2336_v49 = vld [vmem:[#allocation6 + $0x8c8] sm:$0xff] }
 0x205   :  { %v2340_v50 = vld [vmem:[#allocation6 + $0x8e8] sm:$0xff]  ;;  %v7066_v54 = vcombine.high %v2335_v46, %v2339_v48  ;;  %v2383_v36 = vld [vmem:[#allocation6 + $0xa40] sm:$0xff] }
 0x206   :  { %v7068_v55 = vcombine.high %v2336_v49, %v2340_v50  ;;  %v7067_v3 = vcombine.low %v2336_v49, %v2340_v50  ;;  %v2387_v37 = vld [vmem:[#allocation6 + $0xa60] sm:$0xff] }
 0x207   :  { %5235 = vmatpush1.bf16.msra.mxu0 %v7009_v58  ;;  %5399 = vmatpush1.bf16.msra.mxu1 %v7011_v21  ;;  %v2347_v58 = vld [vmem:[#allocation6 + $0x920] sm:$0xff]  ;;  %v2344_v21 = vld [vmem:[#allocation6 + $0x908] sm:$0xff] }
 0x208   :  { %5236 = vmatprep.subr.bf16.mxu0 %v7018_v60  ;;  %5400 = vmatprep.subr.bf16.mxu1 %v7020_v61  ;;  %v2348_v60 = vld [vmem:[#allocation6 + $0x928] sm:$0xff]  ;;  %v7065_v61 = vcombine.low %v2335_v46, %v2339_v48  ;;  %v7074_v62 = vcombine.high %v2343_v57, %v2347_v58  ;;  %v7114_v46 = vcombine.high %v2383_v36, %v2387_v37  ;;  %v2391_v49 = vld [vmem:[#allocation6 + $0xa80] sm:$0xff] }
 0x209   :  { %v7076_v63 = vcombine.high %v2344_v21, %v2348_v60  ;;  %v7075_v32 = vcombine.low %v2344_v21, %v2348_v60  ;;  %v2395_v50 = vld [vmem:[#allocation6 + $0xaa0] sm:$0xff] }
 0x20a   :  { %v2399_v21 = vld [vmem:[#allocation6 + $0xac0] sm:$0xff] }
 0x20b   :  { %5237 = vmatpush1.bf16.msra.mxu0 %v7017_v0  ;;  %5401 = vmatpush1.bf16.msra.mxu1 %v7019_v1  ;;  %v2355_v0 = vld [vmem:[#allocation6 + $0x960] sm:$0xff]  ;;  %v2352_v1 = vld [vmem:[#allocation6 + $0x948] sm:$0xff] }
 0x20c   :  { %5238 = vmatprep.subr.bf16.mxu0 %v7026_v52  ;;  %5402 = vmatprep.subr.bf16.mxu1 %v7028_v2  ;;  %v2356_v52 = vld [vmem:[#allocation6 + $0x968] sm:$0xff]  ;;  %v7073_v2 = vcombine.low %v2343_v57, %v2347_v58  ;;  %v7082_v5 = vcombine.high %v2351_v56, %v2355_v0  ;;  %v7122_v57 = vcombine.high %v2391_v49, %v2395_v50  ;;  %v2403_v60 = vld [vmem:[#allocation6 + $0xae0] sm:$0xff] }
 0x20d   :  { %v7084_v7 = vcombine.high %v2352_v1, %v2356_v52  ;;  %v7083_v14 = vcombine.low %v2352_v1, %v2356_v52  ;;  %v1689_v1 = vsub.s32 4, %v7904_v47  ;;  %v2407_v52 = vld [vmem:[#allocation6 + $0xb00] sm:$0xff] }
 0x20f   :  { %5239 = vmatpush1.bf16.msra.mxu0 %v7025_v9  ;;  %5403 = vmatpush1.bf16.msra.mxu1 %v7027_v10  ;;  %v2363_v9 = vld [vmem:[#allocation6 + $0x9a0] sm:$0xff]  ;;  %v2360_v10 = vld [vmem:[#allocation6 + $0x988] sm:$0xff] }
 0x210   :  { %5240 = vmatprep.subr.bf16.mxu0 %v7034_v11  ;;  %5404 = vmatprep.subr.bf16.mxu1 %v7036_v12  ;;  %v2364_v11 = vld [vmem:[#allocation6 + $0x9a8] sm:$0xff]  ;;  %v7081_v12 = vcombine.low %v2351_v56, %v2355_v0  ;;  %v7090_v15 = vcombine.high %v2359_v8, %v2363_v9  ;;  %v7130_v56 = vcombine.high %v2399_v21, %v2403_v60 }
 0x211   :  { %v7092_v16 = vcombine.high %v2360_v10, %v2364_v11  ;;  %v7091_v23 = vcombine.low %v2360_v10, %v2364_v11  ;;  %v1690_v11 = vrot.slane %v7948_v43, %v1689_v1 }
 0x213   :  { %5241 = vmatpush1.bf16.msra.mxu0 %v7033_v18  ;;  %5405 = vmatpush1.bf16.msra.mxu1 %v7035_v19  ;;  %v2371_v18 = vld [vmem:[#allocation6 + $0x9e0] sm:$0xff]  ;;  %v2368_v19 = vld [vmem:[#allocation6 + $0x9c8] sm:$0xff] }
 0x214   :  { %5251 = vmatprep.subr.bf16.mxu0 %v7042_v20  ;;  %5415 = vmatprep.subr.bf16.mxu1 %v7044_v22  ;;  %v2372_v20 = vld [vmem:[#allocation6 + $0x9e8] sm:$0xff]  ;;  %v7089_v22 = vcombine.low %v2359_v8, %v2363_v9  ;;  %v7098_v24 = vcombine.high %v2367_v17, %v2371_v18  ;;  %v1701_v8 = vsub.s32 7, %v7904_v47  ;;  %v7129_v9 = vcombine.low %v2399_v21, %v2403_v60 }
 0x215   :  { %v7100_v25 = vcombine.high %v2368_v19, %v2372_v20 }
 0x216   :  { %5243 = vmatmul.mubr.bf16.vlgmr.msra.gmra.mrb[8].mxu0 %v7980_v30  ;;  %5407 = vmatmul.mubr.bf16.vlgmr.msra.gmra.mrb[8].mxu1 %v7980_v30 }
 0x217   :  { %5252 = vmatpush1.bf16.msra.mxu0 %v7041_v28  ;;  %5416 = vmatpush1.bf16.msra.mxu1 %v7043_v29  ;;  %v2376_v28 = vld [vmem:[#allocation6 + $0xa08] sm:$0xff] }
 0x218   :  { %5253 = vmatprep.subr.bf16.mxu0 %v7050_v31  ;;  %5417 = vmatprep.subr.bf16.mxu1 %v7052_v33  ;;  %v2380_v29 = vld [vmem:[#allocation6 + $0xa28] sm:$0xff]  ;;  %v7097_v31 = vcombine.low %v2367_v17, %v2371_v18  ;;  %v7099_v33 = vcombine.low %v2368_v19, %v2372_v20  ;;  %v2419_v17 = vld [vmem:[#allocation6 + $0xb60] sm:$0xff]  ;;  %v1702_v20 = vrot.slane %v7948_v43, %v1701_v8 }
 0x219   :  { %v7108_v35 = vcombine.high %v2376_v28, %v2380_v29  ;;  %v2416_v18 = vld [vmem:[#allocation6 + $0xb48] sm:$0xff] }
 0x21a   :  { %v2420_v19 = vld [vmem:[#allocation6 + $0xb68] sm:$0xff] }
 0x21b   :  { %5254 = vmatpush1.bf16.msra.mxu0 %v7049_v38  ;;  %5418 = vmatpush1.bf16.msra.mxu1 %v7051_v39  ;;  %v2384_v38 = vld [vmem:[#allocation6 + $0xa48] sm:$0xff] }
 0x21c   :  { %5255 = vmatprep.subr.bf16.mxu0 %v7058_v40  ;;  %5419 = vmatprep.subr.bf16.mxu1 %v7060_v41  ;;  %v2388_v39 = vld [vmem:[#allocation6 + $0xa68] sm:$0xff]  ;;  %v7105_v40 = vcombine.low %v2375_v26, %v2379_v27  ;;  %v7107_v41 = vcombine.low %v2376_v28, %v2380_v29  ;;  %v7148_v29 = vcombine.high %v2416_v18, %v2420_v19 }
 0x21d   :  { %v7116_v48 = vcombine.high %v2384_v38, %v2388_v39 }
 0x21f   :  { %5256 = vmatpush1.bf16.msra.mxu0 %v7057_v51  ;;  %5420 = vmatpush1.bf16.msra.mxu1 %v7059_v53  ;;  %v2392_v51 = vld [vmem:[#allocation6 + $0xa88] sm:$0xff] }
 0x220   :  { %5257 = vmatprep.subr.bf16.mxu0 %v7066_v54  ;;  %5421 = vmatprep.subr.bf16.mxu1 %v7068_v55  ;;  %v2396_v53 = vld [vmem:[#allocation6 + $0xaa8] sm:$0xff]  ;;  %v7113_v54 = vcombine.low %v2383_v36, %v2387_v37  ;;  %v7115_v55 = vcombine.low %v2384_v38, %v2388_v39  ;;  %v2427_v36 = vld [vmem:[#allocation6 + $0xba0] sm:$0xff] }
 0x221   :  { %v7124_v58 = vcombine.high %v2392_v51, %v2396_v53  ;;  %v2424_v37 = vld [vmem:[#allocation6 + $0xb88] sm:$0xff] }
 0x223   :  { %5258 = vmatpush1.bf16.msra.mxu0 %v7065_v61  ;;  %5422 = vmatpush1.bf16.msra.mxu1 %v7067_v3  ;;  %v2400_v61 = vld [vmem:[#allocation6 + $0xac8] sm:$0xff] }
 0x224   :  { %5259 = vmatprep.subr.bf16.mxu0 %v7074_v62  ;;  %5423 = vmatprep.subr.bf16.mxu1 %v7076_v63  ;;  %v2404_v3 = vld [vmem:[#allocation6 + $0xae8] sm:$0xff]  ;;  %v7121_v62 = vcombine.low %v2391_v49, %v2395_v50  ;;  %v7123_v63 = vcombine.low %v2392_v51, %v2396_v53  ;;  %v2431_v51 = vld [vmem:[#allocation6 + $0xbc0] sm:$0xff] }
 0x225   :  { %v7132_v0 = vcombine.high %v2400_v61, %v2404_v3  ;;  %v7131_v10 = vcombine.low %v2400_v61, %v2404_v3  ;;  %v2435_v53 = vld [vmem:[#allocation6 + $0xbe0] sm:$0xff] }
 0x226   :  { %v7162_v21 = vcombine.high %v2431_v51, %v2435_v53  ;;  %v2439_v61 = vld [vmem:[#allocation6 + $0xc00] sm:$0xff] }
 0x227   :  { %5260 = vmatpush1.bf16.msra.mxu0 %v7073_v2  ;;  %5424 = vmatpush1.bf16.msra.mxu1 %v7075_v32  ;;  %v1693_v2 = vsub.s32 5, %v7904_v47  ;;  %v2411_v32 = vld [vmem:[#allocation6 + $0xb20] sm:$0xff] }
 0x228   :  { %5261 = vmatprep.subr.bf16.mxu0 %v7082_v5  ;;  %5425 = vmatprep.subr.bf16.mxu1 %v7084_v7  ;;  %v2408_v5 = vld [vmem:[#allocation6 + $0xb08] sm:$0xff]  ;;  %v2443_v3 = vld [vmem:[#allocation6 + $0xc20] sm:$0xff] }
 0x229   :  { %v2412_v7 = vld [vmem:[#allocation6 + $0xb28] sm:$0xff] }
 0x22b   :  { %5262 = vmatpush1.bf16.msra.mxu0 %v7081_v12  ;;  %5426 = vmatpush1.bf16.msra.mxu1 %v7083_v14  ;;  %v7138_v12 = vcombine.high %v2407_v52, %v2411_v32  ;;  %v7140_v14 = vcombine.high %v2408_v5, %v2412_v7 }
 0x22c   :  { %5263 = vmatprep.subr.bf16.mxu0 %v7090_v15  ;;  %5427 = vmatprep.subr.bf16.mxu1 %v7092_v16  ;;  %v2415_v15 = vld [vmem:[#allocation6 + $0xb40] sm:$0xff]  ;;  %v1694_v16 = vrot.slane %v7948_v43, %v1693_v2  ;;  %v2428_v43 = vld [vmem:[#allocation6 + $0xba8] sm:$0xff] }
 0x22d   :  { %v7146_v28 = vcombine.high %v2415_v15, %v2419_v17  ;;  %v7156_v50 = vcombine.high %v2424_v37, %v2428_v43 }
 0x22f   :  { %5264 = vmatpush1.bf16.msra.mxu0 %v7089_v22  ;;  %5428 = vmatpush1.bf16.msra.mxu1 %v7091_v23  ;;  %v7137_v23 = vcombine.low %v2407_v52, %v2411_v32  ;;  %v7170_v52 = vcombine.high %v2439_v61, %v2443_v3 }
 0x230   :  { %5265 = vmatprep.subr.bf16.mxu0 %v7098_v24  ;;  %5429 = vmatprep.subr.bf16.mxu1 %v7100_v25  ;;  %v7139_v24 = vcombine.low %v2408_v5, %v2412_v7  ;;  %v2447_v7 = vld [vmem:[#allocation6 + $0xc40] sm:$0xff] }
 0x233   :  { %5266 = vmatpush1.bf16.msra.mxu0 %v7097_v31  ;;  %5430 = vmatpush1.bf16.msra.mxu1 %v7099_v33  ;;  %v2423_v31 = vld [vmem:[#allocation6 + $0xb80] sm:$0xff] }
 0x234   :  { %5267 = vmatprep.subr.bf16.mxu0 %v7106_v34  ;;  %5431 = vmatprep.subr.bf16.mxu1 %v7108_v35  ;;  %v7154_v49 = vcombine.high %v2423_v31, %v2427_v36 }
 0x237   :  { %5268 = vmatpush1.bf16.msra.mxu0 %v7105_v40  ;;  %5432 = vmatpush1.bf16.msra.mxu1 %v7107_v41 }
 0x238   :  { %5269 = vmatprep.subr.bf16.mxu0 %v7114_v46  ;;  %5433 = vmatprep.subr.bf16.mxu1 %v7116_v48  ;;  %v7145_v46 = vcombine.low %v2415_v15, %v2419_v17  ;;  %v7147_v48 = vcombine.low %v2416_v18, %v2420_v19  ;;  %v2455_v19 = vld [vmem:[#allocation6 + $0xc80] sm:$0xff] }
 0x23b   :  { %5270 = vmatpush1.bf16.msra.mxu0 %v7113_v54  ;;  %5434 = vmatpush1.bf16.msra.mxu1 %v7115_v55  ;;  %v2432_v54 = vld [vmem:[#allocation6 + $0xbc8] sm:$0xff] }
 0x23c   :  { %5271 = vmatprep.subr.bf16.mxu0 %v7122_v57  ;;  %5435 = vmatprep.subr.bf16.mxu1 %v7124_v58  ;;  %v2436_v55 = vld [vmem:[#allocation6 + $0xbe8] sm:$0xff]  ;;  %v7153_v57 = vcombine.low %v2423_v31, %v2427_v36  ;;  %v7155_v58 = vcombine.low %v2424_v37, %v2428_v43 }
 0x23d   :  { %v7164_v60 = vcombine.high %v2432_v54, %v2436_v55  ;;  %v2464_v36 = vld [vmem:[#allocation6 + $0xcc8] sm:$0xff] }
 0x23e   :  { %v2468_v37 = vld [vmem:[#allocation6 + $0xce8] sm:$0xff] }
 0x23f   :  { %5272 = vmatpush1.bf16.msra.mxu0 %v7121_v62  ;;  %5436 = vmatpush1.bf16.msra.mxu1 %v7123_v63  ;;  %v2440_v62 = vld [vmem:[#allocation6 + $0xc08] sm:$0xff] }
 0x240   :  { %5273 = vmatprep.subr.bf16.mxu0 %v7130_v56  ;;  %5437 = vmatprep.subr.bf16.mxu1 %v7132_v0  ;;  %v2444_v63 = vld [vmem:[#allocation6 + $0xc28] sm:$0xff]  ;;  %v7161_v56 = vcombine.low %v2431_v51, %v2435_v53  ;;  %v7163_v0 = vcombine.low %v2432_v54, %v2436_v55  ;;  %v7195_v51 = vcombine.low %v2464_v36, %v2468_v37  ;;  %v2479_v55 = vld [vmem:[#allocation6 + $0xd40] sm:$0xff] }
 0x241   :  { %v7172_v32 = vcombine.high %v2440_v62, %v2444_v63  ;;  %v7171_v17 = vcombine.low %v2440_v62, %v2444_v63  ;;  %v2487_v63 = vld [vmem:[#allocation6 + $0xd80] sm:$0xff] }
 0x243   :  { %5274 = vmatpush1.bf16.msra.mxu0 %v7129_v9  ;;  %5438 = vmatpush1.bf16.msra.mxu1 %v7131_v10  ;;  %v2451_v10 = vld [vmem:[#allocation6 + $0xc60] sm:$0xff] }
 0x244   :  { %v1950_v22 = vpop.f32.mrb[4].mxu0  ;;  %v7996_v26 = vpop.f32.mrb[4].mxu1  ;;  %5275 = vmatprep.subr.bf16.mxu0 %v7138_v12  ;;  %5439 = vmatprep.subr.bf16.mxu1 %v7140_v14  ;;  %v2452_v12 = vld [vmem:[#allocation6 + $0xc68] sm:$0xff] }
 0x245   :  { %v7453_v25 = vadd.f32 %v1950_v22, %v1690_v11  ;;  %v1952_v27 = vpop.f32.mrb[5].mxu0  ;;  %v2034_v34 = vpop.f32.mrb[5].mxu1  ;;  %v2448_v11 = vld [vmem:[#allocation6 + $0xc48] sm:$0xff] }
 0x246   :  { %v7454_v33 = vadd.f32 %v1952_v27, %v1694_v16  ;;  %v1954_v35 = vpop.f32.mrb[6].mxu0  ;;  %v7456_v38 = vadd.f32 %v2034_v34, %v1702_v20  ;;  %v2036_v39 = vpop.f32.mrb[6].mxu1  ;;  %v7169_v16 = vcombine.low %v2439_v61, %v2443_v3  ;;  %v7178_v20 = vcombine.high %v2447_v7, %v2451_v10  ;;  %v2463_v34 = vld [vmem:[#allocation6 + $0xcc0] sm:$0xff] }
 0x247   :  { %v1955_v40 = vpop.f32.mrb[7].mxu0  ;;  %7612 = vtanh.f32 %v7453_v25  ;;  %5276 = vmatpush1.bf16.msra.mxu0 %v7137_v23  ;;  %5440 = vmatpush1.bf16.msra.mxu1 %v7139_v24  ;;  %v2037_v41 = vpop.f32.mrb[7].mxu1  ;;  %v7180_v22 = vcombine.high %v2448_v11, %v2452_v12  ;;  %v2459_v23 = vld [vmem:[#allocation6 + $0xca0] sm:$0xff]  ;;  %v2456_v24 = vld [vmem:[#allocation6 + $0xc88] sm:$0xff] }
 0x248   :  { %7614 = vtanh.f32 %v7454_v33  ;;  %5277 = vmatprep.subr.bf16.mxu0 %v7146_v28  ;;  %5441 = vmatprep.subr.bf16.mxu1 %v7148_v29  ;;  %v2460_v25 = vld [vmem:[#allocation6 + $0xca8] sm:$0xff]  ;;  %v7177_v28 = vcombine.low %v2447_v7, %v2451_v10  ;;  %v7179_v29 = vcombine.low %v2448_v11, %v2452_v12  ;;  %v7186_v31 = vcombine.high %v2455_v19, %v2459_v23  ;;  %v2467_v35 = vld [vmem:[#allocation6 + $0xce0] sm:$0xff] }
 0x249   :  { %7616 = vtanh.f32 %v7456_v38  ;;  %v7188_v33 = vcombine.high %v2456_v24, %v2460_v25  ;;  %v7185_v43 = vcombine.low %v2455_v19, %v2459_v23  ;;  %v7187_v38 = vcombine.low %v2456_v24, %v2460_v25  ;;  %v2471_v41 = vld [vmem:[#allocation6 + $0xd00] sm:$0xff]  ;;  %v2496_v12 = vld [vmem:[#allocation6 + $0xdc8] sm:$0xff] }
 0x24a   :  { %v7194_v39 = vcombine.high %v2463_v34, %v2467_v35  ;;  %v7196_v40 = vcombine.high %v2464_v36, %v2468_v37  ;;  %v2495_v10 = vld [vmem:[#allocation6 + $0xdc0] sm:$0xff]  ;;  %v2504_v24 = vld [vmem:[#allocation6 + $0xe08] sm:$0xff] }
 0x24b   :  { %5278 = vmatpush1.bf16.msra.mxu0 %v7145_v46  ;;  %5442 = vmatpush1.bf16.msra.mxu1 %v7147_v48  ;;  %v2475_v46 = vld [vmem:[#allocation6 + $0xd20] sm:$0xff]  ;;  %v2472_v48 = vld [vmem:[#allocation6 + $0xd08] sm:$0xff] }
 0x24c   :  { %5279 = vmatprep.subr.bf16.mxu0 %v7154_v49  ;;  %5443 = vmatprep.subr.bf16.mxu1 %v7156_v50  ;;  %v2476_v49 = vld [vmem:[#allocation6 + $0xd28] sm:$0xff]  ;;  %v7193_v50 = vcombine.low %v2463_v34, %v2467_v35  ;;  %v7202_v53 = vcombine.high %v2471_v41, %v2475_v46  ;;  %v2499_v11 = vld [vmem:[#allocation6 + $0xde0] sm:$0xff] }
 0x24d   :  { %v7204_v54 = vcombine.high %v2472_v48, %v2476_v49  ;;  %v7203_v61 = vcombine.low %v2472_v48, %v2476_v49  ;;  %v7226_v19 = vcombine.high %v2495_v10, %v2499_v11  ;;  %v2507_v23 = vld [vmem:[#allocation6 + $0xe20] sm:$0xff]  ;;  %v2508_v25 = vld [vmem:[#allocation6 + $0xe28] sm:$0xff] }
 0x24e   :  { %v2511_v34 = vld [vmem:[#allocation6 + $0xe40] sm:$0xff]  ;;  %v2512_v36 = vld [vmem:[#allocation6 + $0xe48] sm:$0xff] }
 0x24f   :  { %5280 = vmatpush1.bf16.msra.mxu0 %v7153_v57  ;;  %5444 = vmatpush1.bf16.msra.mxu1 %v7155_v58  ;;  %v2483_v57 = vld [vmem:[#allocation6 + $0xd60] sm:$0xff]  ;;  %v2480_v58 = vld [vmem:[#allocation6 + $0xd48] sm:$0xff] }
 0x250   :  { %5281 = vmatprep.subr.bf16.mxu0 %v7162_v21  ;;  %5445 = vmatprep.subr.bf16.mxu1 %v7164_v60  ;;  %v2484_v21 = vld [vmem:[#allocation6 + $0xd68] sm:$0xff]  ;;  %v7201_v60 = vcombine.low %v2471_v41, %v2475_v46  ;;  %v7210_v3 = vcombine.high %v2479_v55, %v2483_v57  ;;  %v2515_v35 = vld [vmem:[#allocation6 + $0xe60] sm:$0xff] }
 0x251   :  { %v7613_v5 = vpop.eup %7612  ;;  %v7212_v62 = vcombine.high %v2480_v58, %v2484_v21  ;;  %v2516_v37 = vld [vmem:[#allocation6 + $0xe68] sm:$0xff]  ;;  %v2519_v41 = vld [vmem:[#allocation6 + $0xe80] sm:$0xff] }
 0x252   :  { %v7615_v9 = vpop.eup %7614  ;;  %v8000_v18 = vpack.c.bf16 %v7613_v5, %v7613_v5  ;;  %v7211_v5 = vcombine.low %v2480_v58, %v2484_v21  ;;  %v2523_v46 = vld [vmem:[#allocation6 + $0xea0] sm:$0xff]  ;;  %v2520_v48 = vld [vmem:[#allocation6 + $0xe88] sm:$0xff] }
 0x253   :  { %v7617_v14 = vpop.eup %7616  ;;  %v7998_v15 = vpack.c.bf16 %v7615_v9, %v7615_v9  ;;  %5282 = vmatpush1.bf16.msra.mxu0 %v7161_v56  ;;  %5446 = vmatpush1.bf16.msra.mxu1 %v7163_v0  ;;  %v2491_v56 = vld [vmem:[#allocation6 + $0xda0] sm:$0xff]  ;;  %v2488_v0 = vld [vmem:[#allocation6 + $0xd88] sm:$0xff] }
 0x254   :  { %5292 = vmatprep.subr.bf16.mxu0 %v7170_v52  ;;  %5456 = vmatprep.subr.bf16.mxu1 %v7172_v32  ;;  %v8004_v27 = vpack.c.bf16 %v7617_v14, %v7617_v14  ;;  %v2492_v52 = vld [vmem:[#allocation6 + $0xda8] sm:$0xff]  ;;  %v7209_v32 = vcombine.low %v2479_v55, %v2483_v57  ;;  %v7218_v7 = vcombine.high %v2487_v63, %v2491_v56  ;;  %v2527_v55 = vld [vmem:[#allocation6 + $0xec0] sm:$0xff] }
 0x255   :  { %5283 = vmatprep.mubr.bf16.mxu0 %v7998_v15  ;;  %5447 = vmatprep.mubr.bf16.mxu1 %v7998_v15  ;;  %v7220_v9 = vcombine.high %v2488_v0, %v2492_v52  ;;  %v2500_v14 = vld [vmem:[#allocation6 + $0xde8] sm:$0xff]  ;;  %v2531_v57 = vld [vmem:[#allocation6 + $0xee0] sm:$0xff] }
 0x256   :  { %5284 = vmatmul.mubr.bf16.vlgmr.msra.gmra.mrb[8].mxu0 %v8000_v18  ;;  %5448 = vmatmul.mubr.bf16.vlgmr.msra.gmra.mrb[8].mxu1 %v8000_v18  ;;  %v2524_v49 = vld [vmem:[#allocation6 + $0xea8] sm:$0xff] }
 0x257   :  { %5293 = vmatpush1.bf16.msra.mxu0 %v7169_v16  ;;  %5457 = vmatpush1.bf16.msra.mxu1 %v7171_v17  ;;  %v7217_v16 = vcombine.low %v2487_v63, %v2491_v56  ;;  %v7219_v17 = vcombine.low %v2488_v0, %v2492_v52  ;;  %v2528_v58 = vld [vmem:[#allocation6 + $0xec8] sm:$0xff]  ;;  %v2535_v56 = vld [vmem:[#allocation6 + $0xf00] sm:$0xff] }
 0x258   :  { %5324 = vmatprep.mubr.bf16.mxu0 %v8004_v27  ;;  %5488 = vmatprep.mubr.bf16.mxu1 %v8004_v27  ;;  %v2532_v21 = vld [vmem:[#allocation6 + $0xee8] sm:$0xff]  ;;  %v2539_v0 = vld [vmem:[#allocation6 + $0xf20] sm:$0xff] }
 0x259   :  { %5294 = vmatprep.subr.bf16.mxu0 %v7178_v20  ;;  %5458 = vmatprep.subr.bf16.mxu1 %v7180_v22  ;;  %v7228_v20 = vcombine.high %v2496_v12, %v2500_v14  ;;  %v2503_v22 = vld [vmem:[#allocation6 + $0xe00] sm:$0xff]  ;;  %v7260_v63 = vcombine.high %v2528_v58, %v2532_v21  ;;  %v2536_v52 = vld [vmem:[#allocation6 + $0xf08] sm:$0xff] }
 0x25b   :  { %5295 = vmatpush1.bf16.msra.mxu0 %v7177_v28  ;;  %5459 = vmatpush1.bf16.msra.mxu1 %v7179_v29  ;;  %v7225_v28 = vcombine.low %v2495_v10, %v2499_v11  ;;  %v7227_v29 = vcombine.low %v2496_v12, %v2500_v14  ;;  %v7259_v10 = vcombine.low %v2528_v58, %v2532_v21  ;;  %v2543_v14 = vld [vmem:[#allocation6 + $0xf40] sm:$0xff] }
 0x25c   :  { %5296 = vmatprep.subr.bf16.mxu0 %v7186_v31  ;;  %5460 = vmatprep.subr.bf16.mxu1 %v7188_v33  ;;  %v7234_v31 = vcombine.high %v2503_v22, %v2507_v23  ;;  %v7236_v33 = vcombine.high %v2504_v24, %v2508_v25  ;;  %v7266_v11 = vcombine.high %v2535_v56, %v2539_v0 }
 0x25f   :  { %5297 = vmatpush1.bf16.msra.mxu0 %v7185_v43  ;;  %5461 = vmatpush1.bf16.msra.mxu1 %v7187_v38  ;;  %v7233_v43 = vcombine.low %v2503_v22, %v2507_v23  ;;  %v7235_v38 = vcombine.low %v2504_v24, %v2508_v25  ;;  %v7265_v22 = vcombine.low %v2535_v56, %v2539_v0 }
 0x260   :  { %5298 = vmatprep.subr.bf16.mxu0 %v7194_v39  ;;  %5462 = vmatprep.subr.bf16.mxu1 %v7196_v40  ;;  %v7242_v39 = vcombine.high %v2511_v34, %v2515_v35  ;;  %v7244_v40 = vcombine.high %v2512_v36, %v2516_v37 }
 0x263   :  { %5299 = vmatpush1.bf16.msra.mxu0 %v7193_v50  ;;  %5463 = vmatpush1.bf16.msra.mxu1 %v7195_v51  ;;  %v7241_v50 = vcombine.low %v2511_v34, %v2515_v35  ;;  %v7243_v51 = vcombine.low %v2512_v36, %v2516_v37  ;;  %v2559_v37 = vld [vmem:[#allocation6 + $0xfc0] sm:$0xff] }
 0x264   :  { %5300 = vmatprep.subr.bf16.mxu0 %v7202_v53  ;;  %5464 = vmatprep.subr.bf16.mxu1 %v7204_v54  ;;  %v7250_v53 = vcombine.high %v2519_v41, %v2523_v46  ;;  %v7252_v54 = vcombine.high %v2520_v48, %v2524_v49 }
 0x267   :  { %5301 = vmatpush1.bf16.msra.mxu0 %v7201_v60  ;;  %5465 = vmatpush1.bf16.msra.mxu1 %v7203_v61  ;;  %v1697_v60 = vsub.s32 6, %v7904_v47  ;;  %v7249_v61 = vcombine.low %v2519_v41, %v2523_v46 }
 0x268   :  { %5302 = vmatprep.subr.bf16.mxu0 %v7210_v3  ;;  %5466 = vmatprep.subr.bf16.mxu1 %v7212_v62  ;;  %v7251_v3 = vcombine.low %v2520_v48, %v2524_v49  ;;  %v7258_v62 = vcombine.high %v2527_v55, %v2531_v57  ;;  %v2057_v49 = vld [vmem:[#allocation6 + $0x10] sm:$0xff] }
 0x26b   :  { %5303 = vmatpush1.bf16.msra.mxu0 %v7209_v32  ;;  %5467 = vmatpush1.bf16.msra.mxu1 %v7211_v5  ;;  %v2540_v32 = vld [vmem:[#allocation6 + $0xf28] sm:$0xff]  ;;  %v7640_v5 = vld [vmem:[#allocation4] sm:$0xff] }
 0x26c   :  { %5304 = vmatprep.subr.bf16.mxu0 %v7218_v7  ;;  %5468 = vmatprep.subr.bf16.mxu1 %v7220_v9  ;;  %v1698_v7 = vrot.slane %v7640_v5, %v1697_v60  ;;  %v7257_v9 = vcombine.low %v2527_v55, %v2531_v57  ;;  %v7268_v12 = vcombine.high %v2536_v52, %v2540_v32 }
 0x26d   :  { %v7267_v23 = vcombine.low %v2536_v52, %v2540_v32 }
 0x26f   :  { %5305 = vmatpush1.bf16.msra.mxu0 %v7217_v16  ;;  %5469 = vmatpush1.bf16.msra.mxu1 %v7219_v17  ;;  %v2547_v16 = vld [vmem:[#allocation6 + $0xf60] sm:$0xff]  ;;  %v2544_v17 = vld [vmem:[#allocation6 + $0xf48] sm:$0xff] }
 0x270   :  { %5306 = vmatprep.subr.bf16.mxu0 %v7226_v19  ;;  %5470 = vmatprep.subr.bf16.mxu1 %v7228_v20  ;;  %v2548_v19 = vld [vmem:[#allocation6 + $0xf68] sm:$0xff]  ;;  %v7455_v20 = vadd.f32 %v7996_v26, %v1698_v7  ;;  %v7274_v24 = vcombine.high %v2543_v14, %v2547_v16  ;;  %v7273_v34 = vcombine.low %v2543_v14, %v2547_v16  ;;  %v2073_v7 = vld [vmem:[#allocation6 + $0x90] sm:$0xff] }
 0x271   :  { %v7276_v25 = vcombine.high %v2544_v17, %v2548_v19  ;;  %v7275_v35 = vcombine.low %v2544_v17, %v2548_v19  ;;  %v2081_v19 = vld [vmem:[#allocation6 + $0xd0] sm:$0xff] }
 0x272   :  { %7618 = vtanh.f32 %v7455_v20  ;;  %v2085_v20 = vld [vmem:[#allocation6 + $0xf0] sm:$0xff] }
 0x273   :  { %5307 = vmatpush1.bf16.msra.mxu0 %v7225_v28  ;;  %5471 = vmatpush1.bf16.msra.mxu1 %v7227_v29  ;;  %v2551_v28 = vld [vmem:[#allocation6 + $0xf80] sm:$0xff] }
 0x274   :  { %5308 = vmatprep.subr.bf16.mxu0 %v7234_v31  ;;  %5472 = vmatprep.subr.bf16.mxu1 %v7236_v33  ;;  %v2555_v29 = vld [vmem:[#allocation6 + $0xfa0] sm:$0xff]  ;;  %v2552_v31 = vld [vmem:[#allocation6 + $0xf88] sm:$0xff] }
 0x275   :  { %v2556_v33 = vld [vmem:[#allocation6 + $0xfa8] sm:$0xff]  ;;  %v7282_v26 = vcombine.high %v2551_v28, %v2555_v29 }
 0x276   :  { %v7284_v36 = vcombine.high %v2552_v31, %v2556_v33  ;;  %v7283_v41 = vcombine.low %v2552_v31, %v2556_v33  ;;  %v2089_v31 = vld [vmem:[#allocation6 + $0x110] sm:$0xff] }
 0x277   :  { %5309 = vmatpush1.bf16.msra.mxu0 %v7233_v43  ;;  %5473 = vmatpush1.bf16.msra.mxu1 %v7235_v38  ;;  %v2563_v43 = vld [vmem:[#allocation6 + $0xfe0] sm:$0xff]  ;;  %v2560_v38 = vld [vmem:[#allocation6 + $0xfc8] sm:$0xff]  ;;  %v2093_v33 = vld [vmem:[#allocation6 + $0x130] sm:$0xff] }
 0x278   :  { %5310 = vmatprep.subr.bf16.mxu0 %v7242_v39  ;;  %5474 = vmatprep.subr.bf16.mxu1 %v7244_v40  ;;  %v2564_v39 = vld [vmem:[#allocation6 + $0xfe8] sm:$0xff]  ;;  %v7281_v40 = vcombine.low %v2551_v28, %v2555_v29  ;;  %v7290_v46 = vcombine.high %v2559_v37, %v2563_v43  ;;  %v6814_v28 = vcombine.high %v2081_v19, %v2085_v20 }
 0x279   :  { %v7292_v48 = vcombine.high %v2560_v38, %v2564_v39  ;;  %v7291_v55 = vcombine.low %v2560_v38, %v2564_v39  ;;  %v2101_v38 = vld [vmem:[#allocation6 + $0x170] sm:$0xff]  ;;  %v2098_v39 = vld [vmem:[#allocation6 + $0x158] sm:$0xff] }
 0x27b   :  { %5311 = vmatpush1.bf16.msra.mxu0 %v7241_v50  ;;  %5475 = vmatpush1.bf16.msra.mxu1 %v7243_v51  ;;  %v2061_v50 = vld [vmem:[#allocation6 + $0x30] sm:$0xff]  ;;  %v2058_v51 = vld [vmem:[#allocation6 + $0x18] sm:$0xff] }
 0x27c   :  { %5312 = vmatprep.subr.bf16.mxu0 %v7250_v53  ;;  %5476 = vmatprep.subr.bf16.mxu1 %v7252_v54  ;;  %v2062_v53 = vld [vmem:[#allocation6 + $0x38] sm:$0xff]  ;;  %v7289_v54 = vcombine.low %v2559_v37, %v2563_v43  ;;  %v6790_v57 = vcombine.high %v2057_v49, %v2061_v50  ;;  %v7619_v21 = vpop.eup %7618  ;;  %v6789_v56 = vcombine.low %v2057_v49, %v2061_v50  ;;  %v2097_v43 = vld [vmem:[#allocation6 + $0x150] sm:$0xff] }
 0x27d   :  { %v6792_v58 = vcombine.high %v2058_v51, %v2062_v53  ;;  %v8014_v0 = vpack.c.bf16 %v7619_v21, %v7619_v21  ;;  %v6791_v52 = vcombine.low %v2058_v51, %v2062_v53  ;;  %v2105_v50 = vld [vmem:[#allocation6 + $0x190] sm:$0xff]  ;;  %v2106_v53 = vld [vmem:[#allocation6 + $0x198] sm:$0xff] }
 0x27e   :  { %v2109_v51 = vld [vmem:[#allocation6 + $0x1b0] sm:$0xff] }
 0x27f   :  { %5313 = vmatpush1.bf16.msra.mxu0 %v7249_v61  ;;  %5477 = vmatpush1.bf16.msra.mxu1 %v7251_v3  ;;  %v2065_v61 = vld [vmem:[#allocation6 + $0x50] sm:$0xff] }
 0x280   :  { %5314 = vmatprep.subr.bf16.mxu0 %v7258_v62  ;;  %5478 = vmatprep.subr.bf16.mxu1 %v7260_v63  ;;  %v2069_v3 = vld [vmem:[#allocation6 + $0x70] sm:$0xff]  ;;  %v2066_v62 = vld [vmem:[#allocation6 + $0x58] sm:$0xff] }
 0x281   :  { %v2070_v63 = vld [vmem:[#allocation6 + $0x78] sm:$0xff]  ;;  %v6798_v32 = vcombine.high %v2065_v61, %v2069_v3 }
 0x282   :  { %v6800_v5 = vcombine.high %v2066_v62, %v2070_v63  ;;  %v6799_v14 = vcombine.low %v2066_v62, %v2070_v63  ;;  %v2114_v62 = vld [vmem:[#allocation6 + $0x1d8] sm:$0xff] }
 0x283   :  { %5315 = vmatpush1.bf16.msra.mxu0 %v7257_v9  ;;  %5479 = vmatpush1.bf16.msra.mxu1 %v7259_v10  ;;  %v2077_v9 = vld [vmem:[#allocation6 + $0xb0] sm:$0xff]  ;;  %v2074_v10 = vld [vmem:[#allocation6 + $0x98] sm:$0xff] }
 0x284   :  { %5316 = vmatprep.subr.bf16.mxu0 %v7266_v11  ;;  %5480 = vmatprep.subr.bf16.mxu1 %v7268_v12  ;;  %v2078_v11 = vld [vmem:[#allocation6 + $0xb8] sm:$0xff]  ;;  %v6797_v12 = vcombine.low %v2065_v61, %v2069_v3  ;;  %v6806_v16 = vcombine.high %v2073_v7, %v2077_v9  ;;  %v2113_v61 = vld [vmem:[#allocation6 + $0x1d0] sm:$0xff] }
 0x285   :  { %v6808_v17 = vcombine.high %v2074_v10, %v2078_v11  ;;  %v2117_v3 = vld [vmem:[#allocation6 + $0x1f0] sm:$0xff]  ;;  %v2118_v63 = vld [vmem:[#allocation6 + $0x1f8] sm:$0xff] }
 0x287   :  { %5317 = vmatpush1.bf16.msra.mxu0 %v7265_v22  ;;  %5481 = vmatpush1.bf16.msra.mxu1 %v7267_v23  ;;  %v2082_v22 = vld [vmem:[#allocation6 + $0xd8] sm:$0xff] }
 0x288   :  { %5318 = vmatprep.subr.bf16.mxu0 %v7274_v24  ;;  %5482 = vmatprep.subr.bf16.mxu1 %v7276_v25  ;;  %v2086_v23 = vld [vmem:[#allocation6 + $0xf8] sm:$0xff]  ;;  %v6805_v24 = vcombine.low %v2073_v7, %v2077_v9  ;;  %v6807_v25 = vcombine.low %v2074_v10, %v2078_v11  ;;  %v2121_v7 = vld [vmem:[#allocation6 + $0x210] sm:$0xff] }
 0x289   :  { %v6816_v29 = vcombine.high %v2082_v22, %v2086_v23  ;;  %v2125_v9 = vld [vmem:[#allocation6 + $0x230] sm:$0xff]  ;;  %v2122_v10 = vld [vmem:[#allocation6 + $0x218] sm:$0xff] }
 0x28a   :  { %v2126_v11 = vld [vmem:[#allocation6 + $0x238] sm:$0xff] }
 0x28b   :  { %5319 = vmatpush1.bf16.msra.mxu0 %v7273_v34  ;;  %5483 = vmatpush1.bf16.msra.mxu1 %v7275_v35  ;;  %v2094_v34 = vld [vmem:[#allocation6 + $0x138] sm:$0xff]  ;;  %v6813_v35 = vcombine.low %v2081_v19, %v2085_v20  ;;  %v2129_v19 = vld [vmem:[#allocation6 + $0x250] sm:$0xff] }
 0x28c   :  { %5320 = vmatprep.subr.bf16.mxu0 %v7282_v26  ;;  %5484 = vmatprep.subr.bf16.mxu1 %v7284_v36  ;;  %v6815_v26 = vcombine.low %v2082_v22, %v2086_v23  ;;  %v6822_v36 = vcombine.high %v2089_v31, %v2093_v33  ;;  %v2133_v20 = vld [vmem:[#allocation6 + $0x270] sm:$0xff]  ;;  %v2130_v22 = vld [vmem:[#allocation6 + $0x258] sm:$0xff] }
 0x28d   :  { %v2134_v23 = vld [vmem:[#allocation6 + $0x278] sm:$0xff] }
 0x28f   :  { %5321 = vmatpush1.bf16.msra.mxu0 %v7281_v40  ;;  %5485 = vmatpush1.bf16.msra.mxu1 %v7283_v41  ;;  %v2102_v40 = vld [vmem:[#allocation6 + $0x178] sm:$0xff]  ;;  %v6821_v41 = vcombine.low %v2089_v31, %v2093_v33  ;;  %v2137_v31 = vld [vmem:[#allocation6 + $0x290] sm:$0xff] }
 0x290   :  { %5322 = vmatprep.subr.bf16.mxu0 %v7290_v46  ;;  %5486 = vmatprep.subr.bf16.mxu1 %v7292_v48  ;;  %v6830_v48 = vcombine.high %v2097_v43, %v2101_v38  ;;  %v6832_v49 = vcombine.high %v2098_v39, %v2102_v40  ;;  %v2141_v33 = vld [vmem:[#allocation6 + $0x2b0] sm:$0xff] }
 0x293   :  { %5323 = vmatpush1.bf16.msra.mxu0 %v7289_v54  ;;  %5487 = vmatpush1.bf16.msra.mxu1 %v7291_v55  ;;  %v2110_v54 = vld [vmem:[#allocation6 + $0x1b8] sm:$0xff]  ;;  %v6829_v55 = vcombine.low %v2097_v43, %v2101_v38  ;;  %v2145_v43 = vld [vmem:[#allocation6 + $0x2d0] sm:$0xff] }
 0x294   :  { %5497 = vmatprep.subr.bf16.mxu0 %v6790_v57  ;;  %5661 = vmatprep.subr.bf16.mxu1 %v6792_v58  ;;  %v6831_v57 = vcombine.low %v2098_v39, %v2102_v40  ;;  %v6838_v58 = vcombine.high %v2105_v50, %v2109_v51  ;;  %v6840_v21 = vcombine.high %v2106_v53, %v2110_v54  ;;  %v2149_v38 = vld [vmem:[#allocation6 + $0x2f0] sm:$0xff]  ;;  %v2146_v39 = vld [vmem:[#allocation6 + $0x2d8] sm:$0xff] }
 0x295   :  { %v2150_v40 = vld [vmem:[#allocation6 + $0x2f8] sm:$0xff] }
 0x296   :  { %5325 = vmatmul.mubr.bf16.vlgmr.msra.gmra.mrb[8].mxu0 %v8014_v0  ;;  %5489 = vmatmul.mubr.bf16.vlgmr.msra.gmra.mrb[8].mxu1 %v8014_v0 }
 0x297   :  { %5498 = vmatpush1.bf16.msra.mxu0 %v6789_v56  ;;  %5529 = vmatprep.mubr.bf16.mxu0 %v7963_v4  ;;  %v6837_v56 = vcombine.low %v2105_v50, %v2109_v51  ;;  %v2153_v50 = vld [vmem:[#allocation6 + $0x310] sm:$0xff] }
 0x298   :  { %5662 = vmatpush1.bf16.msra.mxu1 %v6791_v52  ;;  %5693 = vmatprep.mubr.bf16.mxu1 %v7963_v4  ;;  %v2090_v4 = vld [vmem:[#allocation6 + $0x118] sm:$0xff]  ;;  %v6839_v52 = vcombine.low %v2106_v53, %v2110_v54  ;;  %v2157_v51 = vld [vmem:[#allocation6 + $0x330] sm:$0xff] }
 0x299   :  { %5499 = vmatprep.subr.bf16.mxu0 %v6798_v32  ;;  %5663 = vmatprep.subr.bf16.mxu1 %v6800_v5  ;;  %v6824_v37 = vcombine.high %v2090_v4, %v2094_v34  ;;  %v6823_v46 = vcombine.low %v2090_v4, %v2094_v34  ;;  %v6846_v32 = vcombine.high %v2113_v61, %v2117_v3  ;;  %v2138_v4 = vld [vmem:[#allocation6 + $0x298] sm:$0xff] }
 0x29a   :  { %v6848_v5 = vcombine.high %v2114_v62, %v2118_v63  ;;  %v2142_v34 = vld [vmem:[#allocation6 + $0x2b8] sm:$0xff] }
 0x29b   :  { %5500 = vmatpush1.bf16.msra.mxu0 %v6797_v12  ;;  %v6845_v12 = vcombine.low %v2113_v61, %v2117_v3  ;;  %v2154_v53 = vld [vmem:[#allocation6 + $0x318] sm:$0xff]  ;;  %v2161_v61 = vld [vmem:[#allocation6 + $0x350] sm:$0xff] }
 0x29c   :  { %5664 = vmatpush1.bf16.msra.mxu1 %v6799_v14  ;;  %5501 = vmatprep.subr.bf16.mxu0 %v6806_v16  ;;  %v6847_v14 = vcombine.low %v2114_v62, %v2118_v63  ;;  %v6854_v16 = vcombine.high %v2121_v7, %v2125_v9  ;;  %v2158_v54 = vld [vmem:[#allocation6 + $0x338] sm:$0xff]  ;;  %v2165_v3 = vld [vmem:[#allocation6 + $0x370] sm:$0xff] }
 0x29d   :  { %5665 = vmatprep.subr.bf16.mxu1 %v6808_v17  ;;  %v6856_v17 = vcombine.high %v2122_v10, %v2126_v11  ;;  %v2162_v62 = vld [vmem:[#allocation6 + $0x358] sm:$0xff] }
 0x29e   :  { %v2166_v63 = vld [vmem:[#allocation6 + $0x378] sm:$0xff] }
 0x29f   :  { %5502 = vmatpush1.bf16.msra.mxu0 %v6805_v24  ;;  %v6853_v24 = vcombine.low %v2121_v7, %v2125_v9  ;;  %v2169_v7 = vld [vmem:[#allocation6 + $0x390] sm:$0xff] }
 0x2a0   :  { %5666 = vmatpush1.bf16.msra.mxu1 %v6807_v25  ;;  %5503 = vmatprep.subr.bf16.mxu0 %v6814_v28  ;;  %v6855_v25 = vcombine.low %v2122_v10, %v2126_v11  ;;  %v6862_v28 = vcombine.high %v2129_v19, %v2133_v20  ;;  %v2173_v9 = vld [vmem:[#allocation6 + $0x3b0] sm:$0xff]  ;;  %v2170_v10 = vld [vmem:[#allocation6 + $0x398] sm:$0xff] }
 0x2a1   :  { %5667 = vmatprep.subr.bf16.mxu1 %v6816_v29  ;;  %v6864_v29 = vcombine.high %v2130_v22, %v2134_v23  ;;  %v2174_v11 = vld [vmem:[#allocation6 + $0x3b8] sm:$0xff] }
 0x2a3   :  { %5504 = vmatpush1.bf16.msra.mxu0 %v6813_v35  ;;  %v6861_v35 = vcombine.low %v2129_v19, %v2133_v20  ;;  %v2177_v19 = vld [vmem:[#allocation6 + $0x3d0] sm:$0xff] }
 0x2a4   :  { %5668 = vmatpush1.bf16.msra.mxu1 %v6815_v26  ;;  %5505 = vmatprep.subr.bf16.mxu0 %v6822_v36  ;;  %v6863_v26 = vcombine.low %v2130_v22, %v2134_v23  ;;  %v6870_v36 = vcombine.high %v2137_v31, %v2141_v33  ;;  %v2181_v20 = vld [vmem:[#allocation6 + $0x3f0] sm:$0xff]  ;;  %v2178_v22 = vld [vmem:[#allocation6 + $0x3d8] sm:$0xff] }
 0x2a5   :  { %5669 = vmatprep.subr.bf16.mxu1 %v6824_v37  ;;  %v6872_v37 = vcombine.high %v2138_v4, %v2142_v34  ;;  %v2182_v23 = vld [vmem:[#allocation6 + $0x3f8] sm:$0xff] }
 0x2a7   :  { %5506 = vmatpush1.bf16.msra.mxu0 %v6821_v41  ;;  %v6869_v41 = vcombine.low %v2137_v31, %v2141_v33  ;;  %v2185_v31 = vld [vmem:[#allocation6 + $0x410] sm:$0xff] }
 0x2a8   :  { %5670 = vmatpush1.bf16.msra.mxu1 %v6823_v46  ;;  %5507 = vmatprep.subr.bf16.mxu0 %v6830_v48  ;;  %v6871_v46 = vcombine.low %v2138_v4, %v2142_v34  ;;  %v6878_v48 = vcombine.high %v2145_v43, %v2149_v38  ;;  %v2189_v33 = vld [vmem:[#allocation6 + $0x430] sm:$0xff]  ;;  %v2186_v4 = vld [vmem:[#allocation6 + $0x418] sm:$0xff] }
 0x2a9   :  { %5671 = vmatprep.subr.bf16.mxu1 %v6832_v49  ;;  %v6880_v49 = vcombine.high %v2146_v39, %v2150_v40  ;;  %v2190_v34 = vld [vmem:[#allocation6 + $0x438] sm:$0xff] }
 0x2ab   :  { %5508 = vmatpush1.bf16.msra.mxu0 %v6829_v55  ;;  %v6877_v55 = vcombine.low %v2145_v43, %v2149_v38  ;;  %v2193_v43 = vld [vmem:[#allocation6 + $0x450] sm:$0xff] }
 0x2ac   :  { %5672 = vmatpush1.bf16.msra.mxu1 %v6831_v57  ;;  %5509 = vmatprep.subr.bf16.mxu0 %v6838_v58  ;;  %v6879_v57 = vcombine.low %v2146_v39, %v2150_v40  ;;  %v6886_v58 = vcombine.high %v2153_v50, %v2157_v51  ;;  %v2197_v38 = vld [vmem:[#allocation6 + $0x470] sm:$0xff]  ;;  %v6917_v39 = vcombine.low %v2185_v31, %v2189_v33  ;;  %v2194_v40 = vld [vmem:[#allocation6 + $0x458] sm:$0xff] }
 0x2ad   :  { %5673 = vmatprep.subr.bf16.mxu1 %v6840_v21  ;;  %v6888_v21 = vcombine.high %v2154_v53, %v2158_v54 }
 0x2af   :  { %5510 = vmatpush1.bf16.msra.mxu0 %v6837_v56  ;;  %v6885_v56 = vcombine.low %v2153_v50, %v2157_v51  ;;  %v2205_v50 = vld [vmem:[#allocation6 + $0x4b0] sm:$0xff] }
 0x2b0   :  { %5674 = vmatpush1.bf16.msra.mxu1 %v6839_v52  ;;  %5511 = vmatprep.subr.bf16.mxu0 %v6846_v32  ;;  %v6887_v52 = vcombine.low %v2154_v53, %v2158_v54  ;;  %v6894_v32 = vcombine.high %v2161_v61, %v2165_v3  ;;  %v2202_v53 = vld [vmem:[#allocation6 + $0x498] sm:$0xff] }
 0x2b1   :  { %5675 = vmatprep.subr.bf16.mxu1 %v6848_v5  ;;  %v6896_v5 = vcombine.high %v2162_v62, %v2166_v63  ;;  %v2206_v54 = vld [vmem:[#allocation6 + $0x4b8] sm:$0xff] }
 0x2b3   :  { %5512 = vmatpush1.bf16.msra.mxu0 %v6845_v12  ;;  %v6893_v12 = vcombine.low %v2161_v61, %v2165_v3  ;;  %v2209_v61 = vld [vmem:[#allocation6 + $0x4d0] sm:$0xff] }
 0x2b4   :  { %5676 = vmatpush1.bf16.msra.mxu1 %v6847_v14  ;;  %5513 = vmatprep.subr.bf16.mxu0 %v6854_v16  ;;  %v6895_v14 = vcombine.low %v2162_v62, %v2166_v63  ;;  %v6902_v16 = vcombine.high %v2169_v7, %v2173_v9  ;;  %v2213_v3 = vld [vmem:[#allocation6 + $0x4f0] sm:$0xff]  ;;  %v2210_v62 = vld [vmem:[#allocation6 + $0x4d8] sm:$0xff] }
 0x2b5   :  { %5677 = vmatprep.subr.bf16.mxu1 %v6856_v17  ;;  %v6904_v17 = vcombine.high %v2170_v10, %v2174_v11  ;;  %v2214_v63 = vld [vmem:[#allocation6 + $0x4f8] sm:$0xff] }
 0x2b7   :  { %5514 = vmatpush1.bf16.msra.mxu0 %v6853_v24  ;;  %v6901_v24 = vcombine.low %v2169_v7, %v2173_v9  ;;  %v2221_v7 = vld [vmem:[#allocation6 + $0x530] sm:$0xff]  ;;  %v2218_v9 = vld [vmem:[#allocation6 + $0x518] sm:$0xff] }
 0x2b8   :  { %5678 = vmatpush1.bf16.msra.mxu1 %v6855_v25  ;;  %5515 = vmatprep.subr.bf16.mxu0 %v6862_v28  ;;  %v6903_v25 = vcombine.low %v2170_v10, %v2174_v11  ;;  %v6910_v28 = vcombine.high %v2177_v19, %v2181_v20  ;;  %v2222_v10 = vld [vmem:[#allocation6 + $0x538] sm:$0xff]  ;;  %v6943_v11 = vcombine.low %v2210_v62, %v2214_v63 }
 0x2b9   :  { %5679 = vmatprep.subr.bf16.mxu1 %v6864_v29  ;;  %v6912_v29 = vcombine.high %v2178_v22, %v2182_v23 }
 0x2bb   :  { %5516 = vmatpush1.bf16.msra.mxu0 %v6861_v35  ;;  %v6909_v35 = vcombine.low %v2177_v19, %v2181_v20  ;;  %v2226_v19 = vld [vmem:[#allocation6 + $0x558] sm:$0xff] }
 0x2bc   :  { %5680 = vmatpush1.bf16.msra.mxu1 %v6863_v26  ;;  %5517 = vmatprep.subr.bf16.mxu0 %v6870_v36  ;;  %v6911_v26 = vcombine.low %v2178_v22, %v2182_v23  ;;  %v6918_v36 = vcombine.high %v2185_v31, %v2189_v33  ;;  %v2230_v20 = vld [vmem:[#allocation6 + $0x578] sm:$0xff]  ;;  %v6951_v23 = vcombine.low %v2218_v9, %v2222_v10 }
 0x2bd   :  { %5681 = vmatprep.subr.bf16.mxu1 %v6872_v37  ;;  %v6920_v37 = vcombine.high %v2186_v4, %v2190_v34  ;;  %v2234_v31 = vld [vmem:[#allocation6 + $0x598] sm:$0xff] }
 0x2be   :  { %v2238_v33 = vld [vmem:[#allocation6 + $0x5b8] sm:$0xff] }
 0x2bf   :  { %5518 = vmatpush1.bf16.msra.mxu0 %v6869_v41  ;;  %v2198_v41 = vld [vmem:[#allocation6 + $0x478] sm:$0xff] }
 0x2c0   :  { %5682 = vmatpush1.bf16.msra.mxu1 %v6871_v46  ;;  %5519 = vmatprep.subr.bf16.mxu0 %v6878_v48  ;;  %v6919_v46 = vcombine.low %v2186_v4, %v2190_v34  ;;  %v6926_v48 = vcombine.high %v2193_v43, %v2197_v38  ;;  %v6928_v51 = vcombine.high %v2194_v40, %v2198_v41 }
 0x2c1   :  { %5683 = vmatprep.subr.bf16.mxu1 %v6880_v49  ;;  %v2201_v49 = vld [vmem:[#allocation6 + $0x490] sm:$0xff]  ;;  %v6959_v34 = vcombine.low %v2226_v19, %v2230_v20 }
 0x2c3   :  { %5520 = vmatpush1.bf16.msra.mxu0 %v6877_v55  ;;  %v6925_v55 = vcombine.low %v2193_v43, %v2197_v38  ;;  %v2242_v43 = vld [vmem:[#allocation6 + $0x5d8] sm:$0xff] }
 0x2c4   :  { %5684 = vmatpush1.bf16.msra.mxu1 %v6879_v57  ;;  %5521 = vmatprep.subr.bf16.mxu0 %v6886_v58  ;;  %v6927_v57 = vcombine.low %v2194_v40, %v2198_v41  ;;  %v6934_v58 = vcombine.high %v2201_v49, %v2205_v50  ;;  %v2246_v38 = vld [vmem:[#allocation6 + $0x5f8] sm:$0xff]  ;;  %v6967_v40 = vcombine.low %v2234_v31, %v2238_v33 }
 0x2c5   :  { %5685 = vmatprep.subr.bf16.mxu1 %v6888_v21  ;;  %v6936_v21 = vcombine.high %v2202_v53, %v2206_v54 }
 0x2c7   :  { %5522 = vmatpush1.bf16.msra.mxu0 %v6885_v56  ;;  %v6933_v56 = vcombine.low %v2201_v49, %v2205_v50  ;;  %v2253_v49 = vld [vmem:[#allocation6 + $0x630] sm:$0xff]  ;;  %v2250_v50 = vld [vmem:[#allocation6 + $0x618] sm:$0xff] }
 0x2c8   :  { %5686 = vmatpush1.bf16.msra.mxu1 %v6887_v52  ;;  %5523 = vmatprep.subr.bf16.mxu0 %v6894_v32  ;;  %v6942_v52 = vcombine.high %v2209_v61, %v2213_v3  ;;  %v6944_v32 = vcombine.high %v2210_v62, %v2214_v63 }
 0x2c9   :  { %5687 = vmatprep.subr.bf16.mxu1 %v6896_v5  ;;  %v2217_v5 = vld [vmem:[#allocation6 + $0x510] sm:$0xff] }
 0x2ca   :  { %v6949_v22 = vcombine.low %v2217_v5, %v2221_v7 }
 0x2cb   :  { %5524 = vmatpush1.bf16.msra.mxu0 %v6893_v12  ;;  %v6950_v12 = vcombine.high %v2217_v5, %v2221_v7  ;;  %v2266_v5 = vld [vmem:[#allocation6 + $0x698] sm:$0xff] }
 0x2cc   :  { %5688 = vmatpush1.bf16.msra.mxu1 %v6895_v14  ;;  %5525 = vmatprep.subr.bf16.mxu0 %v6902_v16  ;;  %v6952_v14 = vcombine.high %v2218_v9, %v2222_v10  ;;  %v2225_v16 = vld [vmem:[#allocation6 + $0x550] sm:$0xff]  ;;  %v2270_v7 = vld [vmem:[#allocation6 + $0x6b8] sm:$0xff] }
 0x2cd   :  { %5689 = vmatprep.subr.bf16.mxu1 %v6904_v17  ;;  %v2229_v17 = vld [vmem:[#allocation6 + $0x570] sm:$0xff] }
 0x2ce   :  { %v6957_v4 = vcombine.low %v2225_v16, %v2229_v17 }
 0x2cf   :  { %5526 = vmatpush1.bf16.msra.mxu0 %v6901_v24  ;;  %v6958_v24 = vcombine.high %v2225_v16, %v2229_v17  ;;  %v2274_v16 = vld [vmem:[#allocation6 + $0x6d8] sm:$0xff] }
 0x2d0   :  { %5690 = vmatpush1.bf16.msra.mxu1 %v6903_v25  ;;  %5527 = vmatprep.subr.bf16.mxu0 %v6910_v28  ;;  %v6960_v25 = vcombine.high %v2226_v19, %v2230_v20  ;;  %v2233_v28 = vld [vmem:[#allocation6 + $0x590] sm:$0xff]  ;;  %v2278_v17 = vld [vmem:[#allocation6 + $0x6f8] sm:$0xff]  ;;  %v6999_v20 = vcombine.low %v2266_v5, %v2270_v7 }
 0x2d1   :  { %5691 = vmatprep.subr.bf16.mxu1 %v6912_v29  ;;  %v2237_v29 = vld [vmem:[#allocation6 + $0x5b0] sm:$0xff] }
 0x2d3   :  { %5528 = vmatpush1.bf16.msra.mxu0 %v6909_v35  ;;  %v6966_v35 = vcombine.high %v2233_v28, %v2237_v29 }
 0x2d4   :  { %5692 = vmatpush1.bf16.msra.mxu1 %v6911_v26  ;;  %5538 = vmatprep.subr.bf16.mxu0 %v6918_v36  ;;  %v6968_v26 = vcombine.high %v2234_v31, %v2238_v33  ;;  %v2241_v36 = vld [vmem:[#allocation6 + $0x5d0] sm:$0xff]  ;;  %v7007_v33 = vcombine.low %v2274_v16, %v2278_v17 }
 0x2d5   :  { %5702 = vmatprep.subr.bf16.mxu1 %v6920_v37  ;;  %v2245_v37 = vld [vmem:[#allocation6 + $0x5f0] sm:$0xff] }
 0x2d6   :  { %5530 = vmatmul.mubr.bf16.vlgmr.msra.gmra.mrb[12].mxu0 %v7965_v6  ;;  %v6974_v41 = vcombine.high %v2241_v36, %v2245_v37 }
 0x2d7   :  { %5694 = vmatmul.mubr.bf16.vlgmr.msra.gmra.mrb[12].mxu1 %v7965_v6  ;;  %5539 = vmatpush1.bf16.msra.mxu0 %v6917_v39  ;;  %v6935_v6 = vcombine.low %v2202_v53, %v2206_v54  ;;  %v6965_v39 = vcombine.low %v2233_v28, %v2237_v29  ;;  %v6973_v53 = vcombine.low %v2241_v36, %v2245_v37  ;;  %v2282_v28 = vld [vmem:[#allocation6 + $0x718] sm:$0xff] }
 0x2d8   :  { %5570 = vmatprep.mubr.bf16.mxu0 %v7969_v13  ;;  %5703 = vmatpush1.bf16.msra.mxu1 %v6919_v46  ;;  %v6976_v46 = vcombine.high %v2242_v43, %v2246_v38  ;;  %v6975_v54 = vcombine.low %v2242_v43, %v2246_v38  ;;  %v2286_v29 = vld [vmem:[#allocation6 + $0x738] sm:$0xff] }
 0x2d9   :  { %5734 = vmatprep.mubr.bf16.mxu1 %v7969_v13  ;;  %5540 = vmatprep.subr.bf16.mxu0 %v6926_v48  ;;  %v6941_v13 = vcombine.low %v2209_v61, %v2213_v3  ;;  %v2249_v48 = vld [vmem:[#allocation6 + $0x610] sm:$0xff]  ;;  %v2258_v61 = vld [vmem:[#allocation6 + $0x658] sm:$0xff]  ;;  %v7015_v38 = vcombine.low %v2282_v28, %v2286_v29 }
 0x2da   :  { %5704 = vmatprep.subr.bf16.mxu1 %v6928_v51  ;;  %v2254_v51 = vld [vmem:[#allocation6 + $0x638] sm:$0xff]  ;;  %v6981_v62 = vcombine.low %v2249_v48, %v2253_v49 }
 0x2db   :  { %5541 = vmatpush1.bf16.msra.mxu0 %v6925_v55  ;;  %v6982_v55 = vcombine.high %v2249_v48, %v2253_v49  ;;  %v2262_v3 = vld [vmem:[#allocation6 + $0x678] sm:$0xff]  ;;  %v6983_v63 = vcombine.low %v2250_v50, %v2254_v51 }
 0x2dc   :  { %5705 = vmatpush1.bf16.msra.mxu1 %v6927_v57  ;;  %5542 = vmatprep.subr.bf16.mxu0 %v6934_v58  ;;  %v6984_v57 = vcombine.high %v2250_v50, %v2254_v51  ;;  %v2257_v58 = vld [vmem:[#allocation6 + $0x650] sm:$0xff]  ;;  %v6991_v10 = vcombine.low %v2258_v61, %v2262_v3  ;;  %v2290_v36 = vld [vmem:[#allocation6 + $0x758] sm:$0xff] }
 0x2dd   :  { %5706 = vmatprep.subr.bf16.mxu1 %v6936_v21  ;;  %v2261_v21 = vld [vmem:[#allocation6 + $0x670] sm:$0xff]  ;;  %v2294_v37 = vld [vmem:[#allocation6 + $0x778] sm:$0xff] }
 0x2de   :  { %v6989_v9 = vcombine.low %v2257_v58, %v2261_v21  ;;  %v2298_v48 = vld [vmem:[#allocation6 + $0x798] sm:$0xff]  ;;  %v7023_v51 = vcombine.low %v2290_v36, %v2294_v37 }
 0x2df   :  { %5543 = vmatpush1.bf16.msra.mxu0 %v6933_v56  ;;  %v6990_v56 = vcombine.high %v2257_v58, %v2261_v21  ;;  %v2302_v49 = vld [vmem:[#allocation6 + $0x7b8] sm:$0xff] }
 0x2e0   :  { %5707 = vmatpush1.bf16.msra.mxu1 %v6935_v6  ;;  %5544 = vmatprep.subr.bf16.mxu0 %v6942_v52  ;;  %v6992_v6 = vcombine.high %v2258_v61, %v2262_v3  ;;  %v2265_v52 = vld [vmem:[#allocation6 + $0x690] sm:$0xff]  ;;  %v2306_v58 = vld [vmem:[#allocation6 + $0x7d8] sm:$0xff]  ;;  %v7031_v3 = vcombine.low %v2298_v48, %v2302_v49 }
 0x2e1   :  { %5708 = vmatprep.subr.bf16.mxu1 %v6944_v32  ;;  %v2269_v32 = vld [vmem:[#allocation6 + $0x6b0] sm:$0xff]  ;;  %v2310_v21 = vld [vmem:[#allocation6 + $0x7f8] sm:$0xff] }
 0x2e2   :  { %v6997_v19 = vcombine.low %v2265_v52, %v2269_v32 }
 0x2e3   :  { %5545 = vmatpush1.bf16.msra.mxu0 %v6941_v13  ;;  %v6998_v13 = vcombine.high %v2265_v52, %v2269_v32  ;;  %v2314_v52 = vld [vmem:[#allocation6 + $0x818] sm:$0xff] }
 0x2e4   :  { %5709 = vmatpush1.bf16.msra.mxu1 %v6943_v11  ;;  %5546 = vmatprep.subr.bf16.mxu0 %v6950_v12  ;;  %v7000_v11 = vcombine.high %v2266_v5, %v2270_v7  ;;  %v2273_v12 = vld [vmem:[#allocation6 + $0x6d0] sm:$0xff]  ;;  %v2318_v32 = vld [vmem:[#allocation6 + $0x838] sm:$0xff]  ;;  %v7039_v7 = vcombine.low %v2306_v58, %v2310_v21 }
 0x2e5   :  { %5710 = vmatprep.subr.bf16.mxu1 %v6952_v14  ;;  %v2277_v14 = vld [vmem:[#allocation6 + $0x6f0] sm:$0xff] }
 0x2e6   :  { %v7005_v31 = vcombine.low %v2273_v12, %v2277_v14 }
 0x2e7   :  { %5547 = vmatpush1.bf16.msra.mxu0 %v6949_v22  ;;  %v7006_v22 = vcombine.high %v2273_v12, %v2277_v14  ;;  %v2322_v14 = vld [vmem:[#allocation6 + $0x858] sm:$0xff] }
 0x2e8   :  { %5711 = vmatpush1.bf16.msra.mxu1 %v6951_v23  ;;  %5548 = vmatprep.subr.bf16.mxu0 %v6958_v24  ;;  %v7008_v23 = vcombine.high %v2274_v16, %v2278_v17  ;;  %v2281_v24 = vld [vmem:[#allocation6 + $0x710] sm:$0xff]  ;;  %v2326_v16 = vld [vmem:[#allocation6 + $0x878] sm:$0xff]  ;;  %v7047_v17 = vcombine.low %v2314_v52, %v2318_v32 }
 0x2e9   :  { %5712 = vmatprep.subr.bf16.mxu1 %v6960_v25  ;;  %v2285_v25 = vld [vmem:[#allocation6 + $0x730] sm:$0xff] }
 0x2ea   :  { %v7013_v43 = vcombine.low %v2281_v24, %v2285_v25 }
 0x2eb   :  { %5549 = vmatpush1.bf16.msra.mxu0 %v6957_v4  ;;  %v7014_v4 = vcombine.high %v2281_v24, %v2285_v25  ;;  %v2330_v24 = vld [vmem:[#allocation6 + $0x898] sm:$0xff] }
 0x2ec   :  { %5713 = vmatpush1.bf16.msra.mxu1 %v6959_v34  ;;  %5550 = vmatprep.subr.bf16.mxu0 %v6966_v35  ;;  %v7016_v34 = vcombine.high %v2282_v28, %v2286_v29  ;;  %v2289_v35 = vld [vmem:[#allocation6 + $0x750] sm:$0xff]  ;;  %v2334_v25 = vld [vmem:[#allocation6 + $0x8b8] sm:$0xff]  ;;  %v7055_v29 = vcombine.low %v2322_v14, %v2326_v16 }
 0x2ed   :  { %5714 = vmatprep.subr.bf16.mxu1 %v6968_v26  ;;  %v2293_v26 = vld [vmem:[#allocation6 + $0x770] sm:$0xff] }
 0x2ee   :  { %v7021_v50 = vcombine.low %v2289_v35, %v2293_v26 }
 0x2ef   :  { %5551 = vmatpush1.bf16.msra.mxu0 %v6965_v39  ;;  %v7022_v39 = vcombine.high %v2289_v35, %v2293_v26  ;;  %v2338_v35 = vld [vmem:[#allocation6 + $0x8d8] sm:$0xff] }
 0x2f0   :  { %5715 = vmatpush1.bf16.msra.mxu1 %v6967_v40  ;;  %5552 = vmatprep.subr.bf16.mxu0 %v6974_v41  ;;  %v7024_v40 = vcombine.high %v2290_v36, %v2294_v37  ;;  %v2297_v41 = vld [vmem:[#allocation6 + $0x790] sm:$0xff]  ;;  %v2342_v26 = vld [vmem:[#allocation6 + $0x8f8] sm:$0xff] }
 0x2f1   :  { %5716 = vmatprep.subr.bf16.mxu1 %v6976_v46  ;;  %v2301_v46 = vld [vmem:[#allocation6 + $0x7b0] sm:$0xff] }
 0x2f2   :  { %v7029_v61 = vcombine.low %v2297_v41, %v2301_v46 }
 0x2f3   :  { %5553 = vmatpush1.bf16.msra.mxu0 %v6973_v53  ;;  %v7030_v53 = vcombine.high %v2297_v41, %v2301_v46  ;;  %v2350_v41 = vld [vmem:[#allocation6 + $0x938] sm:$0xff]  ;;  %v7071_v46 = vcombine.low %v2338_v35, %v2342_v26 }
 0x2f4   :  { %5717 = vmatpush1.bf16.msra.mxu1 %v6975_v54  ;;  %5554 = vmatprep.subr.bf16.mxu0 %v6982_v55  ;;  %v7032_v54 = vcombine.high %v2298_v48, %v2302_v49  ;;  %v2305_v55 = vld [vmem:[#allocation6 + $0x7d0] sm:$0xff] }
 0x2f5   :  { %5718 = vmatprep.subr.bf16.mxu1 %v6984_v57  ;;  %v2309_v57 = vld [vmem:[#allocation6 + $0x7f0] sm:$0xff] }
 0x2f6   :  { %v7037_v5 = vcombine.low %v2305_v55, %v2309_v57 }
 0x2f7   :  { %5555 = vmatpush1.bf16.msra.mxu0 %v6981_v62  ;;  %v7038_v62 = vcombine.high %v2305_v55, %v2309_v57 }
 0x2f8   :  { %5719 = vmatpush1.bf16.msra.mxu1 %v6983_v63  ;;  %5556 = vmatprep.subr.bf16.mxu0 %v6990_v56  ;;  %v7040_v63 = vcombine.high %v2306_v58, %v2310_v21  ;;  %v2313_v56 = vld [vmem:[#allocation6 + $0x810] sm:$0xff] }
 0x2f9   :  { %5720 = vmatprep.subr.bf16.mxu1 %v6992_v6  ;;  %v2317_v6 = vld [vmem:[#allocation6 + $0x830] sm:$0xff] }
 0x2fa   :  { %v7045_v12 = vcombine.low %v2313_v56, %v2317_v6 }
 0x2fb   :  { %5557 = vmatpush1.bf16.msra.mxu0 %v6989_v9  ;;  %v7046_v9 = vcombine.high %v2313_v56, %v2317_v6 }
 0x2fc   :  { %5721 = vmatpush1.bf16.msra.mxu1 %v6991_v10  ;;  %5558 = vmatprep.subr.bf16.mxu0 %v6998_v13  ;;  %v7048_v10 = vcombine.high %v2314_v52, %v2318_v32  ;;  %v2321_v13 = vld [vmem:[#allocation6 + $0x850] sm:$0xff] }
 0x2fd   :  { %5722 = vmatprep.subr.bf16.mxu1 %v7000_v11  ;;  %v2325_v11 = vld [vmem:[#allocation6 + $0x870] sm:$0xff] }
 0x2fe   :  { %v7053_v28 = vcombine.low %v2321_v13, %v2325_v11 }
 0x2ff   :  { %5559 = vmatpush1.bf16.msra.mxu0 %v6997_v19  ;;  %v7054_v19 = vcombine.high %v2321_v13, %v2325_v11 }
 0x300   :  { %5723 = vmatpush1.bf16.msra.mxu1 %v6999_v20  ;;  %5560 = vmatprep.subr.bf16.mxu0 %v7006_v22  ;;  %v2329_v20 = vld [vmem:[#allocation6 + $0x890] sm:$0xff] }
 0x301   :  { %5724 = vmatprep.subr.bf16.mxu1 %v7008_v23  ;;  %v2333_v22 = vld [vmem:[#allocation6 + $0x8b0] sm:$0xff]  ;;  %v7056_v23 = vcombine.high %v2322_v14, %v2326_v16 }
 0x302   :  { %v7061_v36 = vcombine.low %v2329_v20, %v2333_v22  ;;  %v2377_v16 = vld [vmem:[#allocation6 + $0xa10] sm:$0xff] }
 0x303   :  { %5561 = vmatpush1.bf16.msra.mxu0 %v7005_v31  ;;  %v7062_v31 = vcombine.high %v2329_v20, %v2333_v22  ;;  %v2382_v20 = vld [vmem:[#allocation6 + $0xa38] sm:$0xff] }
 0x304   :  { %5725 = vmatpush1.bf16.msra.mxu1 %v7007_v33  ;;  %5562 = vmatprep.subr.bf16.mxu0 %v7014_v4  ;;  %v7064_v33 = vcombine.high %v2330_v24, %v2334_v25  ;;  %v2337_v4 = vld [vmem:[#allocation6 + $0x8d0] sm:$0xff] }
 0x305   :  { %5726 = vmatprep.subr.bf16.mxu1 %v7016_v34  ;;  %v2341_v34 = vld [vmem:[#allocation6 + $0x8f0] sm:$0xff] }
 0x306   :  { %v7070_v37 = vcombine.high %v2337_v4, %v2341_v34 }
 0x307   :  { %5563 = vmatpush1.bf16.msra.mxu0 %v7013_v43  ;;  %v7072_v43 = vcombine.high %v2338_v35, %v2342_v26 }
 0x308   :  { %5727 = vmatpush1.bf16.msra.mxu1 %v7015_v38  ;;  %5564 = vmatprep.subr.bf16.mxu0 %v7022_v39  ;;  %v2345_v38 = vld [vmem:[#allocation6 + $0x910] sm:$0xff] }
 0x309   :  { %5728 = vmatprep.subr.bf16.mxu1 %v7024_v40  ;;  %v2349_v39 = vld [vmem:[#allocation6 + $0x930] sm:$0xff]  ;;  %v2346_v40 = vld [vmem:[#allocation6 + $0x918] sm:$0xff] }
 0x30a   :  { %v7078_v48 = vcombine.high %v2345_v38, %v2349_v39  ;;  %v7080_v49 = vcombine.high %v2346_v40, %v2350_v41  ;;  %v7077_v55 = vcombine.low %v2345_v38, %v2349_v39  ;;  %v7079_v57 = vcombine.low %v2346_v40, %v2350_v41 }
 0x30b   :  { %5565 = vmatpush1.bf16.msra.mxu0 %v7021_v50  ;;  %v2353_v50 = vld [vmem:[#allocation6 + $0x950] sm:$0xff] }
 0x30c   :  { %5729 = vmatpush1.bf16.msra.mxu1 %v7023_v51  ;;  %5566 = vmatprep.subr.bf16.mxu0 %v7030_v53  ;;  %v2357_v51 = vld [vmem:[#allocation6 + $0x970] sm:$0xff]  ;;  %v2354_v53 = vld [vmem:[#allocation6 + $0x958] sm:$0xff] }
 0x30d   :  { %5730 = vmatprep.subr.bf16.mxu1 %v7032_v54  ;;  %v2358_v54 = vld [vmem:[#allocation6 + $0x978] sm:$0xff]  ;;  %v7086_v58 = vcombine.high %v2353_v50, %v2357_v51  ;;  %v7085_v56 = vcombine.low %v2353_v50, %v2357_v51 }
 0x30e   :  { %v7088_v21 = vcombine.high %v2354_v53, %v2358_v54  ;;  %v7087_v6 = vcombine.low %v2354_v53, %v2358_v54 }
 0x30f   :  { %5567 = vmatpush1.bf16.msra.mxu0 %v7029_v61  ;;  %v2361_v61 = vld [vmem:[#allocation6 + $0x990] sm:$0xff] }
 0x310   :  { %5731 = vmatpush1.bf16.msra.mxu1 %v7031_v3  ;;  %5568 = vmatprep.subr.bf16.mxu0 %v7038_v62  ;;  %v2365_v3 = vld [vmem:[#allocation6 + $0x9b0] sm:$0xff]  ;;  %v2362_v62 = vld [vmem:[#allocation6 + $0x998] sm:$0xff] }
 0x311   :  { %5732 = vmatprep.subr.bf16.mxu1 %v7040_v63  ;;  %v2366_v63 = vld [vmem:[#allocation6 + $0x9b8] sm:$0xff]  ;;  %v7094_v52 = vcombine.high %v2361_v61, %v2365_v3  ;;  %v7093_v13 = vcombine.low %v2361_v61, %v2365_v3 }
 0x312   :  { %v7096_v32 = vcombine.high %v2362_v62, %v2366_v63  ;;  %v7095_v11 = vcombine.low %v2362_v62, %v2366_v63 }
 0x313   :  { %5569 = vmatpush1.bf16.msra.mxu0 %v7037_v5  ;;  %v2369_v5 = vld [vmem:[#allocation6 + $0x9d0] sm:$0xff] }
 0x314   :  { %5733 = vmatpush1.bf16.msra.mxu1 %v7039_v7  ;;  %5579 = vmatprep.subr.bf16.mxu0 %v7046_v9  ;;  %v2373_v7 = vld [vmem:[#allocation6 + $0x9f0] sm:$0xff]  ;;  %v2370_v9 = vld [vmem:[#allocation6 + $0x9d8] sm:$0xff] }
 0x315   :  { %5743 = vmatprep.subr.bf16.mxu1 %v7048_v10  ;;  %v2374_v10 = vld [vmem:[#allocation6 + $0x9f8] sm:$0xff]  ;;  %v7101_v22 = vcombine.low %v2369_v5, %v2373_v7 }
 0x316   :  { %5571 = vmatmul.mubr.bf16.vlgmr.msra.gmra.mrb[12].mxu0 %v7980_v30  ;;  %v7104_v14 = vcombine.high %v2370_v9, %v2374_v10 }
 0x317   :  { %5735 = vmatmul.mubr.bf16.vlgmr.msra.gmra.mrb[12].mxu1 %v7980_v30  ;;  %5580 = vmatpush1.bf16.msra.mxu0 %v7045_v12  ;;  %v7063_v30 = vcombine.low %v2330_v24, %v2334_v25  ;;  %v7102_v12 = vcombine.high %v2369_v5, %v2373_v7 }
 0x318   :  { %5611 = vmatprep.mubr.bf16.mxu0 %v7998_v15  ;;  %5744 = vmatpush1.bf16.msra.mxu1 %v7047_v17  ;;  %v2381_v17 = vld [vmem:[#allocation6 + $0xa30] sm:$0xff] }
 0x319   :  { %5775 = vmatprep.mubr.bf16.mxu1 %v7998_v15  ;;  %5581 = vmatprep.subr.bf16.mxu0 %v7054_v19  ;;  %v7069_v15 = vcombine.low %v2337_v4, %v2341_v34  ;;  %v2378_v19 = vld [vmem:[#allocation6 + $0xa18] sm:$0xff]  ;;  %v7110_v24 = vcombine.high %v2377_v16, %v2381_v17  ;;  %v7109_v4 = vcombine.low %v2377_v16, %v2381_v17 }
 0x31a   :  { %5745 = vmatprep.subr.bf16.mxu1 %v7056_v23  ;;  %v7103_v23 = vcombine.low %v2370_v9, %v2374_v10  ;;  %v7112_v25 = vcombine.high %v2378_v19, %v2382_v20  ;;  %v7111_v34 = vcombine.low %v2378_v19, %v2382_v20 }
 0x31b   :  { %5582 = vmatpush1.bf16.msra.mxu0 %v7053_v28  ;;  %v2385_v28 = vld [vmem:[#allocation6 + $0xa50] sm:$0xff] }
 0x31c   :  { %5746 = vmatpush1.bf16.msra.mxu1 %v7055_v29  ;;  %5583 = vmatprep.subr.bf16.mxu0 %v7062_v31  ;;  %v2389_v29 = vld [vmem:[#allocation6 + $0xa70] sm:$0xff]  ;;  %v2386_v31 = vld [vmem:[#allocation6 + $0xa58] sm:$0xff] }
 0x31d   :  { %5747 = vmatprep.subr.bf16.mxu1 %v7064_v33  ;;  %v2390_v33 = vld [vmem:[#allocation6 + $0xa78] sm:$0xff]  ;;  %v7118_v35 = vcombine.high %v2385_v28, %v2389_v29  ;;  %v7117_v38 = vcombine.low %v2385_v28, %v2389_v29 }
 0x31e   :  { %v7120_v26 = vcombine.high %v2386_v31, %v2390_v33  ;;  %v7119_v39 = vcombine.low %v2386_v31, %v2390_v33 }
 0x31f   :  { %5584 = vmatpush1.bf16.msra.mxu0 %v7061_v36  ;;  %v2393_v36 = vld [vmem:[#allocation6 + $0xa90] sm:$0xff] }
 0x320   :  { %5748 = vmatpush1.bf16.msra.mxu1 %v7063_v30  ;;  %5585 = vmatprep.subr.bf16.mxu0 %v7070_v37  ;;  %v2397_v30 = vld [vmem:[#allocation6 + $0xab0] sm:$0xff]  ;;  %v2394_v37 = vld [vmem:[#allocation6 + $0xa98] sm:$0xff] }
 0x321   :  { %5749 = vmatprep.subr.bf16.mxu1 %v7072_v43  ;;  %v2398_v43 = vld [vmem:[#allocation6 + $0xab8] sm:$0xff]  ;;  %v7126_v40 = vcombine.high %v2393_v36, %v2397_v30  ;;  %v7125_v50 = vcombine.low %v2393_v36, %v2397_v30 }
 0x322   :  { %v7128_v41 = vcombine.high %v2394_v37, %v2398_v43  ;;  %v7127_v51 = vcombine.low %v2394_v37, %v2398_v43 }
 0x323   :  { %5586 = vmatpush1.bf16.msra.mxu0 %v7069_v15  ;;  %v2401_v15 = vld [vmem:[#allocation6 + $0xad0] sm:$0xff] }
 0x324   :  { %5750 = vmatpush1.bf16.msra.mxu1 %v7071_v46  ;;  %5587 = vmatprep.subr.bf16.mxu0 %v7078_v48  ;;  %v2405_v46 = vld [vmem:[#allocation6 + $0xaf0] sm:$0xff]  ;;  %v2402_v48 = vld [vmem:[#allocation6 + $0xad8] sm:$0xff] }
 0x325   :  { %5751 = vmatprep.subr.bf16.mxu1 %v7080_v49  ;;  %v2406_v49 = vld [vmem:[#allocation6 + $0xaf8] sm:$0xff]  ;;  %v7134_v53 = vcombine.high %v2401_v15, %v2405_v46  ;;  %v7133_v61 = vcombine.low %v2401_v15, %v2405_v46 }
 0x326   :  { %v7136_v54 = vcombine.high %v2402_v48, %v2406_v49  ;;  %v7135_v3 = vcombine.low %v2402_v48, %v2406_v49  ;;  %v2454_v15 = vld [vmem:[#allocation6 + $0xc78] sm:$0xff]  ;;  %v2457_v49 = vld [vmem:[#allocation6 + $0xc90] sm:$0xff] }
 0x327   :  { %5588 = vmatpush1.bf16.msra.mxu0 %v7077_v55  ;;  %v2409_v55 = vld [vmem:[#allocation6 + $0xb10] sm:$0xff] }
 0x328   :  { %5752 = vmatpush1.bf16.msra.mxu1 %v7079_v57  ;;  %5589 = vmatprep.subr.bf16.mxu0 %v7086_v58  ;;  %v2413_v57 = vld [vmem:[#allocation6 + $0xb30] sm:$0xff]  ;;  %v2410_v58 = vld [vmem:[#allocation6 + $0xb18] sm:$0xff] }
 0x329   :  { %5753 = vmatprep.subr.bf16.mxu1 %v7088_v21  ;;  %v2414_v21 = vld [vmem:[#allocation6 + $0xb38] sm:$0xff]  ;;  %v7142_v62 = vcombine.high %v2409_v55, %v2413_v57  ;;  %v7141_v5 = vcombine.low %v2409_v55, %v2413_v57 }
 0x32a   :  { %v7144_v63 = vcombine.high %v2410_v58, %v2414_v21  ;;  %v7143_v7 = vcombine.low %v2410_v58, %v2414_v21 }
 0x32b   :  { %5590 = vmatpush1.bf16.msra.mxu0 %v7085_v56  ;;  %v2417_v56 = vld [vmem:[#allocation6 + $0xb50] sm:$0xff] }
 0x32c   :  { %5754 = vmatpush1.bf16.msra.mxu1 %v7087_v6  ;;  %5591 = vmatprep.subr.bf16.mxu0 %v7094_v52  ;;  %v2421_v6 = vld [vmem:[#allocation6 + $0xb70] sm:$0xff]  ;;  %v2418_v52 = vld [vmem:[#allocation6 + $0xb58] sm:$0xff] }
 0x32d   :  { %5755 = vmatprep.subr.bf16.mxu1 %v7096_v32  ;;  %v2422_v32 = vld [vmem:[#allocation6 + $0xb78] sm:$0xff]  ;;  %v7150_v9 = vcombine.high %v2417_v56, %v2421_v6  ;;  %v7149_v16 = vcombine.low %v2417_v56, %v2421_v6 }
 0x32e   :  { %v7152_v10 = vcombine.high %v2418_v52, %v2422_v32  ;;  %v7151_v17 = vcombine.low %v2418_v52, %v2422_v32  ;;  %v2473_v32 = vld [vmem:[#allocation6 + $0xd10] sm:$0xff] }
 0x32f   :  { %5592 = vmatpush1.bf16.msra.mxu0 %v7093_v13  ;;  %v2425_v13 = vld [vmem:[#allocation6 + $0xb90] sm:$0xff] }
 0x330   :  { %5756 = vmatpush1.bf16.msra.mxu1 %v7095_v11  ;;  %5593 = vmatprep.subr.bf16.mxu0 %v7102_v12  ;;  %v2429_v11 = vld [vmem:[#allocation6 + $0xbb0] sm:$0xff]  ;;  %v2426_v12 = vld [vmem:[#allocation6 + $0xb98] sm:$0xff] }
 0x331   :  { %5757 = vmatprep.subr.bf16.mxu1 %v7104_v14  ;;  %v2430_v14 = vld [vmem:[#allocation6 + $0xbb8] sm:$0xff]  ;;  %v7158_v19 = vcombine.high %v2425_v13, %v2429_v11  ;;  %v7157_v28 = vcombine.low %v2425_v13, %v2429_v11 }
 0x332   :  { %v7160_v20 = vcombine.high %v2426_v12, %v2430_v14  ;;  %v7159_v29 = vcombine.low %v2426_v12, %v2430_v14  ;;  %v2481_v12 = vld [vmem:[#allocation6 + $0xd50] sm:$0xff] }
 0x333   :  { %5594 = vmatpush1.bf16.msra.mxu0 %v7101_v22  ;;  %v2433_v22 = vld [vmem:[#allocation6 + $0xbd0] sm:$0xff] }
 0x334   :  { %5758 = vmatpush1.bf16.msra.mxu1 %v7103_v23  ;;  %5595 = vmatprep.subr.bf16.mxu0 %v7110_v24  ;;  %v2437_v23 = vld [vmem:[#allocation6 + $0xbf0] sm:$0xff]  ;;  %v2434_v24 = vld [vmem:[#allocation6 + $0xbd8] sm:$0xff] }
 0x335   :  { %5759 = vmatprep.subr.bf16.mxu1 %v7112_v25  ;;  %v2438_v25 = vld [vmem:[#allocation6 + $0xbf8] sm:$0xff]  ;;  %v7166_v31 = vcombine.high %v2433_v22, %v2437_v23  ;;  %v7165_v36 = vcombine.low %v2433_v22, %v2437_v23  ;;  %v2485_v14 = vld [vmem:[#allocation6 + $0xd70] sm:$0xff] }
 0x336   :  { %v7168_v33 = vcombine.high %v2434_v24, %v2438_v25  ;;  %v7167_v30 = vcombine.low %v2434_v24, %v2438_v25  ;;  %v7214_v22 = vcombine.high %v2481_v12, %v2485_v14  ;;  %v2489_v24 = vld [vmem:[#allocation6 + $0xd90] sm:$0xff] }
 0x337   :  { %5596 = vmatpush1.bf16.msra.mxu0 %v7109_v4  ;;  %v2441_v4 = vld [vmem:[#allocation6 + $0xc10] sm:$0xff] }
 0x338   :  { %5760 = vmatpush1.bf16.msra.mxu1 %v7111_v34  ;;  %5597 = vmatprep.subr.bf16.mxu0 %v7118_v35  ;;  %v2445_v34 = vld [vmem:[#allocation6 + $0xc30] sm:$0xff]  ;;  %v2442_v35 = vld [vmem:[#allocation6 + $0xc18] sm:$0xff] }
 0x339   :  { %5761 = vmatprep.subr.bf16.mxu1 %v7120_v26  ;;  %v2446_v26 = vld [vmem:[#allocation6 + $0xc38] sm:$0xff]  ;;  %v7174_v37 = vcombine.high %v2441_v4, %v2445_v34  ;;  %v2493_v25 = vld [vmem:[#allocation6 + $0xdb0] sm:$0xff] }
 0x33a   :  { %v7176_v43 = vcombine.high %v2442_v35, %v2446_v26  ;;  %v7175_v46 = vcombine.low %v2442_v35, %v2446_v26 }
 0x33b   :  { %5598 = vmatpush1.bf16.msra.mxu0 %v7117_v38  ;;  %v2449_v38 = vld [vmem:[#allocation6 + $0xc50] sm:$0xff] }
 0x33c   :  { %5762 = vmatpush1.bf16.msra.mxu1 %v7119_v39  ;;  %5599 = vmatprep.subr.bf16.mxu0 %v7126_v40  ;;  %v2453_v39 = vld [vmem:[#allocation6 + $0xc70] sm:$0xff]  ;;  %v7173_v40 = vcombine.low %v2441_v4, %v2445_v34  ;;  %v7222_v4 = vcombine.high %v2489_v24, %v2493_v25 }
 0x33d   :  { %5763 = vmatprep.subr.bf16.mxu1 %v7128_v41  ;;  %v2450_v41 = vld [vmem:[#allocation6 + $0xc58] sm:$0xff]  ;;  %v7182_v48 = vcombine.high %v2449_v38, %v2453_v39  ;;  %v7181_v55 = vcombine.low %v2449_v38, %v2453_v39 }
 0x33e   :  { %v7183_v57 = vcombine.low %v2450_v41, %v2454_v15  ;;  %v2498_v38 = vld [vmem:[#allocation6 + $0xdd8] sm:$0xff] }
 0x33f   :  { %5600 = vmatpush1.bf16.msra.mxu0 %v7125_v50  ;;  %v2461_v50 = vld [vmem:[#allocation6 + $0xcb0] sm:$0xff]  ;;  %v2502_v39 = vld [vmem:[#allocation6 + $0xdf8] sm:$0xff] }
 0x340   :  { %5764 = vmatpush1.bf16.msra.mxu1 %v7127_v51  ;;  %5601 = vmatprep.subr.bf16.mxu0 %v7134_v53  ;;  %v7184_v51 = vcombine.high %v2450_v41, %v2454_v15  ;;  %v2458_v53 = vld [vmem:[#allocation6 + $0xc98] sm:$0xff]  ;;  %v7190_v58 = vcombine.high %v2457_v49, %v2461_v50  ;;  %v7189_v56 = vcombine.low %v2457_v49, %v2461_v50 }
 0x341   :  { %5765 = vmatprep.subr.bf16.mxu1 %v7136_v54  ;;  %v2462_v54 = vld [vmem:[#allocation6 + $0xcb8] sm:$0xff]  ;;  %v7221_v15 = vcombine.low %v2489_v24, %v2493_v25 }
 0x342   :  { %v7192_v21 = vcombine.high %v2458_v53, %v2462_v54 }
 0x343   :  { %5602 = vmatpush1.bf16.msra.mxu0 %v7133_v61  ;;  %v2465_v61 = vld [vmem:[#allocation6 + $0xcd0] sm:$0xff] }
 0x344   :  { %5766 = vmatpush1.bf16.msra.mxu1 %v7135_v3  ;;  %5603 = vmatprep.subr.bf16.mxu0 %v7142_v62  ;;  %v2469_v3 = vld [vmem:[#allocation6 + $0xcf0] sm:$0xff]  ;;  %v2466_v62 = vld [vmem:[#allocation6 + $0xcd8] sm:$0xff] }
 0x345   :  { %5767 = vmatprep.subr.bf16.mxu1 %v7144_v63  ;;  %v2470_v63 = vld [vmem:[#allocation6 + $0xcf8] sm:$0xff]  ;;  %v7198_v6 = vcombine.high %v2465_v61, %v2469_v3 }
 0x346   :  { %v7200_v52 = vcombine.high %v2466_v62, %v2470_v63 }
 0x347   :  { %5604 = vmatpush1.bf16.msra.mxu0 %v7141_v5  ;;  %v2477_v5 = vld [vmem:[#allocation6 + $0xd30] sm:$0xff] }
 0x348   :  { %5768 = vmatpush1.bf16.msra.mxu1 %v7143_v7  ;;  %5605 = vmatprep.subr.bf16.mxu0 %v7150_v9  ;;  %v2474_v7 = vld [vmem:[#allocation6 + $0xd18] sm:$0xff]  ;;  %v7206_v13 = vcombine.high %v2473_v32, %v2477_v5 }
 0x349   :  { %5769 = vmatprep.subr.bf16.mxu1 %v7152_v10  ;;  %v2478_v9 = vld [vmem:[#allocation6 + $0xd38] sm:$0xff]  ;;  %v7199_v10 = vcombine.low %v2466_v62, %v2470_v63  ;;  %v2513_v62 = vld [vmem:[#allocation6 + $0xe50] sm:$0xff] }
 0x34a   :  { %v7208_v11 = vcombine.high %v2474_v7, %v2478_v9  ;;  %v2517_v63 = vld [vmem:[#allocation6 + $0xe70] sm:$0xff] }
 0x34b   :  { %5606 = vmatpush1.bf16.msra.mxu0 %v7149_v16  ;;  %v2482_v16 = vld [vmem:[#allocation6 + $0xd58] sm:$0xff] }
 0x34c   :  { %5770 = vmatpush1.bf16.msra.mxu1 %v7151_v17  ;;  %5607 = vmatprep.subr.bf16.mxu0 %v7158_v19  ;;  %v2486_v17 = vld [vmem:[#allocation6 + $0xd78] sm:$0xff]  ;;  %v7205_v19 = vcombine.low %v2473_v32, %v2477_v5  ;;  %v7246_v32 = vcombine.high %v2513_v62, %v2517_v63 }
 0x34d   :  { %5771 = vmatprep.subr.bf16.mxu1 %v7160_v20  ;;  %v7207_v20 = vcombine.low %v2474_v7, %v2478_v9  ;;  %v7216_v23 = vcombine.high %v2482_v16, %v2486_v17  ;;  %v2521_v7 = vld [vmem:[#allocation6 + $0xe90] sm:$0xff] }
 0x34e   :  { %v2525_v9 = vld [vmem:[#allocation6 + $0xeb0] sm:$0xff] }
 0x34f   :  { %5608 = vmatpush1.bf16.msra.mxu0 %v7157_v28  ;;  %v2490_v28 = vld [vmem:[#allocation6 + $0xd98] sm:$0xff] }
 0x350   :  { %5772 = vmatpush1.bf16.msra.mxu1 %v7159_v29  ;;  %5609 = vmatprep.subr.bf16.mxu0 %v7166_v31  ;;  %v2494_v29 = vld [vmem:[#allocation6 + $0xdb8] sm:$0xff]  ;;  %v7213_v31 = vcombine.low %v2481_v12, %v2485_v14  ;;  %v7254_v12 = vcombine.high %v2521_v7, %v2525_v9 }
 0x351   :  { %5773 = vmatprep.subr.bf16.mxu1 %v7168_v33  ;;  %v7215_v33 = vcombine.low %v2482_v16, %v2486_v17  ;;  %v7224_v26 = vcombine.high %v2490_v28, %v2494_v29  ;;  %v7223_v49 = vcombine.low %v2490_v28, %v2494_v29  ;;  %v2529_v16 = vld [vmem:[#allocation6 + $0xed0] sm:$0xff] }
 0x352   :  { %v2533_v17 = vld [vmem:[#allocation6 + $0xef0] sm:$0xff] }
 0x353   :  { %5610 = vmatpush1.bf16.msra.mxu0 %v7165_v36  ;;  %v2497_v36 = vld [vmem:[#allocation6 + $0xdd0] sm:$0xff]  ;;  %v7262_v24 = vcombine.high %v2529_v16, %v2533_v17 }
 0x354   :  { %5774 = vmatpush1.bf16.msra.mxu1 %v7167_v30  ;;  %5620 = vmatprep.subr.bf16.mxu0 %v7174_v37  ;;  %v2501_v30 = vld [vmem:[#allocation6 + $0xdf0] sm:$0xff] }
 0x355   :  { %5784 = vmatprep.subr.bf16.mxu1 %v7176_v43  ;;  %v7230_v50 = vcombine.high %v2497_v36, %v2501_v30  ;;  %v2537_v28 = vld [vmem:[#allocation6 + $0xf10] sm:$0xff] }
 0x356   :  { %5612 = vmatmul.mubr.bf16.vlgmr.msra.gmra.mrb[12].mxu0 %v8000_v18  ;;  %v2541_v29 = vld [vmem:[#allocation6 + $0xf30] sm:$0xff] }
 0x357   :  { %5776 = vmatmul.mubr.bf16.vlgmr.msra.gmra.mrb[12].mxu1 %v8000_v18  ;;  %5621 = vmatpush1.bf16.msra.mxu0 %v7173_v40  ;;  %v7191_v18 = vcombine.low %v2458_v53, %v2462_v54  ;;  %v2505_v53 = vld [vmem:[#allocation6 + $0xe10] sm:$0xff] }
 0x358   :  { %5652 = vmatprep.mubr.bf16.mxu0 %v8004_v27  ;;  %5785 = vmatpush1.bf16.msra.mxu1 %v7175_v46  ;;  %v2509_v54 = vld [vmem:[#allocation6 + $0xe30] sm:$0xff] }
 0x359   :  { %5816 = vmatprep.mubr.bf16.mxu1 %v8004_v27  ;;  %5622 = vmatprep.subr.bf16.mxu0 %v7182_v48  ;;  %v7197_v27 = vcombine.low %v2465_v61, %v2469_v3  ;;  %v7238_v61 = vcombine.high %v2505_v53, %v2509_v54 }
 0x35a   :  { %5786 = vmatprep.subr.bf16.mxu1 %v7184_v51  ;;  %v7232_v51 = vcombine.high %v2498_v38, %v2502_v39 }
 0x35b   :  { %5623 = vmatpush1.bf16.msra.mxu0 %v7181_v55  ;;  %v2506_v55 = vld [vmem:[#allocation6 + $0xe18] sm:$0xff] }
 0x35c   :  { %5787 = vmatpush1.bf16.msra.mxu1 %v7183_v57  ;;  %5624 = vmatprep.subr.bf16.mxu0 %v7190_v58  ;;  %v2510_v57 = vld [vmem:[#allocation6 + $0xe38] sm:$0xff]  ;;  %v7229_v58 = vcombine.low %v2497_v36, %v2501_v30  ;;  %v7270_v30 = vcombine.high %v2537_v28, %v2541_v29 }
 0x35d   :  { %5788 = vmatprep.subr.bf16.mxu1 %v7192_v21  ;;  %v7231_v21 = vcombine.low %v2498_v38, %v2502_v39  ;;  %v7240_v3 = vcombine.high %v2506_v55, %v2510_v57 }
 0x35f   :  { %5625 = vmatpush1.bf16.msra.mxu0 %v7189_v56  ;;  %v2514_v56 = vld [vmem:[#allocation6 + $0xe58] sm:$0xff] }
 0x360   :  { %5789 = vmatpush1.bf16.msra.mxu1 %v7191_v18  ;;  %5626 = vmatprep.subr.bf16.mxu0 %v7198_v6  ;;  %v2518_v18 = vld [vmem:[#allocation6 + $0xe78] sm:$0xff]  ;;  %v7237_v6 = vcombine.low %v2505_v53, %v2509_v54  ;;  %v2553_v54 = vld [vmem:[#allocation6 + $0xf90] sm:$0xff] }
 0x361   :  { %5790 = vmatprep.subr.bf16.mxu1 %v7200_v52  ;;  %v7239_v52 = vcombine.low %v2506_v55, %v2510_v57  ;;  %v7248_v5 = vcombine.high %v2514_v56, %v2518_v18  ;;  %v2557_v55 = vld [vmem:[#allocation6 + $0xfb0] sm:$0xff] }
 0x363   :  { %5627 = vmatpush1.bf16.msra.mxu0 %v7197_v27  ;;  %v2522_v27 = vld [vmem:[#allocation6 + $0xe98] sm:$0xff] }
 0x364   :  { %5791 = vmatpush1.bf16.msra.mxu1 %v7199_v10  ;;  %5628 = vmatprep.subr.bf16.mxu0 %v7206_v13  ;;  %v2526_v10 = vld [vmem:[#allocation6 + $0xeb8] sm:$0xff]  ;;  %v7245_v13 = vcombine.low %v2513_v62, %v2517_v63  ;;  %v2561_v63 = vld [vmem:[#allocation6 + $0xfd0] sm:$0xff] }
 0x365   :  { %5792 = vmatprep.subr.bf16.mxu1 %v7208_v11  ;;  %v7247_v11 = vcombine.low %v2514_v56, %v2518_v18  ;;  %v7256_v14 = vcombine.high %v2522_v27, %v2526_v10  ;;  %v2565_v56 = vld [vmem:[#allocation6 + $0xff0] sm:$0xff]  ;;  %v2566_v18 = vld [vmem:[#allocation6 + $0xff8] sm:$0xff] }
 0x367   :  { %5629 = vmatpush1.bf16.msra.mxu0 %v7205_v19  ;;  %v2530_v19 = vld [vmem:[#allocation6 + $0xed8] sm:$0xff] }
 0x368   :  { %5793 = vmatpush1.bf16.msra.mxu1 %v7207_v20  ;;  %5630 = vmatprep.subr.bf16.mxu0 %v7214_v22  ;;  %v2534_v20 = vld [vmem:[#allocation6 + $0xef8] sm:$0xff]  ;;  %v7253_v22 = vcombine.low %v2521_v7, %v2525_v9  ;;  %v7540_v9 = vld [vmem:[#allocation9 + $0x40] sm:$0xff]  }
 0x369   :  { %v8032_v34 = vpop.f32.mrb[8].mxu0  ;;  %v8034_v35 = vpop.f32.mrb[8].mxu1  ;;  %5794 = vmatprep.subr.bf16.mxu1 %v7216_v23  ;;  %v7255_v23 = vcombine.low %v2522_v27, %v2526_v10  ;;  %v7264_v25 = vcombine.high %v2530_v19, %v2534_v20  ;;  %v7263_v36 = vcombine.low %v2530_v19, %v2534_v20  ;;  %v7541_v27 = vld [vmem:[#allocation9 + $0xc0] sm:$0xff]   ;;  %v7546_v20 = vld [vmem:[#allocation9 + $0x8] sm:$0xff]  }
 0x36a   :  { %v8036_v37 = vpop.f32.mrb[9].mxu0  ;;  %v8038_v43 = vpop.f32.mrb[9].mxu1 }
 0x36b   :  { %v5330_v40 = vpop.f32.mrb[10].mxu0  ;;  %v5494_v41 = vpop.f32.mrb[10].mxu1  ;;  %5631 = vmatpush1.bf16.msra.mxu0 %v7213_v31  ;;  %v8040_v31 = vld [vmem:[#allocation7] sm:$0xff] }
 0x36c   :  { %5795 = vmatpush1.bf16.msra.mxu1 %v7215_v33  ;;  %v5331_v46 = vpop.f32.mrb[11].mxu0  ;;  %v5495_v48 = vpop.f32.mrb[11].mxu1  ;;  %5632 = vmatprep.subr.bf16.mxu0 %v7222_v4  ;;  %v2538_v33 = vld [vmem:[#allocation6 + $0xf18] sm:$0xff]  ;;  %v5136_v38 = vrot.slane %v8040_v31, %v1677_v44  ;;  %v2545_v40 = vld [vmem:[#allocation6 + $0xf50] sm:$0xff] }
 0x36d   :  { %5796 = vmatprep.subr.bf16.mxu1 %v7224_v26  ;;  %v2542_v4 = vld [vmem:[#allocation6 + $0xf38] sm:$0xff]  ;;  %v7261_v26 = vcombine.low %v2529_v16, %v2533_v17  ;;  %v2549_v41 = vld [vmem:[#allocation6 + $0xf70] sm:$0xff] }
 0x36e   :  { %v7272_v39 = vcombine.high %v2538_v33, %v2542_v4  ;;  %v2546_v46 = vld [vmem:[#allocation6 + $0xf58] sm:$0xff]  ;;  %v7458_v53 = vadd.f32 %v8036_v37, %v5136_v38  ;;  %v7545_v17 = vld [vmem:[#allocation9 + $0xc8] sm:$0xff]   ;;  %v7557_v38 = vld [vmem:[#allocation9 + $0xe0] sm:$0xff]  }
 0x36f   :  { %5633 = vmatpush1.bf16.msra.mxu0 %v7221_v15  ;;  %v5144_v15 = vrot.slane %v8040_v31, %v1685_v45  ;;  %v2550_v48 = vld [vmem:[#allocation6 + $0xf78] sm:$0xff]  ;;  %v7277_v45 = vcombine.low %v2545_v40, %v2549_v41 }
 0x370   :  { %5797 = vmatpush1.bf16.msra.mxu1 %v7223_v49  ;;  %5634 = vmatprep.subr.bf16.mxu0 %v7230_v50  ;;  %v7269_v49 = vcombine.low %v2537_v28, %v2541_v29  ;;  %v7271_v50 = vcombine.low %v2538_v33, %v2542_v4  ;;  %v7280_v44 = vcombine.high %v2546_v46, %v2550_v48  ;;  %7620 = vtanh.f32 %v7458_v53  ;;  %v2562_v37 = vld [vmem:[#allocation6 + $0xfd8] sm:$0xff]  ;;  %v7552_v29 = vld [vmem:[#allocation9 + $0x58] sm:$0xff]  }
 0x371   :  { %5798 = vmatprep.subr.bf16.mxu1 %v7232_v51  ;;  %v7278_v51 = vcombine.high %v2545_v40, %v2549_v41  ;;  %v7460_v57 = vadd.f32 %v8038_v43, %v5144_v15  ;;  %v7295_v7 = vcombine.low %v2562_v37, %v2566_v18  ;;  %v7551_v28 = vld [vmem:[#allocation9 + $0x90] sm:$0xff]   ;;  %v7553_v33 = vld [vmem:[#allocation9 + $0xd8] sm:$0xff]   ;;  %v7558_v40 = vld [vmem:[#allocation9 + $0x20] sm:$0xff]  }
 0x372   :  { %v7554_v4 = vld [vmem:[#allocation9 + $0x18] sm:$0xff]   ;;  %v7560_v15 = vld [vmem:[#allocation9 + $0x68] sm:$0xff]  }
 0x373   :  { %5635 = vmatpush1.bf16.msra.mxu0 %v7229_v58  ;;  %v2554_v58 = vld [vmem:[#allocation6 + $0xf98] sm:$0xff]  ;;  %7622 = vtanh.f32 %v7460_v57  ;;  %v7569_v53 = vld [vmem:[#allocation9 + $0xf8] sm:$0xff]  }
 0x374   :  { %5799 = vmatpush1.bf16.msra.mxu1 %v7231_v21  ;;  %5636 = vmatprep.subr.bf16.mxu0 %v7238_v61  ;;  %v2558_v21 = vld [vmem:[#allocation6 + $0xfb8] sm:$0xff]  ;;  %v7279_v61 = vcombine.low %v2546_v46, %v2550_v48  ;;  %v7561_v46 = vld [vmem:[#allocation9 + $0xe8] sm:$0xff]  }
 0x375   :  { %5800 = vmatprep.subr.bf16.mxu1 %v7240_v3  ;;  %v7286_v3 = vcombine.high %v2553_v54, %v2557_v55  ;;  %v7288_v62 = vcombine.high %v2554_v58, %v2558_v21  ;;  %v7287_v43 = vcombine.low %v2554_v58, %v2558_v21  ;;  %v7563_v48 = vld [vmem:[#allocation9 + $0xa8] sm:$0xff]   ;;  %v7573_v58 = vld [vmem:[#allocation9 + $0x1c0] sm:$0xff]  }
 0x377   :  { %5637 = vmatpush1.bf16.msra.mxu0 %v7237_v6  ;;  %v7285_v6 = vcombine.low %v2553_v54, %v2557_v55  ;;  %v7571_v54 = vld [vmem:[#allocation9 + $0xb8] sm:$0xff]   ;;  %v7572_v55 = vld [vmem:[#allocation9 + $0x140] sm:$0xff]  }
 0x378   :  { %5801 = vmatpush1.bf16.msra.mxu1 %v7239_v52  ;;  %5638 = vmatprep.subr.bf16.mxu0 %v7246_v32  ;;  %v7294_v52 = vcombine.high %v2561_v63, %v2565_v56  ;;  %v7296_v32 = vcombine.high %v2562_v37, %v2566_v18  ;;  %v7578_v37 = vld [vmem:[#allocation9 + $0x108] sm:$0xff]  }
 0x379   :  { %5802 = vmatprep.subr.bf16.mxu1 %v7248_v5  ;;  %v7293_v5 = vcombine.low %v2561_v63, %v2565_v56  ;;  %v7577_v56 = vld [vmem:[#allocation9 + $0x1c8] sm:$0xff]  }
 0x37a   :  { %v7621_v10 = vpop.eup %7620  ;;  %v7579_v18 = vld [vmem:[#allocation9 + $0x188] sm:$0xff]  }
 0x37b   :  { %5639 = vmatpush1.bf16.msra.mxu0 %v7245_v13  ;;  %v7542_v13 = vld [vmem:[#allocation9] sm:$0xff]   ;;  %v5834_v16 = vpack.c.bf16 %v7621_v10, %v7621_v10 }
 0x37c   :  { %5803 = vmatpush1.bf16.msra.mxu1 %v7247_v11  ;;  %5640 = vmatprep.subr.bf16.mxu0 %v7254_v12  ;;  %v7543_v12 = vld [vmem:[#allocation9 + $0x80] sm:$0xff]  }
 0x37d   :  { %5804 = vmatprep.subr.bf16.mxu1 %v7256_v14  ;;  %v7623_v11 = vpop.eup %7622  ;;  %v7544_v14 = vld [vmem:[#allocation9 + $0x48] sm:$0xff]   ;;  %v7588_v10 = vld [vmem:[#allocation9 + $0x160] sm:$0xff]  }
 0x37e   :  { %v5836_v19 = vpack.c.bf16 %v7623_v11, %v7623_v11  ;;  %v7590_v11 = vld [vmem:[#allocation9 + $0x120] sm:$0xff]  }
 0x37f   :  { %5641 = vmatpush1.bf16.msra.mxu0 %v7253_v22  ;;  %v7547_v22 = vld [vmem:[#allocation9 + $0x88] sm:$0xff]  }
 0x380   :  { %5805 = vmatpush1.bf16.msra.mxu1 %v7255_v23  ;;  %5642 = vmatprep.subr.bf16.mxu0 %v7262_v24  ;;  %v7548_v23 = vld [vmem:[#allocation9 + $0x50] sm:$0xff]  }
 0x381   :  { %5806 = vmatprep.subr.bf16.mxu1 %v7264_v25  ;;  %v7549_v24 = vld [vmem:[#allocation9 + $0xd0] sm:$0xff]  }
 0x382   :  { %v7550_v25 = vld [vmem:[#allocation9 + $0x10] sm:$0xff]  }
 0x383   :  { %5643 = vmatpush1.bf16.msra.mxu0 %v7261_v26  ;;  %v5140_v26 = vrot.slane %v8040_v31, %v1681_v59  ;;  %v7562_v59 = vld [vmem:[#allocation9 + $0x28] sm:$0xff]  }
 0x384   :  { %5807 = vmatpush1.bf16.msra.mxu1 %v7263_v36  ;;  %5644 = vmatprep.subr.bf16.mxu0 %v7270_v30  ;;  %v7555_v36 = vld [vmem:[#allocation9 + $0x98] sm:$0xff]   ;;  %v7556_v30 = vld [vmem:[#allocation9 + $0x60] sm:$0xff]  }
 0x385   :  { %5808 = vmatprep.subr.bf16.mxu1 %v7272_v39  ;;  %v7459_v41 = vadd.f32 %v8034_v35, %v5140_v26  ;;  %v7567_v35 = vld [vmem:[#allocation9 + $0xb0] sm:$0xff]   ;;  %v5152_v26 = vrot.slane %v8040_v31, %v1693_v2 }
 0x387   :  { %5645 = vmatpush1.bf16.msra.mxu0 %v7269_v49  ;;  %v7564_v49 = vld [vmem:[#allocation9 + $0x70] sm:$0xff]  }
 0x388   :  { %5809 = vmatpush1.bf16.msra.mxu1 %v7271_v50  ;;  %5646 = vmatprep.subr.bf16.mxu0 %v7278_v51  ;;  %v7566_v50 = vld [vmem:[#allocation9 + $0x30] sm:$0xff]   ;;  %v7568_v51 = vld [vmem:[#allocation9 + $0x78] sm:$0xff]  }
 0x389   :  { %5810 = vmatprep.subr.bf16.mxu1 %v7280_v44  ;;  %v7570_v44 = vld [vmem:[#allocation9 + $0x38] sm:$0xff]  }
 0x38b   :  { %5647 = vmatpush1.bf16.msra.mxu0 %v7277_v45  ;;  %v7574_v45 = vld [vmem:[#allocation9 + $0x100] sm:$0xff]  }
 0x38c   :  { %5811 = vmatpush1.bf16.msra.mxu1 %v7279_v61  ;;  %5648 = vmatprep.subr.bf16.mxu0 %v7286_v3  ;;  %v7575_v3 = vld [vmem:[#allocation9 + $0x180] sm:$0xff]  }
 0x38d   :  { %5812 = vmatprep.subr.bf16.mxu1 %v7288_v62  ;;  %v7576_v62 = vld [vmem:[#allocation9 + $0x148] sm:$0xff]  }
 0x38f   :  { %5649 = vmatpush1.bf16.msra.mxu0 %v7285_v6  ;;  %v7580_v6 = vld [vmem:[#allocation9 + $0x150] sm:$0xff]  }
 0x390   :  { %5813 = vmatpush1.bf16.msra.mxu1 %v7287_v43  ;;  %5650 = vmatprep.subr.bf16.mxu0 %v7294_v52  ;;  %v7581_v43 = vld [vmem:[#allocation9 + $0x1d0] sm:$0xff]  }
 0x391   :  { %5814 = vmatprep.subr.bf16.mxu1 %v7296_v32  ;;  %v7582_v52 = vld [vmem:[#allocation9 + $0x110] sm:$0xff]  }
 0x392   :  { %v7583_v32 = vld [vmem:[#allocation9 + $0x190] sm:$0xff]  }
 0x393   :  { %5651 = vmatpush1.bf16.msra.mxu0 %v7293_v5  ;;  %v7584_v5 = vld [vmem:[#allocation9 + $0x158] sm:$0xff]  }
 0x394   :  { %5815 = vmatpush1.bf16.msra.mxu1 %v7295_v7  ;;  %7361 = vmatprep.subr.bf16.mxu0 %v7540_v9  ;;  %v7585_v7 = vld [vmem:[#allocation9 + $0x1d8] sm:$0xff]  }
 0x395   :  { %7383 = vmatprep.subr.bf16.mxu1 %v7541_v27  ;;  %v7586_v9 = vld [vmem:[#allocation9 + $0x118] sm:$0xff]  }
 0x396   :  { %5653 = vmatmul.mubr.bf16.vlgmr.msra.gmra.mrb[12].mxu0 %v8014_v0  ;;  %v7587_v27 = vld [vmem:[#allocation9 + $0x198] sm:$0xff]  }
 0x397   :  { %5817 = vmatmul.mubr.bf16.vlgmr.msra.gmra.mrb[12].mxu1 %v8014_v0  ;;  %7362 = vmatpush3.bf16.msra.mxu0 %v7542_v13  ;;  %v5132_v0 = vrot.slane %v8040_v31, %v1673_v42  ;;  %v7559_v42 = vld [vmem:[#allocation9 + $0xa0] sm:$0xff]  }
 0x398   :  { %6386 = vmatprep.mubr.bf16.mxu0 %v5834_v16  ;;  %7384 = vmatpush3.bf16.msra.mxu1 %v7543_v12  ;;  %v7589_v13 = vld [vmem:[#allocation9 + $0x1e0] sm:$0xff]   ;;  %v7593_v16 = vld [vmem:[#allocation9 + $0x1e8] sm:$0xff]  }
 0x399   :  { %6426 = vmatprep.mubr.bf16.mxu1 %v5836_v19  ;;  %7363 = vmatprep.subr.bf16.mxu0 %v7544_v14  ;;  %v7457_v39 = vadd.f32 %v8032_v34, %v5132_v0  ;;  %v7565_v34 = vld [vmem:[#allocation9 + $0xf0] sm:$0xff]   ;;  %v7591_v12 = vld [vmem:[#allocation9 + $0x1a0] sm:$0xff]   ;;  %v7592_v14 = vld [vmem:[#allocation9 + $0x168] sm:$0xff]   ;;  %v5148_v0 = vrot.slane %v8040_v31, %v1689_v1 }
 0x39a   :  { %7385 = vmatprep.subr.bf16.mxu1 %v7545_v17  ;;  %v7594_v17 = vld [vmem:[#allocation9 + $0x128] sm:$0xff]  }
 0x39b   :  { %7364 = vmatpush3.bf16.msra.mxu0 %v7546_v20  ;;  %7624 = vtanh.f32 %v7457_v39  ;;  %v7595_v19 = vld [vmem:[#allocation9 + $0x1a8] sm:$0xff]   ;;  %v7596_v20 = vld [vmem:[#allocation9 + $0x170] sm:$0xff]  }
 0x39c   :  { %7386 = vmatpush3.bf16.msra.mxu1 %v7547_v22  ;;  %7365 = vmatprep.subr.bf16.mxu0 %v7548_v23  ;;  %7626 = vtanh.f32 %v7459_v41  ;;  %v7597_v22 = vld [vmem:[#allocation9 + $0x1f0] sm:$0xff]  }
 0x39d   :  { %7387 = vmatprep.subr.bf16.mxu1 %v7549_v24  ;;  %v7598_v23 = vld [vmem:[#allocation9 + $0x130] sm:$0xff]  }
 0x39e   :  { %v7599_v24 = vld [vmem:[#allocation9 + $0x1b0] sm:$0xff]  }
 0x39f   :  { %7366 = vmatpush3.bf16.msra.mxu0 %v7550_v25  ;;  %v7600_v25 = vld [vmem:[#allocation9 + $0x178] sm:$0xff]  }
 0x3a0   :  { %7388 = vmatpush3.bf16.msra.mxu1 %v7551_v28  ;;  %7367 = vmatprep.subr.bf16.mxu0 %v7552_v29  ;;  %v7601_v28 = vld [vmem:[#allocation9 + $0x1f8] sm:$0xff]  }
 0x3a1   :  { %7389 = vmatprep.subr.bf16.mxu1 %v7553_v33  ;;  %v7602_v29 = vld [vmem:[#allocation9 + $0x138] sm:$0xff]  }
 0x3a2   :  { %v7603_v33 = vld [vmem:[#allocation9 + $0x1b8] sm:$0xff]  }
 0x3a3   :  { %7368 = vmatpush3.bf16.msra.mxu0 %v7554_v4  ;;  %v5156_v4 = vrot.slane %v8040_v31, %v1697_v60 }
 0x3a4   :  { %7390 = vmatpush3.bf16.msra.mxu1 %v7555_v36  ;;  %7369 = vmatprep.subr.bf16.mxu0 %v7556_v30  ;;  %v5160_v36 = vrot.slane %v8040_v31, %v1701_v8 }
 0x3a5   :  { %7391 = vmatprep.subr.bf16.mxu1 %v7557_v38  ;;  %v7625_v57 = vpop.eup %7624 }
 0x3a6   :  { %v7627_v21 = vpop.eup %7626  ;;  %v5833_v61 = vpack.c.bf16 %v7625_v57, %v7625_v57 }
 0x3a7   :  { %7370 = vmatpush3.bf16.msra.mxu0 %v7558_v40  ;;  %v5835_v63 = vpack.c.bf16 %v7627_v21, %v7627_v21 }
 0x3a8   :  { %7392 = vmatpush3.bf16.msra.mxu1 %v7559_v42  ;;  %7371 = vmatprep.subr.bf16.mxu0 %v7560_v15 }
 0x3a9   :  { %7393 = vmatprep.subr.bf16.mxu1 %v7561_v46 }
 0x3ab   :  { %7372 = vmatpush3.bf16.msra.mxu0 %v7562_v59 }
 0x3ac   :  { %7394 = vmatpush3.bf16.msra.mxu1 %v7563_v48  ;;  %7373 = vmatprep.subr.bf16.mxu0 %v7564_v49 }
 0x3ad   :  { %7395 = vmatprep.subr.bf16.mxu1 %v7565_v34 }
 0x3af   :  { %7374 = vmatpush3.bf16.msra.mxu0 %v7566_v50 }
 0x3b0   :  { %7396 = vmatpush3.bf16.msra.mxu1 %v7567_v35  ;;  %7375 = vmatprep.subr.bf16.mxu0 %v7568_v51 }
 0x3b1   :  { %7397 = vmatprep.subr.bf16.mxu1 %v7569_v53 }
 0x3b3   :  { %7376 = vmatpush3.bf16.msra.mxu0 %v7570_v44  ;;  %v5969_v44 = vld [vmem:[#allocation10] sm:$0x1] }
 0x3b4   :  { %7398 = vmatpush3.bf16.msra.mxu1 %v7571_v54  ;;  %7405 = vmatprep.subr.bf16.mxu0 %v7572_v55 }
 0x3b5   :  { %7427 = vmatprep.subr.bf16.mxu1 %v7573_v58 }
 0x3b6   :  { %6387 = vmatmul.mubr.bf16.vlgmr.msra.gmra.mrb[16].mxu0 %v5833_v61 }
 0x3b7   :  { %6427 = vmatmul.mubr.bf16.vlgmr.msra.gmra.mrb[16].mxu1 %v5835_v63  ;;  %7406 = vmatpush3.bf16.msra.mxu0 %v7574_v45 }
 0x3b8   :  { %7428 = vmatpush3.bf16.msra.mxu1 %v7575_v3  ;;  %7407 = vmatprep.subr.bf16.mxu0 %v7576_v62 }
 0x3b9   :  { %7429 = vmatprep.subr.bf16.mxu1 %v7577_v56 }
 0x3bb   :  { %7408 = vmatpush3.bf16.msra.mxu0 %v7578_v37 }
 0x3bc   :  { %7430 = vmatpush3.bf16.msra.mxu1 %v7579_v18  ;;  %7409 = vmatprep.subr.bf16.mxu0 %v7580_v6 }
 0x3bd   :  { %7431 = vmatprep.subr.bf16.mxu1 %v7581_v43 }
 0x3bf   :  { %7410 = vmatpush3.bf16.msra.mxu0 %v7582_v52 }
 0x3c0   :  { %7432 = vmatpush3.bf16.msra.mxu1 %v7583_v32  ;;  %7411 = vmatprep.subr.bf16.mxu0 %v7584_v5 }
 0x3c1   :  { %7433 = vmatprep.subr.bf16.mxu1 %v7585_v7 }
 0x3c3   :  { %7412 = vmatpush3.bf16.msra.mxu0 %v7586_v9 }
 0x3c4   :  { %7434 = vmatpush3.bf16.msra.mxu1 %v7587_v27  ;;  %7413 = vmatprep.subr.bf16.mxu0 %v7588_v10 }
 0x3c5   :  { %7435 = vmatprep.subr.bf16.mxu1 %v7589_v13 }
 0x3c7   :  { %7414 = vmatpush3.bf16.msra.mxu0 %v7590_v11 }
 0x3c8   :  { %7436 = vmatpush3.bf16.msra.mxu1 %v7591_v12  ;;  %7415 = vmatprep.subr.bf16.mxu0 %v7592_v14 }
 0x3c9   :  { %7437 = vmatprep.subr.bf16.mxu1 %v7593_v16 }
 0x3cb   :  { %7416 = vmatpush3.bf16.msra.mxu0 %v7594_v17 }
 0x3cc   :  { %7438 = vmatpush3.bf16.msra.mxu1 %v7595_v19  ;;  %7417 = vmatprep.subr.bf16.mxu0 %v7596_v20 }
 0x3cd   :  { %7439 = vmatprep.subr.bf16.mxu1 %v7597_v22 }
 0x3cf   :  { %7418 = vmatpush3.bf16.msra.mxu0 %v7598_v23 }
 0x3d0   :  { %7440 = vmatpush3.bf16.msra.mxu1 %v7599_v24  ;;  %7419 = vmatprep.subr.bf16.mxu0 %v7600_v25 }
 0x3d1   :  { %7441 = vmatprep.subr.bf16.mxu1 %v7601_v28 }
 0x3d3   :  { %7420 = vmatpush3.bf16.msra.mxu0 %v7602_v29 }
 0x3d4   :  { %7442 = vmatpush3.bf16.msra.mxu1 %v7603_v33 }
 0x469   :  { %v5654_v30 = vpop.f32.mrb[12].mxu0 }
 0x46a   :  { %v7461_v38 = vadd.f32 %v5654_v30, %v5148_v0  ;;  %v5818_v39 = vpop.f32.mrb[12].mxu1  ;;  %v5656_v40 = vpop.f32.mrb[13].mxu0 }
 0x46b   :  { %v7463_v41 = vadd.f32 %v5818_v39, %v5156_v4  ;;  %v7462_v42 = vadd.f32 %v5656_v40, %v5152_v26  ;;  %v5820_v15 = vpop.f32.mrb[13].mxu1  ;;  %v5658_v1 = vpop.f32.mrb[14].mxu0 }
 0x46c   :  { %7628 = vtanh.f32 %v7461_v38  ;;  %v7464_v46 = vadd.f32 %v5820_v15, %v5160_v36  ;;  %v5822_v59 = vpop.f32.mrb[14].mxu1  ;;  %v5659_v60 = vpop.f32.mrb[15].mxu0 }
 0x46d   :  { %7630 = vtanh.f32 %v7463_v41  ;;  %v5823_v48 = vpop.f32.mrb[15].mxu1 }
 0x46e   :  { %7632 = vtanh.f32 %v7462_v42 }
 0x46f   :  { %7634 = vtanh.f32 %v7464_v46 }
 0x476   :  { %v7629_v2 = vpop.eup %7628 }
 0x477   :  { %v7631_v47 = vpop.eup %7630  ;;  %v5837_v34 = vpack.c.bf16 %v7629_v2, %v7629_v2 }
 0x478   :  { %v7633_v49 = vpop.eup %7632  ;;  %v5839_v35 = vpack.c.bf16 %v7631_v47, %v7631_v47 }
 0x479   :  { %v7635_v8 = vpop.eup %7634  ;;  %v5838_v31 = vpack.c.bf16 %v7633_v49, %v7633_v49 }
 0x47a   :  { %v5840_v50 = vpack.c.bf16 %v7635_v8, %v7635_v8 }
 0x47b   :  { %6466 = vmatprep.mubr.bf16.mxu0 %v5838_v31 }
 0x47c   :  { %6506 = vmatprep.mubr.bf16.mxu1 %v5840_v50  ;;  %6467 = vmatmul.mubr.bf16.vlgmr.msra.gmra.mrb[20].mxu0 %v5837_v34 }
 0x47d   :  { %6507 = vmatmul.mubr.bf16.vlgmr.msra.gmra.mrb[20].mxu1 %v5839_v35 }
 0x489   :  { %v7377_v51 = vpop.f32.mrb[16].mxu0 }
 0x48a   :  { %v7399_v53 = vpop.f32.mrb[16].mxu1  ;;  %v7378_v54 = vpop.f32.mrb[17].mxu0 }
 0x48b   :  { %v7379_v55 = vadd.f32 %v7378_v54, %v7377_v51  ;;  %v7400_v57 = vpop.f32.mrb[17].mxu1  ;;  %v7380_v58 = vpop.f32.mrb[18].mxu0 }
 0x48c   :  { %v7401_v21 = vadd.f32 %v7400_v57, %v7399_v53  ;;  %v7402_v45 = vpop.f32.mrb[18].mxu1  ;;  %v7381_v61 = vpop.f32.mrb[19].mxu0 }
 0x48d   :  { %v6389_v3 = vadd.f32 %v7379_v55, %v5969_v44  ;;  %v7403_v62 = vpop.f32.mrb[19].mxu1 }
 0x48f   :  { %v6429_v63 = vadd.f32 %v7401_v21, %v6389_v3 }
 0x54f   :  { %v7421_v56 = vpop.f32.mrb[20].mxu0 }
 0x550   :  { %v7443_v37 = vpop.f32.mrb[20].mxu1  ;;  %v7422_v18 = vpop.f32.mrb[21].mxu0 }
 0x551   :  { %v7423_v6 = vadd.f32 %v7422_v18, %v7421_v56  ;;  %v7444_v43 = vpop.f32.mrb[21].mxu1  ;;  %v7424_v52 = vpop.f32.mrb[22].mxu0 }
 0x552   :  { %v7445_v32 = vadd.f32 %v7444_v43, %v7443_v37  ;;  %v7446_v5 = vpop.f32.mrb[22].mxu1  ;;  %v7425_v7 = vpop.f32.mrb[23].mxu0 }
 0x553   :  { %v6469_v9 = vadd.f32 %v7423_v6, %v6429_v63  ;;  %v7447_v27 = vpop.f32.mrb[23].mxu1 }
 0x555   :  { %v6509_v10 = vadd.f32 %v7445_v32, %v6469_v9 }
 0x557   :  { %v6514_v13 = vsub.f32 0.0, %v6509_v10 }
 0x559   :  { %v6515_v11 = vmul.f32 1.442695, %v6514_v13 }
 0x55b   :  { %7636 = vpow2.f32 %v6515_v11 }
 0x565   :  { %v7637_v12 = vpop.eup %7636 }
 0x566   :  { %v6517_v14 = vadd.f32 1.0, %v7637_v12 }
 0x568   :  { %7638 = vrcp.f32 %v6517_v14 }
 0x572   :  { %v7639_v16 = vpop.eup %7638 }
 0x573   :  { %6519 = vst [vmem:[%s8082_s7] sm:$0x1] %v7639_v16 }
 0x574   :  { %6524 = vsyncpa [#allocation3], 1 }
 0x575   :  { %6525 = vsyncpa [#allocation5], 1 }
 0x576   :  { %6526 = vsyncpa [#allocation8], 1 }
 0x577   :  { %6527 = vsyncpa [#allocation11], 1 }

</bundles_post_ra>
